<compile_context>
chip_gen: v5e
topology: v5e:2x2
jax: 0.10.0
libtpu: 0.0.40
codegen_flags: <defaults>
</compile_context>

<pallas_src>
import jax
import jax.numpy as jnp
from jax.experimental import pallas as pl
from jax.experimental.pallas import tpu as pltpu

EPS = 1e-5


def _bn_relu_kernel(x_ref, g_ref, b_ref, o_ref):
    # x_ref: (TC, L)  -- TC channels, L = N*H*W elements per channel
    # g_ref, b_ref: (TC, 1) affine params
    x = x_ref[...].astype(jnp.float32)
    L = x_ref.shape[1]
    inv_n = jnp.float32(1.0 / L)

    # Single-pass batch statistics (training-mode BN: biased variance).
    s1 = jnp.sum(x, axis=1, keepdims=True)
    s2 = jnp.sum(x * x, axis=1, keepdims=True)
    mean = s1 * inv_n
    var = jnp.maximum(s2 * inv_n - mean * mean, 0.0)
    inv_std = jax.lax.rsqrt(var + EPS)

    # Fold affine params into per-channel scale/shift (cheap: (TC, 1) math).
    scale = g_ref[...] * inv_std
    shift = b_ref[...] - mean * scale

    # Normalize + affine + ReLU in one full-tile FMA + max.
    y = x * scale + shift
    o_ref[...] = jnp.maximum(y, 0.0).astype(o_ref.dtype)


def batchnorm_relu(x_nchw, gamma, beta, *, tile_c=512):
    """x_nchw: (N, C, H, W) float32; gamma/beta: (C,) float32."""
    N, C, H, W = x_nchw.shape
    L = N * H * W
    assert C % tile_c == 0, "channel count must be divisible by tile_c"

    # (N, C, H, W) -> (C, N*H*W). For N == 1 this is a free reshape.
    # TODO(synk): for N > 1 this transpose is a full HBM round trip; a
    # (C, N, H*W) layout with an 'arbitrary' grid axis over N would avoid it.
    x_cl = jnp.transpose(x_nchw, (1, 0, 2, 3)).reshape(C, L)
    g2 = gamma.reshape(C, 1).astype(jnp.float32)
    b2 = beta.reshape(C, 1).astype(jnp.float32)

    out_cl = pl.pallas_call(
        _bn_relu_kernel,
        out_shape=jax.ShapeDtypeStruct((C, L), x_cl.dtype),
        grid_spec=pltpu.PrefetchScalarGridSpec(
            num_scalar_prefetch=0,
            grid=(C // tile_c,),
            in_specs=[
                pl.BlockSpec((tile_c, L), lambda i: (i, 0)),
                pl.BlockSpec((tile_c, 1), lambda i: (i, 0)),
                pl.BlockSpec((tile_c, 1), lambda i: (i, 0)),
            ],
            out_specs=pl.BlockSpec((tile_c, L), lambda i: (i, 0)),
        ),
        compiler_params=pltpu.CompilerParams(
            dimension_semantics=("parallel",)
        ),
    )(x_cl, g2, b2)

    # (C, N*H*W) -> (N, C, H, W)
    return jnp.transpose(out_cl.reshape(C, N, H, W), (1, 0, 2, 3))


def _reference(x_nchw, gamma, beta):
    mean = jnp.mean(x_nchw, axis=(0, 2, 3), keepdims=True)
    var = jnp.mean((x_nchw - mean) ** 2, axis=(0, 2, 3), keepdims=True)
    y = (x_nchw - mean) * jax.lax.rsqrt(var + EPS)
    y = y * gamma.reshape(1, -1, 1, 1) + beta.reshape(1, -1, 1, 1)
    return jnp.maximum(y, 0.0)


if __name__ == "__main__":
    key = jax.random.PRNGKey(0)
    kx, kg, kb = jax.random.split(key, 3)

    # Same shape as the PyTorch module's input: [1, 1024, 14, 14]
    N, C, H, W = 1, 1024, 14, 14
    x = jax.random.normal(kx, (N, C, H, W), dtype=jnp.float32)

    # Deterministic affine parameters (PyTorch default init is gamma=1,
    # beta=0; perturb them deterministically so the affine path is exercised).
    gamma = 1.0 + 0.1 * jax.random.normal(kg, (C,), dtype=jnp.float32)
    beta = 0.1 * jax.random.normal(kb, (C,), dtype=jnp.float32)

    out = batchnorm_relu(x, gamma, beta)
    out = jax.block_until_ready(out)

    ref = _reference(x, gamma, beta)
    assert out.shape == (N, C, H, W)
    assert jnp.allclose(out, ref, atol=1e-4, rtol=1e-4), "mismatch vs reference"

    print("KERNEL_OK")
</pallas_src>

<mosaic_0001>
module attributes {stable_mosaic.version = 11 : i64} {
  func.func @_bn_relu_kernel(%arg0: i32, %arg1: memref<512x196xf32, #tpu.memory_space<vmem>>, %arg2: memref<512x1xf32, #tpu.memory_space<vmem>>, %arg3: memref<512x1xf32, #tpu.memory_space<vmem>>, %arg4: memref<512x196xf32, #tpu.memory_space<vmem>>) attributes {dimension_semantics = [#tpu.dimension_semantics<parallel>], iteration_bounds = array<i64: 2>, scalar_prefetch = 0 : i64, scratch_operands = 0 : i64, tpu.core_type = #tpu.core_type<tc>, window_params = [{transform_indices = @transform_0, window_bounds = array<i64: 512, 196>}, {transform_indices = @transform_1, window_bounds = array<i64: 512, 1>}, {transform_indices = @transform_2, window_bounds = array<i64: 512, 1>}, {transform_indices = @transform_3, window_bounds = array<i64: 512, 196>}]} {
    %c0 = arith.constant 0 : index
    %c0_0 = arith.constant 0 : index
    %0 = vector.load %arg1[%c0, %c0_0] : memref<512x196xf32, #tpu.memory_space<vmem>>, vector<512x196xf32>
    %cst = arith.constant dense<0.000000e+00> : vector<512xf32>
    %1 = vector.multi_reduction <add>, %0, %cst [1] : vector<512x196xf32> to vector<512xf32>
    %2 = vector.shape_cast %1 : vector<512xf32> to vector<512x1xf32>
    %3 = arith.mulf %0, %0 : vector<512x196xf32>
    %cst_1 = arith.constant dense<0.000000e+00> : vector<512xf32>
    %4 = vector.multi_reduction <add>, %3, %cst_1 [1] : vector<512x196xf32> to vector<512xf32>
    %5 = vector.shape_cast %4 : vector<512xf32> to vector<512x1xf32>
    %cst_2 = arith.constant 0.00510204071 : f32
    %6 = vector.broadcast %cst_2 : f32 to vector<512x1xf32>
    %7 = arith.mulf %2, %6 : vector<512x1xf32>
    %cst_3 = arith.constant 0.00510204071 : f32
    %8 = vector.broadcast %cst_3 : f32 to vector<512x1xf32>
    %9 = arith.mulf %5, %8 : vector<512x1xf32>
    %10 = arith.mulf %7, %7 : vector<512x1xf32>
    %11 = arith.subf %9, %10 : vector<512x1xf32>
    %cst_4 = arith.constant 0.000000e+00 : f32
    %12 = vector.broadcast %cst_4 : f32 to vector<512x1xf32>
    %13 = arith.maximumf %11, %12 : vector<512x1xf32>
    %cst_5 = arith.constant 9.99999974E-6 : f32
    %14 = vector.broadcast %cst_5 : f32 to vector<512x1xf32>
    %15 = arith.addf %13, %14 : vector<512x1xf32>
    %16 = math.rsqrt %15 : vector<512x1xf32>
    %c0_6 = arith.constant 0 : index
    %c0_7 = arith.constant 0 : index
    %17 = vector.load %arg2[%c0_6, %c0_7] : memref<512x1xf32, #tpu.memory_space<vmem>>, vector<512x1xf32>
    %18 = arith.mulf %17, %16 : vector<512x1xf32>
    %c0_8 = arith.constant 0 : index
    %c0_9 = arith.constant 0 : index
    %19 = vector.load %arg3[%c0_8, %c0_9] : memref<512x1xf32, #tpu.memory_space<vmem>>, vector<512x1xf32>
    %20 = arith.mulf %7, %18 : vector<512x1xf32>
    %21 = arith.subf %19, %20 : vector<512x1xf32>
    %22 = vector.broadcast %18 : vector<512x1xf32> to vector<512x196xf32>
    %23 = arith.mulf %0, %22 : vector<512x196xf32>
    %24 = vector.broadcast %21 : vector<512x1xf32> to vector<512x196xf32>
    %25 = arith.addf %23, %24 : vector<512x196xf32>
    %cst_10 = arith.constant 0.000000e+00 : f32
    %26 = vector.broadcast %cst_10 : f32 to vector<512x196xf32>
    %27 = arith.maximumf %25, %26 : vector<512x196xf32>
    %c0_11 = arith.constant 0 : index
    %c0_12 = arith.constant 0 : index
    %28 = vector.load %arg4[%c0_11, %c0_12] : memref<512x196xf32, #tpu.memory_space<vmem>>, vector<512x196xf32>
    tpu.vector_store %arg4[%c0_11, %c0_12], %27 {strides = array<i32>} : memref<512x196xf32, #tpu.memory_space<vmem>>, vector<512x196xf32>,
    return
  }
  func.func @transform_0(%arg0: i32) -> (i32, i32) {
    %c0_i32 = arith.constant 0 : i32
    %c0_i32_0 = arith.constant 0 : i32
    return %arg0, %c0_i32 : i32, i32
  }
  func.func @transform_1(%arg0: i32) -> (i32, i32) {
    %c0_i32 = arith.constant 0 : i32
    %c0_i32_0 = arith.constant 0 : i32
    return %arg0, %c0_i32 : i32, i32
  }
  func.func @transform_2(%arg0: i32) -> (i32, i32) {
    %c0_i32 = arith.constant 0 : i32
    %c0_i32_0 = arith.constant 0 : i32
    return %arg0, %c0_i32 : i32, i32
  }
  func.func @transform_3(%arg0: i32) -> (i32, i32) {
    %c0_i32 = arith.constant 0 : i32
    %c0_i32_0 = arith.constant 0 : i32
    return %arg0, %c0_i32 : i32, i32
  }
}

</mosaic_0001>

<bundles_post_ra>
// kernel: tpu_custom_call.1
= control target key start
LH: loop header
LB: loop body
LE: loop exit
PB: predicated region body
PF: predicated region fallthrough
CT: control target
= control target key end

     0   :  { %s3886_s12 = smov 0   ;;  %s7934_s0 = inlined_call_operand.vmem [shape: f32[1024,196], index: 0, kind: input, shape index: {}]   ;;  %s7935_s1 = inlined_call_operand.vmem [shape: f32[1024,1], index: 1, kind: input, shape index: {}]   ;;  %s7936_s2 = inlined_call_operand.vmem [shape: f32[1024,1], index: 2, kind: input, shape index: {}]   ;;  %s7937_s3 = inlined_call_operand.vmem [shape: f32[1024,196], index: 3, kind: output, shape index: {}]  }
   0x1 LB: > { %s3570_s13 = sadd.s32 4294967295, %s3863_s12   ;;  %p3574_p0 = scmp.ge.s32.totalorder %s3863_s12, 1  ;;  %s3863_s12 = sphi %s3886_s12, %s13_s12  }
   0x2   : > { %p161_p1 = scmp.lt.s32.totalorder %s3863_s12, 3 }
   0x4   : > { %p162_p2 = pnand %p3574_p0, %p161_p1 }
   0x6   : > { %165 = sbr.rel (%p162_p2) target bundleno = 907 (0x38b), region = 32 }
   0xb   : > { %s3575_s14 = sshll.u32 %s3570_s13, 6  ;;  %vm351_vm0 = vcmask 556032  }
   0xc   : > { %p198_p3 = scmp.lt.s32.totalorder %s3575_s14, 127 }
   0xe   : > { %s8836_s14 = smov (!%p198_p3, %s3575_s14), 127 }
   0xf   : > { %s3587_s15 = sshll.u32 %s8836_s14, 4  ;;  %s3579_s19 = sshll.u32 %s8836_s14, 3 }
  0x10   : > { %s3902_s18 = scalar_lea.vmem %s7934_s0, %s3587_s15  ;;  %s5306_s22 = scalar_lea.vmem %s7935_s1, %s3579_s19 }
  0x11   : > { %v3905_v0 = vld [vmem:[%s3902_s18 + $0x40] sm:$0xff]  ;;  %v3908_v1 = vld [vmem:[%s3902_s18 + $0x48] sm:$0xff]  ;;  %v3930_v10 = vld [vmem:[%s3902_s18 + $0x58] sm:$0xff]  ;;  %s7167_s25 = scalar_lea.vmem %s7936_s2, %s3579_s19  ;;  %s7416_s28 = scalar_lea.vmem %s7937_s3, %s3587_s15 }
  0x12   : > { %v3911_v2 = vld [vmem:[%s3902_s18 + $0x20] sm:$0xff]  ;;  %v368_v3 = vsel %vm351_vm0, %v3908_v1, 0.0  ;;  %v3916_v4 = vld [vmem:[%s3902_s18 + $0x28] sm:$0xff]  ;;  %v3935_v13 = vld [vmem:[%s3902_s18 + $0x38] sm:$0xff]  ;;  %v372_v16 = vsel %vm351_vm0, %v3930_v10, 0.0 }
  0x13   : > { %v3919_v5 = vld [vmem:[%s3902_s18] sm:$0xff]  ;;  %v3922_v6 = vld [vmem:[%s3902_s18 + $0x8] sm:$0xff]  ;;  %v369_v7 = vadd.f32 %v368_v3, %v3905_v0  ;;  %v360_v8 = vsel %vm351_vm0, %v3916_v4, 0.0  ;;  %v3938_v14 = vld [vmem:[%s3902_s18 + $0x18] sm:$0xff]  ;;  %v364_v18 = vsel %vm351_vm0, %v3935_v13, 0.0 }
  0x14   : > { %v352_v9 = vsel %vm351_vm0, %v3922_v6, 0.0  ;;  %v361_v11 = vadd.f32 %v360_v8, %v3911_v2  ;;  %v3941_v15 = vld [vmem:[%s3902_s18 + $0x50] sm:$0xff]  ;;  %v356_v20 = vsel %vm351_vm0, %v3938_v14, 0.0  ;;  %v3959_v24 = vld [vmem:[%s3902_s18 + $0x88] sm:$0xff]  ;;  %v3962_v25 = vld [vmem:[%s3902_s18 + $0x78] sm:$0xff] }
  0x15   : > { %v353_v12 = vadd.f32 %v352_v9, %v3919_v5  ;;  %370 = vadd.xlane.f32.xlu2 %v369_v7  ;;  %v3946_v17 = vld [vmem:[%s3902_s18 + $0x30] sm:$0xff]  ;;  %v373_v21 = vadd.f32 %v372_v16, %v3941_v15  ;;  %v3965_v26 = vld [vmem:[%s3902_s18 + $0x68] sm:$0xff]  ;;  %v3968_v27 = vld [vmem:[%s3902_s18 + $0x80] sm:$0xff]  ;;  %v384_v28 = vsel %vm351_vm0, %v3959_v24, 0.0  ;;  %v380_v30 = vsel %vm351_vm0, %v3962_v25, 0.0 }
  0x16   : > { %362 = vadd.xlane.f32.xlu1 %v361_v11  ;;  %v3951_v19 = vld [vmem:[%s3902_s18 + $0x10] sm:$0xff]  ;;  %v365_v22 = vadd.f32 %v364_v18, %v3946_v17  ;;  %v3978_v31 = vld [vmem:[%s3902_s18 + $0x60] sm:$0xff]  ;;  %v376_v32 = vsel %vm351_vm0, %v3965_v26, 0.0  ;;  %v385_v33 = vadd.f32 %v384_v28, %v3968_v27  ;;  %v3986_v36 = vld [vmem:[%s3902_s18 + $0xb8] sm:$0xff] }
  0x17   : > { %354 = vadd.xlane.f32.xlu0 %v353_v12  ;;  %v357_v23 = vadd.f32 %v356_v20, %v3951_v19  ;;  %v3973_v29 = vld [vmem:[%s3902_s18 + $0x70] sm:$0xff]  ;;  %v377_v35 = vadd.f32 %v376_v32, %v3978_v31  ;;  %v3989_v37 = vld [vmem:[%s3902_s18 + $0xa8] sm:$0xff]  ;;  %v3992_v38 = vld [vmem:[%s3902_s18 + $0x98] sm:$0xff]  ;;  %v396_v40 = vsel %vm351_vm0, %v3986_v36, 0.0 }
  0x18   : > { %v381_v34 = vadd.f32 %v380_v30, %v3973_v29  ;;  %v3995_v39 = vld [vmem:[%s3902_s18 + $0xb0] sm:$0xff]  ;;  %v4000_v41 = vld [vmem:[%s3902_s18 + $0xa0] sm:$0xff]  ;;  %v392_v42 = vsel %vm351_vm0, %v3989_v37, 0.0  ;;  %v388_v44 = vsel %vm351_vm0, %v3992_v38, 0.0  ;;  %v4013_v48 = vld [vmem:[%s3902_s18 + $0xe8] sm:$0xff] }
  0x19   : > { %v4005_v43 = vld [vmem:[%s3902_s18 + $0x90] sm:$0xff]  ;;  %v397_v45 = vadd.f32 %v396_v40, %v3995_v39  ;;  %v393_v46 = vadd.f32 %v392_v42, %v4000_v41  ;;  %v4016_v49 = vld [vmem:[%s3902_s18 + $0xd8] sm:$0xff]  ;;  %v4019_v50 = vld [vmem:[%s3902_s18 + $0xc8] sm:$0xff]  ;;  %v408_v52 = vsel %vm351_vm0, %v4013_v48, 0.0 }
  0x1a   : > { %v389_v47 = vadd.f32 %v388_v44, %v4005_v43  ;;  %v4022_v51 = vld [vmem:[%s3902_s18 + $0xe0] sm:$0xff]  ;;  %v4027_v53 = vld [vmem:[%s3902_s18 + $0xd0] sm:$0xff]  ;;  %v404_v54 = vsel %vm351_vm0, %v4016_v49, 0.0  ;;  %v400_v56 = vsel %vm351_vm0, %v4019_v50, 0.0  ;;  %v4040_v60 = vld [vmem:[%s3902_s18 + $0x118] sm:$0xff] }
  0x1b   : > { %v4032_v55 = vld [vmem:[%s3902_s18 + $0xc0] sm:$0xff]  ;;  %v409_v57 = vadd.f32 %v408_v52, %v4022_v51  ;;  %v405_v58 = vadd.f32 %v404_v54, %v4027_v53  ;;  %v4043_v61 = vld [vmem:[%s3902_s18 + $0x108] sm:$0xff]  ;;  %v4046_v62 = vld [vmem:[%s3902_s18 + $0xf8] sm:$0xff]  ;;  %v420_v3 = vsel %vm351_vm0, %v4040_v60, 0.0 }
  0x1c   : > { %v401_v59 = vadd.f32 %v400_v56, %v4032_v55  ;;  %v4049_v63 = vld [vmem:[%s3902_s18 + $0x110] sm:$0xff]  ;;  %v4054_v7 = vld [vmem:[%s3902_s18 + $0x100] sm:$0xff]  ;;  %v416_v8 = vsel %vm351_vm0, %v4043_v61, 0.0  ;;  %v412_v11 = vsel %vm351_vm0, %v4046_v62, 0.0  ;;  %v4067_v20 = vld [vmem:[%s3902_s18 + $0x148] sm:$0xff] }
  0x1d   : > { %374 = vadd.xlane.f32.xlu2 %v373_v21  ;;  %v4059_v9 = vld [vmem:[%s3902_s18 + $0xf0] sm:$0xff]  ;;  %v421_v12 = vadd.f32 %v420_v3, %v4049_v63  ;;  %v417_v16 = vadd.f32 %v416_v8, %v4054_v7  ;;  %v4070_v21 = vld [vmem:[%s3902_s18 + $0x138] sm:$0xff]  ;;  %v432_v28 = vsel %vm351_vm0, %v4067_v20, 0.0  ;;  %v4108_v54 = vld [vmem:[%s3902_s18 + $0x160] sm:$0xff] }
  0x1e   : > { %366 = vadd.xlane.f32.xlu1 %v365_v22  ;;  %v413_v18 = vadd.f32 %v412_v11, %v4059_v9  ;;  %v4073_v22 = vld [vmem:[%s3902_s18 + $0x128] sm:$0xff]  ;;  %v4081_v30 = vld [vmem:[%s3902_s18 + $0x130] sm:$0xff]  ;;  %v428_v32 = vsel %vm351_vm0, %v4070_v21, 0.0  ;;  %v4094_v44 = vld [vmem:[%s3902_s18 + $0x178] sm:$0xff] }
  0x1f   : > { %358 = vadd.xlane.f32.xlu0 %v357_v23  ;;  %v4076_v23 = vld [vmem:[%s3902_s18 + $0x140] sm:$0xff]  ;;  %v429_v40 = vadd.f32 %v428_v32, %v4081_v30  ;;  %8153 = vst [vmem:[#allocation2_spill] sm:$0xff] %v4094_v44  ;;  %v444_v52 = vsel %vm351_vm0, %v4094_v44, 0.0  ;;  %v4121_v11 = vld [vmem:[%s3902_s18 + $0x1a8] sm:$0xff]  ;;  %v4135_v32 = vld [vmem:[%s3902_s18 + $0x190] sm:$0xff] }
  0x20   : > { %8155 = vst [vmem:[#allocation4_spill] sm:$0xff] %v4121_v11  ;;  %v4349_v44 = vld [vmem:[%s3902_s18 + $0x308] sm:$0xff] }
  0x21   : > { %8157 = vst [vmem:[#allocation6_spill] sm:$0xff] %v4135_v32 }
  0x22   : > { %8206 = vst [vmem:[#allocation55_spill] sm:$0xff] %v4349_v44 }
  0x25   : > { %386 = vadd.xlane.f32.xlu2 %v385_v33  ;;  %v4086_v33 = vld [vmem:[%s3902_s18 + $0x120] sm:$0xff] }
  0x26   : > { %382 = vadd.xlane.f32.xlu1 %v381_v34  ;;  %v424_v34 = vsel %vm351_vm0, %v4073_v22, 0.0 }
  0x27   : > { %378 = vadd.xlane.f32.xlu0 %v377_v35  ;;  %v433_v35 = vadd.f32 %v432_v28, %v4076_v23  ;;  %v425_v42 = vadd.f32 %v424_v34, %v4086_v33  ;;  %v456_v28 = vsel %vm351_vm0, %v4121_v11, 0.0 }
  0x2d   : > { %398 = vadd.xlane.f32.xlu2 %v397_v45  ;;  %v4097_v45 = vld [vmem:[%s3902_s18 + $0x168] sm:$0xff] }
  0x2e   : > { %394 = vadd.xlane.f32.xlu1 %v393_v46  ;;  %v4100_v46 = vld [vmem:[%s3902_s18 + $0x158] sm:$0xff]  ;;  %v440_v56 = vsel %vm351_vm0, %v4097_v45, 0.0 }
  0x2f   : > { %390 = vadd.xlane.f32.xlu0 %v389_v47  ;;  %v4103_v47 = vld [vmem:[%s3902_s18 + $0x170] sm:$0xff]  ;;  %v441_v3 = vadd.f32 %v440_v56, %v4108_v54 }
  0x30   : > { %8154 = vst [vmem:[#allocation3_spill] sm:$0xff] %v4103_v47 }
  0x35   : > { %410 = vadd.xlane.f32.xlu2 %v409_v57  ;;  %v4113_v57 = vld [vmem:[%s3902_s18 + $0x150] sm:$0xff] }
  0x36   : > { %406 = vadd.xlane.f32.xlu1 %v405_v58  ;;  %v436_v58 = vsel %vm351_vm0, %v4100_v46, 0.0 }
  0x37   : > { %402 = vadd.xlane.f32.xlu0 %v401_v59  ;;  %v445_v59 = vadd.f32 %v444_v52, %v4103_v47  ;;  %v437_v8 = vadd.f32 %v436_v58, %v4113_v57  ;;  %v4148_v58 = vld [vmem:[%s3902_s18 + $0x1d8] sm:$0xff] }
  0x38   : > { %8159 = vst [vmem:[#allocation8_spill] sm:$0xff] %v4148_v58  ;;  %v4178_v47 = vld [vmem:[%s3902_s18 + $0x1f8] sm:$0xff] }
  0x39   : > { %8166 = vst [vmem:[#allocation15_spill] sm:$0xff] %v4178_v47 }
  0x3d   : > { %422 = vadd.xlane.f32.xlu2 %v421_v12  ;;  %v4124_v12 = vld [vmem:[%s3902_s18 + $0x198] sm:$0xff] }
  0x3e   : > { %418 = vadd.xlane.f32.xlu1 %v417_v16  ;;  %v4127_v16 = vld [vmem:[%s3902_s18 + $0x188] sm:$0xff]  ;;  %v452_v34 = vsel %vm351_vm0, %v4124_v12, 0.0 }
  0x3f   : > { %414 = vadd.xlane.f32.xlu0 %v413_v18  ;;  %v4130_v18 = vld [vmem:[%s3902_s18 + $0x1a0] sm:$0xff]  ;;  %v453_v52 = vadd.f32 %v452_v34, %v4135_v32  ;;  %v4346_v32 = vld [vmem:[%s3902_s18 + $0x318] sm:$0xff] }
  0x40   : > { %8156 = vst [vmem:[#allocation5_spill] sm:$0xff] %v4130_v18  ;;  %v4162_v34 = vld [vmem:[%s3902_s18 + $0x1c0] sm:$0xff] }
  0x41   : > { %8163 = vst [vmem:[#allocation12_spill] sm:$0xff] %v4162_v34 }
  0x42   : > { %8205 = vst [vmem:[#allocation54_spill] sm:$0xff] %v4346_v32 }
  0x45   : > { %434 = vadd.xlane.f32.xlu2 %v433_v35  ;;  %v4140_v35 = vld [vmem:[%s3902_s18 + $0x180] sm:$0xff] }
  0x46   : > { %430 = vadd.xlane.f32.xlu1 %v429_v40  ;;  %8158 = vst [vmem:[#allocation7_spill] sm:$0xff] %v4140_v35  ;;  %v448_v40 = vsel %vm351_vm0, %v4127_v16, 0.0 }
  0x47   : > { %426 = vadd.xlane.f32.xlu0 %v425_v42  ;;  %v457_v42 = vadd.f32 %v456_v28, %v4130_v18  ;;  %v449_v56 = vadd.f32 %v448_v40, %v4140_v35  ;;  %v468_v28 = vsel %vm351_vm0, %v4148_v58, 0.0  ;;  %v4167_v18 = vld [vmem:[%s3902_s18 + $0x1b0] sm:$0xff]  ;;  %v4175_v58 = vld [vmem:[%s3902_s18 + $0x208] sm:$0xff]  ;;  %v4316_v35 = vld [vmem:[%s3902_s18 + $0x2d8] sm:$0xff] }
  0x48   : > { %8164 = vst [vmem:[#allocation13_spill] sm:$0xff] %v4167_v18 }
  0x49   : > { %8165 = vst [vmem:[#allocation14_spill] sm:$0xff] %v4175_v58 }
  0x4a   : > { %8197 = vst [vmem:[#allocation46_spill] sm:$0xff] %v4316_v35 }
  0x4d   : > { %446 = vadd.xlane.f32.xlu2 %v445_v59  ;;  %v4151_v59 = vld [vmem:[%s3902_s18 + $0x1c8] sm:$0xff] }
  0x4e   : > { %442 = vadd.xlane.f32.xlu1 %v441_v3  ;;  %8160 = vst [vmem:[#allocation9_spill] sm:$0xff] %v4151_v59  ;;  %v4154_v3 = vld [vmem:[%s3902_s18 + $0x1b8] sm:$0xff]  ;;  %v464_v40 = vsel %vm351_vm0, %v4151_v59, 0.0  ;;  %v4181_v59 = vld [vmem:[%s3902_s18 + $0x1e8] sm:$0xff] }
  0x4f   : > { %438 = vadd.xlane.f32.xlu0 %v437_v8  ;;  %8161 = vst [vmem:[#allocation10_spill] sm:$0xff] %v4154_v3  ;;  %v4157_v8 = vld [vmem:[%s3902_s18 + $0x1d0] sm:$0xff] }
  0x50   : > { %8162 = vst [vmem:[#allocation11_spill] sm:$0xff] %v4157_v8 }
  0x51   : > { %8167 = vst [vmem:[#allocation16_spill] sm:$0xff] %v4181_v59 }
  0x55   : > { %458 = vadd.xlane.f32.xlu2 %v457_v42  ;;  %v460_v42 = vsel %vm351_vm0, %v4154_v3, 0.0  ;;  %v4184_v3 = vld [vmem:[%s3902_s18 + $0x200] sm:$0xff] }
  0x56   : > { %454 = vadd.xlane.f32.xlu1 %v453_v52  ;;  %v469_v52 = vadd.f32 %v468_v28, %v4157_v8  ;;  %v461_v11 = vadd.f32 %v460_v42, %v4167_v18  ;;  %8168 = vst [vmem:[#allocation17_spill] sm:$0xff] %v4184_v3  ;;  %v480_v28 = vsel %vm351_vm0, %v4175_v58, 0.0  ;;  %v476_v42 = vsel %vm351_vm0, %v4178_v47, 0.0  ;;  %v4194_v8 = vld [vmem:[%s3902_s18 + $0x1e0] sm:$0xff]  ;;  %v4202_v58 = vld [vmem:[%s3902_s18 + $0x238] sm:$0xff] }
  0x57   : > { %450 = vadd.xlane.f32.xlu0 %v449_v56  ;;  %v465_v56 = vadd.f32 %v464_v40, %v4162_v34  ;;  %v4189_v40 = vld [vmem:[%s3902_s18 + $0x1f0] sm:$0xff]  ;;  %8170 = vst [vmem:[#allocation19_spill] sm:$0xff] %v4194_v8  ;;  %v4205_v34 = vld [vmem:[%s3902_s18 + $0x228] sm:$0xff]  ;;  %v4208_v47 = vld [vmem:[%s3902_s18 + $0x218] sm:$0xff] }
  0x58   : > { %8169 = vst [vmem:[#allocation18_spill] sm:$0xff] %v4189_v40 }
  0x59   : > { %8171 = vst [vmem:[#allocation20_spill] sm:$0xff] %v4202_v58 }
  0x5a   : > { %8172 = vst [vmem:[#allocation21_spill] sm:$0xff] %v4205_v34 }
  0x5b   : > { %8173 = vst [vmem:[#allocation22_spill] sm:$0xff] %v4208_v47 }
  0x5d   : > { %470 = vadd.xlane.f32.xlu2 %v469_v52  ;;  %v472_v52 = vsel %vm351_vm0, %v4181_v59, 0.0  ;;  %v4211_v59 = vld [vmem:[%s3902_s18 + $0x230] sm:$0xff] }
  0x5e   : > { %466 = vadd.xlane.f32.xlu1 %v465_v56  ;;  %v477_v56 = vadd.f32 %v476_v42, %v4189_v40  ;;  %v473_v18 = vadd.f32 %v472_v52, %v4194_v8  ;;  %8174 = vst [vmem:[#allocation23_spill] sm:$0xff] %v4211_v59  ;;  %v4216_v42 = vld [vmem:[%s3902_s18 + $0x220] sm:$0xff]  ;;  %v488_v52 = vsel %vm351_vm0, %v4205_v34, 0.0  ;;  %v4232_v40 = vld [vmem:[%s3902_s18 + $0x258] sm:$0xff]  ;;  %v4235_v34 = vld [vmem:[%s3902_s18 + $0x248] sm:$0xff] }
  0x5f   : > { %462 = vadd.xlane.f32.xlu0 %v461_v11  ;;  %v481_v11 = vadd.f32 %v480_v28, %v4184_v3  ;;  %v492_v28 = vsel %vm351_vm0, %v4202_v58, 0.0  ;;  %8175 = vst [vmem:[#allocation24_spill] sm:$0xff] %v4216_v42  ;;  %v4221_v3 = vld [vmem:[%s3902_s18 + $0x210] sm:$0xff]  ;;  %v4229_v58 = vld [vmem:[%s3902_s18 + $0x268] sm:$0xff] }
  0x60   : > { %8176 = vst [vmem:[#allocation25_spill] sm:$0xff] %v4221_v3 }
  0x61   : > { %8177 = vst [vmem:[#allocation26_spill] sm:$0xff] %v4229_v58 }
  0x62   : > { %8178 = vst [vmem:[#allocation27_spill] sm:$0xff] %v4232_v40 }
  0x63   : > { %8179 = vst [vmem:[#allocation28_spill] sm:$0xff] %v4235_v34 }
  0x65   : > { %482 = vadd.xlane.f32.xlu2 %v481_v11  ;;  %v484_v11 = vsel %vm351_vm0, %v4208_v47, 0.0  ;;  %v4238_v47 = vld [vmem:[%s3902_s18 + $0x260] sm:$0xff] }
  0x66   : > { %478 = vadd.xlane.f32.xlu1 %v477_v56  ;;  %v489_v56 = vadd.f32 %v488_v52, %v4216_v42  ;;  %v485_v8 = vadd.f32 %v484_v11, %v4221_v3  ;;  %8180 = vst [vmem:[#allocation29_spill] sm:$0xff] %v4238_v47  ;;  %v4243_v52 = vld [vmem:[%s3902_s18 + $0x250] sm:$0xff]  ;;  %v500_v11 = vsel %vm351_vm0, %v4232_v40, 0.0  ;;  %v4259_v42 = vld [vmem:[%s3902_s18 + $0x288] sm:$0xff]  ;;  %v4262_v40 = vld [vmem:[%s3902_s18 + $0x278] sm:$0xff] }
  0x67   : > { %474 = vadd.xlane.f32.xlu0 %v473_v18  ;;  %v493_v18 = vadd.f32 %v492_v28, %v4211_v59  ;;  %v504_v28 = vsel %vm351_vm0, %v4229_v58, 0.0  ;;  %8181 = vst [vmem:[#allocation30_spill] sm:$0xff] %v4243_v52  ;;  %v4248_v59 = vld [vmem:[%s3902_s18 + $0x240] sm:$0xff]  ;;  %v4256_v58 = vld [vmem:[%s3902_s18 + $0x298] sm:$0xff] }
  0x68   : > { %8182 = vst [vmem:[#allocation31_spill] sm:$0xff] %v4248_v59 }
  0x69   : > { %8183 = vst [vmem:[#allocation32_spill] sm:$0xff] %v4256_v58 }
  0x6a   : > { %8184 = vst [vmem:[#allocation33_spill] sm:$0xff] %v4259_v42 }
  0x6b   : > { %8185 = vst [vmem:[#allocation34_spill] sm:$0xff] %v4262_v40 }
  0x6d   : > { %494 = vadd.xlane.f32.xlu2 %v493_v18  ;;  %v496_v18 = vsel %vm351_vm0, %v4235_v34, 0.0  ;;  %v4265_v34 = vld [vmem:[%s3902_s18 + $0x290] sm:$0xff] }
  0x6e   : > { %490 = vadd.xlane.f32.xlu1 %v489_v56  ;;  %v501_v56 = vadd.f32 %v500_v11, %v4243_v52  ;;  %v497_v3 = vadd.f32 %v496_v18, %v4248_v59  ;;  %8186 = vst [vmem:[#allocation35_spill] sm:$0xff] %v4265_v34  ;;  %v4270_v11 = vld [vmem:[%s3902_s18 + $0x280] sm:$0xff]  ;;  %v512_v18 = vsel %vm351_vm0, %v4259_v42, 0.0  ;;  %v4286_v52 = vld [vmem:[%s3902_s18 + $0x2b8] sm:$0xff]  ;;  %v4289_v42 = vld [vmem:[%s3902_s18 + $0x2a8] sm:$0xff] }
  0x6f   : > { %486 = vadd.xlane.f32.xlu0 %v485_v8  ;;  %v505_v8 = vadd.f32 %v504_v28, %v4238_v47  ;;  %v516_v28 = vsel %vm351_vm0, %v4256_v58, 0.0  ;;  %8187 = vst [vmem:[#allocation36_spill] sm:$0xff] %v4270_v11  ;;  %v4275_v47 = vld [vmem:[%s3902_s18 + $0x270] sm:$0xff]  ;;  %v4283_v58 = vld [vmem:[%s3902_s18 + $0x2c8] sm:$0xff] }
  0x70   : > { %8188 = vst [vmem:[#allocation37_spill] sm:$0xff] %v4275_v47 }
  0x71   : > { %8189 = vst [vmem:[#allocation38_spill] sm:$0xff] %v4283_v58 }
  0x72   : > { %8190 = vst [vmem:[#allocation39_spill] sm:$0xff] %v4286_v52 }
  0x73   : > { %8191 = vst [vmem:[#allocation40_spill] sm:$0xff] %v4289_v42 }
  0x75   : > { %506 = vadd.xlane.f32.xlu2 %v505_v8  ;;  %v508_v8 = vsel %vm351_vm0, %v4262_v40, 0.0  ;;  %v4292_v40 = vld [vmem:[%s3902_s18 + $0x2c0] sm:$0xff] }
  0x76   : > { %502 = vadd.xlane.f32.xlu1 %v501_v56  ;;  %v513_v56 = vadd.f32 %v512_v18, %v4270_v11  ;;  %v509_v59 = vadd.f32 %v508_v8, %v4275_v47  ;;  %8192 = vst [vmem:[#allocation41_spill] sm:$0xff] %v4292_v40  ;;  %v4297_v18 = vld [vmem:[%s3902_s18 + $0x2b0] sm:$0xff]  ;;  %v524_v8 = vsel %vm351_vm0, %v4286_v52, 0.0  ;;  %v4310_v11 = vld [vmem:[%s3902_s18 + $0x2f8] sm:$0xff] }
  0x77   : > { %498 = vadd.xlane.f32.xlu0 %v497_v3  ;;  %v517_v3 = vadd.f32 %v516_v28, %v4265_v34  ;;  %v528_v28 = vsel %vm351_vm0, %v4283_v58, 0.0  ;;  %8193 = vst [vmem:[#allocation42_spill] sm:$0xff] %v4297_v18  ;;  %v4302_v34 = vld [vmem:[%s3902_s18 + $0x2a0] sm:$0xff]  ;;  %v4313_v58 = vld [vmem:[%s3902_s18 + $0x2e8] sm:$0xff]  ;;  %v4319_v52 = vld [vmem:[%s3902_s18 + $0x2f0] sm:$0xff] }
  0x78   : > { %8194 = vst [vmem:[#allocation43_spill] sm:$0xff] %v4302_v34 }
  0x79   : > { %8195 = vst [vmem:[#allocation44_spill] sm:$0xff] %v4310_v11 }
  0x7a   : > { %8196 = vst [vmem:[#allocation45_spill] sm:$0xff] %v4313_v58 }
  0x7b   : > { %8198 = vst [vmem:[#allocation47_spill] sm:$0xff] %v4319_v52 }
  0x7d   : > { %518 = vadd.xlane.f32.xlu2 %v517_v3  ;;  %v520_v3 = vsel %vm351_vm0, %v4289_v42, 0.0 }
  0x7e   : > { %514 = vadd.xlane.f32.xlu1 %v513_v56  ;;  %v525_v56 = vadd.f32 %v524_v8, %v4297_v18  ;;  %v521_v47 = vadd.f32 %v520_v3, %v4302_v34  ;;  %v4324_v8 = vld [vmem:[%s3902_s18 + $0x2e0] sm:$0xff]  ;;  %v536_v3 = vsel %vm351_vm0, %v4313_v58, 0.0  ;;  %v4343_v58 = vld [vmem:[%s3902_s18 + $0x328] sm:$0xff] }
  0x7f   : > { %510 = vadd.xlane.f32.xlu0 %v509_v59  ;;  %v529_v59 = vadd.f32 %v528_v28, %v4292_v40  ;;  %v540_v28 = vsel %vm351_vm0, %v4310_v11, 0.0  ;;  %8199 = vst [vmem:[#allocation48_spill] sm:$0xff] %v4324_v8  ;;  %v4329_v40 = vld [vmem:[%s3902_s18 + $0x2d0] sm:$0xff]  ;;  %v537_v18 = vadd.f32 %v536_v3, %v4324_v8  ;;  %v4379_v8 = vld [vmem:[%s3902_s18 + $0x348] sm:$0xff] }
  0x80   : > { %8200 = vst [vmem:[#allocation49_spill] sm:$0xff] %v4329_v40  ;;  %v541_v11 = vadd.f32 %v540_v28, %v4319_v52  ;;  %v552_v28 = vsel %vm351_vm0, %v4343_v58, 0.0  ;;  %v4357_v3 = vld [vmem:[%s3902_s18 + $0x310] sm:$0xff] }
  0x81   : > { %8204 = vst [vmem:[#allocation53_spill] sm:$0xff] %v4343_v58 }
  0x82   : > { %8208 = vst [vmem:[#allocation57_spill] sm:$0xff] %v4357_v3 }
  0x83   : > { %8214 = vst [vmem:[#allocation63_spill] sm:$0xff] %v4379_v8 }
  0x85   : > { %530 = vadd.xlane.f32.xlu2 %v529_v59  ;;  %v532_v59 = vsel %vm351_vm0, %v4316_v35, 0.0  ;;  %v4382_v35 = vld [vmem:[%s3902_s18 + $0x338] sm:$0xff] }
  0x86   : > { %526 = vadd.xlane.f32.xlu1 %v525_v56  ;;  %v533_v42 = vadd.f32 %v532_v59, %v4329_v40  ;;  %v548_v59 = vsel %vm351_vm0, %v4346_v32, 0.0  ;;  %v4376_v32 = vld [vmem:[%s3902_s18 + $0x358] sm:$0xff]  ;;  %8215 = vst [vmem:[#allocation64_spill] sm:$0xff] %v4382_v35 }
  0x87   : > { %522 = vadd.xlane.f32.xlu0 %v521_v47  ;;  %v549_v52 = vadd.f32 %v548_v59, %v4357_v3  ;;  %8213 = vst [vmem:[#allocation62_spill] sm:$0xff] %v4376_v32  ;;  %v4390_v59 = vld [vmem:[%s3902_s18 + $0x340] sm:$0xff]  ;;  %v4412_v3 = vld [vmem:[%s3902_s18 + $0x378] sm:$0xff] }
  0x88   : > { %v4333_v56 = vpop.xlane.xlu2 %370  ;;  %8217 = vst [vmem:[#allocation66_spill] sm:$0xff] %v4390_v59 }
  0x89   : > { %8201 = vst [vmem:[#allocation50_spill] sm:$0xff] %v4333_v56  ;;  %v4335_v47 = vpop.xlane.xlu1 %362 }
  0x8a   : > { %8202 = vst [vmem:[#allocation51_spill] sm:$0xff] %v4335_v47  ;;  %v4337_v34 = vpop.xlane.xlu0 %354  ;;  %v4352_v47 = vld [vmem:[%s3902_s18 + $0x320] sm:$0xff] }
  0x8b   : > { %8203 = vst [vmem:[#allocation52_spill] sm:$0xff] %v4337_v34  ;;  %v4362_v34 = vld [vmem:[%s3902_s18 + $0x300] sm:$0xff]  ;;  %v553_v58 = vadd.f32 %v552_v28, %v4352_v47  ;;  %v564_v28 = vsel %vm351_vm0, %v4376_v32, 0.0 }
  0x8c   : > { %8207 = vst [vmem:[#allocation56_spill] sm:$0xff] %v4352_v47 }
  0x8d   : > { %542 = vadd.xlane.f32.xlu2 %v541_v11  ;;  %8209 = vst [vmem:[#allocation58_spill] sm:$0xff] %v4362_v34  ;;  %v544_v11 = vsel %vm351_vm0, %v4349_v44, 0.0  ;;  %v4415_v44 = vld [vmem:[%s3902_s18 + $0x368] sm:$0xff] }
  0x8e   : > { %538 = vadd.xlane.f32.xlu1 %v537_v18  ;;  %v545_v40 = vadd.f32 %v544_v11, %v4362_v34  ;;  %v560_v11 = vsel %vm351_vm0, %v4379_v8, 0.0  ;;  %v4409_v8 = vld [vmem:[%s3902_s18 + $0x388] sm:$0xff]  ;;  %8223 = vst [vmem:[#allocation72_spill] sm:$0xff] %v4412_v3 }
  0x8f   : > { %534 = vadd.xlane.f32.xlu0 %v533_v42  ;;  %v561_v47 = vadd.f32 %v560_v11, %v4390_v59  ;;  %8222 = vst [vmem:[#allocation71_spill] sm:$0xff] %v4409_v8  ;;  %v4423_v11 = vld [vmem:[%s3902_s18 + $0x370] sm:$0xff]  ;;  %v4445_v59 = vld [vmem:[%s3902_s18 + $0x3a8] sm:$0xff] }
  0x90   : > { %v4366_v18 = vpop.xlane.xlu2 %374  ;;  %8224 = vst [vmem:[#allocation73_spill] sm:$0xff] %v4415_v44 }
  0x91   : > { %8210 = vst [vmem:[#allocation59_spill] sm:$0xff] %v4366_v18  ;;  %v4368_v42 = vpop.xlane.xlu1 %366 }
  0x92   : > { %8211 = vst [vmem:[#allocation60_spill] sm:$0xff] %v4368_v42  ;;  %v4370_v56 = vpop.xlane.xlu0 %358  ;;  %v4385_v42 = vld [vmem:[%s3902_s18 + $0x350] sm:$0xff] }
  0x93   : > { %8212 = vst [vmem:[#allocation61_spill] sm:$0xff] %v4370_v56  ;;  %v4395_v56 = vld [vmem:[%s3902_s18 + $0x330] sm:$0xff]  ;;  %v565_v32 = vadd.f32 %v564_v28, %v4385_v42  ;;  %v576_v28 = vsel %vm351_vm0, %v4409_v8, 0.0 }
  0x94   : > { %8216 = vst [vmem:[#allocation65_spill] sm:$0xff] %v4385_v42  ;;  %v4428_v42 = vld [vmem:[%s3902_s18 + $0x360] sm:$0xff] }
  0x95   : > { %554 = vadd.xlane.f32.xlu2 %v553_v58  ;;  %8218 = vst [vmem:[#allocation67_spill] sm:$0xff] %v4395_v56  ;;  %v556_v58 = vsel %vm351_vm0, %v4382_v35, 0.0  ;;  %v4448_v35 = vld [vmem:[%s3902_s18 + $0x398] sm:$0xff] }
  0x96   : > { %550 = vadd.xlane.f32.xlu1 %v549_v52  ;;  %v557_v34 = vadd.f32 %v556_v58, %v4395_v56  ;;  %8226 = vst [vmem:[#allocation75_spill] sm:$0xff] %v4423_v11  ;;  %v572_v58 = vsel %vm351_vm0, %v4412_v3, 0.0  ;;  %v4442_v3 = vld [vmem:[%s3902_s18 + $0x3b8] sm:$0xff] }
  0x97   : > { %546 = vadd.xlane.f32.xlu0 %v545_v40  ;;  %8227 = vst [vmem:[#allocation76_spill] sm:$0xff] %v4428_v42 }
  0x98   : > { %v4399_v52 = vpop.xlane.xlu2 %386  ;;  %8231 = vst [vmem:[#allocation80_spill] sm:$0xff] %v4442_v3 }
  0x99   : > { %8219 = vst [vmem:[#allocation68_spill] sm:$0xff] %v4399_v52  ;;  %v4401_v40 = vpop.xlane.xlu1 %382  ;;  %v573_v52 = vadd.f32 %v572_v58, %v4423_v11  ;;  %v4456_v58 = vld [vmem:[%s3902_s18 + $0x3a0] sm:$0xff] }
  0x9a   : > { %8220 = vst [vmem:[#allocation69_spill] sm:$0xff] %v4401_v40  ;;  %v4403_v18 = vpop.xlane.xlu0 %378  ;;  %v4418_v40 = vld [vmem:[%s3902_s18 + $0x380] sm:$0xff] }
  0x9b   : > { %8221 = vst [vmem:[#allocation70_spill] sm:$0xff] %v4403_v18  ;;  %v577_v8 = vadd.f32 %v576_v28, %v4418_v40  ;;  %v588_v28 = vsel %vm351_vm0, %v4442_v3, 0.0 }
  0x9c   : > { %8225 = vst [vmem:[#allocation74_spill] sm:$0xff] %v4418_v40  ;;  %v4461_v40 = vld [vmem:[%s3902_s18 + $0x390] sm:$0xff] }
  0x9d   : > { %566 = vadd.xlane.f32.xlu2 %v565_v32  ;;  %v568_v32 = vsel %vm351_vm0, %v4415_v44, 0.0  ;;  %8232 = vst [vmem:[#allocation81_spill] sm:$0xff] %v4445_v59  ;;  %v4481_v44 = vld [vmem:[%s3902_s18 + $0x3c8] sm:$0xff] }
  0x9e   : > { %562 = vadd.xlane.f32.xlu1 %v561_v47  ;;  %v569_v56 = vadd.f32 %v568_v32, %v4428_v42  ;;  %8233 = vst [vmem:[#allocation82_spill] sm:$0xff] %v4448_v35  ;;  %v584_v32 = vsel %vm351_vm0, %v4445_v59, 0.0  ;;  %v4475_v59 = vld [vmem:[%s3902_s18 + $0x3e8] sm:$0xff] }
  0x9f   : > { %558 = vadd.xlane.f32.xlu0 %v557_v34  ;;  %8235 = vst [vmem:[#allocation84_spill] sm:$0xff] %v4456_v58  ;;  %v585_v42 = vadd.f32 %v584_v32, %v4456_v58 }
  0xa0   : > { %v4432_v47 = vpop.xlane.xlu2 %398  ;;  %8236 = vst [vmem:[#allocation85_spill] sm:$0xff] %v4461_v40 }
  0xa1   : > { %8228 = vst [vmem:[#allocation77_spill] sm:$0xff] %v4432_v47  ;;  %v4434_v34 = vpop.xlane.xlu1 %394  ;;  %v4478_v47 = vld [vmem:[%s3902_s18 + $0x3d8] sm:$0xff] }
  0xa2   : > { %8229 = vst [vmem:[#allocation78_spill] sm:$0xff] %v4434_v34  ;;  %v4436_v18 = vpop.xlane.xlu0 %390  ;;  %v4451_v34 = vld [vmem:[%s3902_s18 + $0x3b0] sm:$0xff]  ;;  %v596_v32 = vsel %vm351_vm0, %v4478_v47, 0.0 }
  0xa3   : > { %8230 = vst [vmem:[#allocation79_spill] sm:$0xff] %v4436_v18  ;;  %v589_v3 = vadd.f32 %v588_v28, %v4451_v34  ;;  %v4489_v28 = vld [vmem:[%s3902_s18 + $0x3d0] sm:$0xff] }
  0xa4   : > { %8234 = vst [vmem:[#allocation83_spill] sm:$0xff] %v4451_v34  ;;  %v592_v34 = vsel %vm351_vm0, %v4481_v44, 0.0 }
  0xa5   : > { %578 = vadd.xlane.f32.xlu2 %v577_v8  ;;  %v580_v8 = vsel %vm351_vm0, %v4448_v35, 0.0  ;;  %8239 = vst [vmem:[#allocation88_spill] sm:$0xff] %v4475_v59  ;;  %v4484_v35 = vld [vmem:[%s3902_s18 + $0x3e0] sm:$0xff] }
  0xa6   : > { %574 = vadd.xlane.f32.xlu1 %v573_v52  ;;  %v581_v11 = vadd.f32 %v580_v8, %v4461_v40  ;;  %8240 = vst [vmem:[#allocation89_spill] sm:$0xff] %v4478_v47  ;;  %v4494_v8 = vld [vmem:[%s3902_s18 + $0x3c0] sm:$0xff]  ;;  %v611_v47 = vmul.f32 %v3938_v14, %v3938_v14 }
  0xa7   : > { %570 = vadd.xlane.f32.xlu0 %v569_v56  ;;  %8241 = vst [vmem:[#allocation90_spill] sm:$0xff] %v4481_v44  ;;  %v593_v58 = vadd.f32 %v592_v34, %v4494_v8  ;;  %v4512_v44 = vld [vmem:[%s3902_s18 + $0x3f8] sm:$0xff] }
  0xa8   : > { %v4465_v52 = vpop.xlane.xlu2 %410  ;;  %8242 = vst [vmem:[#allocation91_spill] sm:$0xff] %v4484_v35 }
  0xa9   : > { %v4467_v56 = vpop.xlane.xlu1 %406  ;;  %8243 = vst [vmem:[#allocation92_spill] sm:$0xff] %v4494_v8 }
  0xaa   : > { %8237 = vst [vmem:[#allocation86_spill] sm:$0xff] %v4467_v56  ;;  %v4469_v18 = vpop.xlane.xlu0 %402  ;;  %v609_v56 = vmul.f32 %v3922_v6, %v3922_v6  ;;  %v604_v6 = vsel %vm351_vm0, %v4512_v44, 0.0 }
  0xab   : > { %8238 = vst [vmem:[#allocation87_spill] sm:$0xff] %v4469_v18  ;;  %v600_v18 = vsel %vm351_vm0, %v4475_v59, 0.0  ;;  %v597_v59 = vadd.f32 %v596_v32, %v4489_v28  ;;  %v608_v32 = vmul.f32 %v3919_v5, %v3919_v5  ;;  %v617_v5 = vmul.f32 %v3908_v1, %v3908_v1 }
  0xac   : > { %8245 = vst [vmem:[#allocation94_spill] sm:$0xff] %v4512_v44  ;;  %v736_v34 = vsel %vm351_vm0, %v609_v56, 0.0  ;;  %v613_v56 = vmul.f32 %v3916_v4, %v3916_v4  ;;  %v616_v44 = vmul.f32 %v3905_v0, %v3905_v0  ;;  %v612_v1 = vmul.f32 %v3911_v2, %v3911_v2 }
  0xad   : > { %590 = vadd.xlane.f32.xlu2 %v589_v3  ;;  %v619_v2 = vmul.f32 %v3930_v10, %v3930_v10 }
  0xae   : > { %586 = vadd.xlane.f32.xlu1 %v585_v42 }
  0xaf   : > { %582 = vadd.xlane.f32.xlu0 %v581_v11  ;;  %v601_v11 = vadd.f32 %v600_v18, %v4484_v35  ;;  %v740_v18 = vsel %vm351_vm0, %v611_v47, 0.0  ;;  %v4521_v35 = vld [vmem:[%s3902_s18 + $0x3f0] sm:$0xff] }
  0xb0   : > { %v4498_v40 = vpop.xlane.xlu2 %422  ;;  %v605_v47 = vadd.f32 %v604_v6, %v4521_v35 }
  0xb1   : > { %v4500_v3 = vpop.xlane.xlu1 %418 }
  0xb2   : > { %8244 = vst [vmem:[#allocation93_spill] sm:$0xff] %v4500_v3  ;;  %v4502_v42 = vpop.xlane.xlu0 %414  ;;  %v610_v3 = vmul.f32 %v3951_v19, %v3951_v19 }
  0xb4   : > { %v741_v19 = vadd.f32 %v740_v18, %v610_v3  ;;  %v752_v3 = vsel %vm351_vm0, %v617_v5, 0.0  ;;  %v614_v18 = vmul.f32 %v3946_v17, %v3946_v17  ;;  %v621_v17 = vmul.f32 %v3965_v26, %v3965_v26 }
  0xb5   : > { %602 = vadd.xlane.f32.xlu2 %v601_v11  ;;  %v753_v0 = vadd.f32 %v752_v3, %v616_v44  ;;  %v622_v5 = vmul.f32 %v3973_v29, %v3973_v29  ;;  %v620_v44 = vmul.f32 %v3978_v31, %v3978_v31  ;;  %v756_v26 = vsel %vm351_vm0, %v619_v2, 0.0 }
  0xb6   : > { %598 = vadd.xlane.f32.xlu1 %v597_v59  ;;  %v737_v59 = vadd.f32 %v736_v34, %v608_v32  ;;  %v627_v31 = vmul.f32 %v3992_v38, %v3992_v38 }
  0xb7   : > { %594 = vadd.xlane.f32.xlu0 %v593_v58  ;;  %v615_v58 = vmul.f32 %v3935_v13, %v3935_v13  ;;  %v744_v13 = vsel %vm351_vm0, %v613_v56, 0.0  ;;  %v760_v56 = vsel %vm351_vm0, %v621_v17, 0.0 }
  0xb8   : > { %v4525_v14 = vpop.xlane.xlu2 %434 }
  0xb9   : > { %v4527_v11 = vpop.xlane.xlu1 %430  ;;  %v748_v32 = vsel %vm351_vm0, %v615_v58, 0.0 }
  0xba   : > { %v4529_v8 = vpop.xlane.xlu0 %426 }
  0xbd   : > { %742 = vadd.xlane.f32.xlu2 %v741_v19  ;;  %v749_v19 = vadd.f32 %v748_v32, %v614_v18 }
  0xbe   : > { %738 = vadd.xlane.f32.xlu1 %v737_v59  ;;  %v745_v59 = vadd.f32 %v744_v13, %v612_v1  ;;  %v761_v1 = vadd.f32 %v760_v56, %v620_v44  ;;  %v629_v13 = vmul.f32 %v3989_v37, %v3989_v37  ;;  %v624_v37 = vmul.f32 %v3968_v27, %v3968_v27 }
  0xbf   : > { %606 = vadd.xlane.f32.xlu0 %v605_v47  ;;  %v623_v47 = vmul.f32 %v3962_v25, %v3962_v25  ;;  %v618_v25 = vmul.f32 %v3941_v15, %v3941_v15  ;;  %v625_v15 = vmul.f32 %v3959_v24, %v3959_v24  ;;  %v635_v44 = vmul.f32 %v4016_v49, %v4016_v49 }
  0xc0   : > { %v4547_v34 = vpop.xlane.xlu2 %446  ;;  %v631_v27 = vmul.f32 %v3986_v36, %v3986_v36  ;;  %v630_v49 = vmul.f32 %v3995_v39, %v3995_v39  ;;  %v637_v39 = vmul.f32 %v4013_v48, %v4013_v48 }
  0xc1   : > { %v4549_v4 = vpop.xlane.xlu1 %442  ;;  %v764_v58 = vsel %vm351_vm0, %v623_v47, 0.0  ;;  %v757_v32 = vadd.f32 %v756_v26, %v618_v25  ;;  %v772_v47 = vsel %vm351_vm0, %v627_v31, 0.0  ;;  %v768_v38 = vsel %vm351_vm0, %v625_v15, 0.0 }
  0xc2   : > { %v4551_v6 = vpop.xlane.xlu0 %438  ;;  %v765_v29 = vadd.f32 %v764_v58, %v622_v5  ;;  %v769_v58 = vadd.f32 %v768_v38, %v624_v37  ;;  %v634_v25 = vmul.f32 %v4027_v53, %v4027_v53  ;;  %v788_v56 = vsel %vm351_vm0, %v635_v44, 0.0 }
  0xc3   : > { %v632_v26 = vmul.f32 %v4032_v55, %v4032_v55  ;;  %v641_v15 = vmul.f32 %v4043_v61, %v4043_v61  ;;  %v639_v55 = vmul.f32 %v4046_v62, %v4046_v62  ;;  %v636_v61 = vmul.f32 %v4022_v51, %v4022_v51 }
  0xc4   : > { %v789_v53 = vadd.f32 %v788_v56, %v634_v25  ;;  %v792_v62 = vsel %vm351_vm0, %v637_v39, 0.0  ;;  %v643_v51 = vmul.f32 %v4040_v60, %v4040_v60  ;;  %v646_v44 = vmul.f32 %v4081_v30, %v4081_v30 }
  0xc5   : > { %754 = vadd.xlane.f32.xlu2 %v753_v0  ;;  %v628_v0 = vmul.f32 %v4000_v41, %v4000_v41  ;;  %v796_v37 = vsel %vm351_vm0, %v639_v55, 0.0 }
  0xc6   : > { %750 = vadd.xlane.f32.xlu1 %v749_v19  ;;  %v776_v19 = vsel %vm351_vm0, %v629_v13, 0.0 }
  0xc7   : > { %746 = vadd.xlane.f32.xlu0 %v745_v59  ;;  %v626_v59 = vmul.f32 %v4005_v43, %v4005_v43  ;;  %v777_v41 = vadd.f32 %v776_v19, %v628_v0  ;;  %v633_v43 = vmul.f32 %v4019_v50, %v4019_v50  ;;  %v780_v50 = vsel %vm351_vm0, %v631_v27, 0.0 }
  0xc8   : > { %v4568_v3 = vpop.xlane.xlu2 %458  ;;  %v781_v31 = vadd.f32 %v780_v50, %v630_v49  ;;  %v640_v0 = vmul.f32 %v4054_v7, %v4054_v7  ;;  %v800_v19 = vsel %vm351_vm0, %v641_v15, 0.0  ;;  %v644_v27 = vmul.f32 %v4086_v33, %v4086_v33 }
  0xc9   : > { %v4570_v10 = vpop.xlane.xlu1 %454  ;;  %v773_v5 = vadd.f32 %v772_v47, %v626_v59  ;;  %v638_v59 = vmul.f32 %v4059_v9, %v4059_v9  ;;  %v645_v9 = vmul.f32 %v4073_v22, %v4073_v22  ;;  %v804_v22 = vsel %vm351_vm0, %v643_v51, 0.0 }
  0xca   : > { %v4572_v18 = vpop.xlane.xlu0 %450  ;;  %v801_v7 = vadd.f32 %v800_v19, %v640_v0  ;;  %v653_v50 = vmul.f32 %v4097_v45, %v4097_v45  ;;  %v651_v33 = vmul.f32 %v4100_v46, %v4100_v46  ;;  %v648_v45 = vmul.f32 %v4076_v23, %v4076_v23  ;;  %v8247_v23 = vld [vmem:[#allocation2_spill] sm:$0xff] }
  0xcb   : > { %v808_v25 = vsel %vm351_vm0, %v645_v9, 0.0 }
  0xcc   : > { %v809_v49 = vadd.f32 %v808_v25, %v644_v27  ;;  %v820_v15 = vsel %vm351_vm0, %v651_v33, 0.0 }
  0xcd   : > { %766 = vadd.xlane.f32.xlu2 %v765_v29  ;;  %v784_v29 = vsel %vm351_vm0, %v633_v43, 0.0 }
  0xce   : > { %762 = vadd.xlane.f32.xlu1 %v761_v1  ;;  %v785_v13 = vadd.f32 %v784_v29, %v632_v26 }
  0xcf   : > { %758 = vadd.xlane.f32.xlu0 %v757_v32 }
  0xd0   : > { %v4589_v17 = vpop.xlane.xlu2 %470 }
  0xd1   : > { %v4591_v24 = vpop.xlane.xlu1 %466 }
  0xd2   : > { %v4593_v2 = vpop.xlane.xlu0 %462 }
  0xd5   : > { %778 = vadd.xlane.f32.xlu2 %v777_v41  ;;  %v797_v41 = vadd.f32 %v796_v37, %v638_v59  ;;  %v659_v59 = vmul.f32 %v4124_v12, %v4124_v12  ;;  %v8248_v37 = vld [vmem:[#allocation6_spill] sm:$0xff] }
  0xd6   : > { %774 = vadd.xlane.f32.xlu1 %v773_v5  ;;  %v793_v5 = vadd.f32 %v792_v62, %v636_v61  ;;  %v655_v61 = vmul.f32 %v8247_v23, %v8247_v23  ;;  %v658_v62 = vmul.f32 %v8248_v37, %v8248_v37 }
  0xd7   : > { %770 = vadd.xlane.f32.xlu0 %v769_v58  ;;  %v647_v58 = vmul.f32 %v4070_v21, %v4070_v21  ;;  %v642_v21 = vmul.f32 %v4049_v63, %v4049_v63  ;;  %v649_v63 = vmul.f32 %v4067_v20, %v4067_v20 }
  0xd8   : > { %v4610_v1 = vpop.xlane.xlu2 %482 }
  0xd9   : > { %v4612_v36 = vpop.xlane.xlu1 %478  ;;  %v812_v43 = vsel %vm351_vm0, %v647_v58, 0.0  ;;  %v805_v29 = vadd.f32 %v804_v22, %v642_v21  ;;  %v816_v46 = vsel %vm351_vm0, %v649_v63, 0.0  ;;  %v8250_v58 = vld [vmem:[#allocation3_spill] sm:$0xff]  ;;  %v8254_v22 = vld [vmem:[#allocation9_spill] sm:$0xff]  ;;  %v8257_v63 = vld [vmem:[#allocation12_spill] sm:$0xff] }
  0xda   : > { %v4614_v32 = vpop.xlane.xlu0 %474  ;;  %v813_v30 = vadd.f32 %v812_v43, %v646_v44  ;;  %v817_v19 = vadd.f32 %v816_v46, %v648_v45  ;;  %v654_v12 = vmul.f32 %v8250_v58, %v8250_v58  ;;  %v8265_v58 = vld [vmem:[#allocation8_spill] sm:$0xff] }
  0xdd   : > { %790 = vadd.xlane.f32.xlu2 %v789_v53  ;;  %v652_v53 = vmul.f32 %v4108_v54, %v4108_v54 }
  0xde   : > { %786 = vadd.xlane.f32.xlu1 %v785_v13  ;;  %v824_v13 = vsel %vm351_vm0, %v653_v50, 0.0  ;;  %v8256_v50 = vld [vmem:[#allocation4_spill] sm:$0xff] }
  0xdf   : > { %782 = vadd.xlane.f32.xlu0 %v781_v31  ;;  %v650_v31 = vmul.f32 %v4113_v57, %v4113_v57  ;;  %v825_v54 = vadd.f32 %v824_v13, %v652_v53  ;;  %v657_v57 = vmul.f32 %v4127_v16, %v4127_v16  ;;  %v828_v16 = vsel %vm351_vm0, %v655_v61, 0.0 }
  0xe0   : > { %v4631_v47 = vpop.xlane.xlu2 %494  ;;  %v829_v25 = vadd.f32 %v828_v16, %v654_v12  ;;  %v661_v33 = vmul.f32 %v8256_v50, %v8256_v50  ;;  %v664_v53 = vmul.f32 %v8257_v63, %v8257_v63  ;;  %v667_v12 = vmul.f32 %v8265_v58, %v8265_v58 }
  0xe1   : > { %v4633_v48 = vpop.xlane.xlu1 %490  ;;  %v821_v0 = vadd.f32 %v820_v15, %v650_v31  ;;  %v832_v9 = vsel %vm351_vm0, %v657_v57, 0.0  ;;  %v8258_v31 = vld [vmem:[#allocation13_spill] sm:$0xff] }
  0xe2   : > { %v4635_v38 = vpop.xlane.xlu0 %486  ;;  %v662_v45 = vmul.f32 %v8258_v31, %v8258_v31  ;;  %v8259_v15 = vld [vmem:[#allocation5_spill] sm:$0xff] }
  0xe3   : > { %v660_v46 = vmul.f32 %v8259_v15, %v8259_v15 }
  0xe5   : > { %802 = vadd.xlane.f32.xlu2 %v801_v7  ;;  %v836_v7 = vsel %vm351_vm0, %v659_v59, 0.0 }
  0xe6   : > { %798 = vadd.xlane.f32.xlu1 %v797_v41  ;;  %v8249_v41 = vld [vmem:[#allocation7_spill] sm:$0xff]  ;;  %v837_v27 = vadd.f32 %v836_v7, %v658_v62 }
  0xe7   : > { %794 = vadd.xlane.f32.xlu0 %v793_v5  ;;  %v656_v5 = vmul.f32 %v8249_v41, %v8249_v41  ;;  %v8263_v62 = vld [vmem:[#allocation15_spill] sm:$0xff]  ;;  %v8264_v41 = vld [vmem:[#allocation16_spill] sm:$0xff] }
  0xe8   : > { %v4652_v56 = vpop.xlane.xlu2 %506  ;;  %v671_v7 = vmul.f32 %v8263_v62, %v8263_v62 }
  0xe9   : > { %v4654_v60 = vpop.xlane.xlu1 %502  ;;  %v833_v21 = vadd.f32 %v832_v9, %v656_v5  ;;  %v669_v5 = vmul.f32 %v8264_v41, %v8264_v41  ;;  %v8266_v9 = vld [vmem:[#allocation18_spill] sm:$0xff] }
  0xea   : > { %v4656_v26 = vpop.xlane.xlu0 %498  ;;  %v670_v16 = vmul.f32 %v8266_v9, %v8266_v9 }
  0xed   : > { %814 = vadd.xlane.f32.xlu2 %v813_v30  ;;  %v665_v30 = vmul.f32 %v8254_v22, %v8254_v22  ;;  %v8268_v22 = vld [vmem:[#allocation11_spill] sm:$0xff] }
  0xee   : > { %810 = vadd.xlane.f32.xlu1 %v809_v49  ;;  %v8255_v49 = vld [vmem:[#allocation10_spill] sm:$0xff] }
  0xef   : > { %806 = vadd.xlane.f32.xlu0 %v805_v29  ;;  %v663_v29 = vmul.f32 %v8255_v49, %v8255_v49  ;;  %v848_v13 = vsel %vm351_vm0, %v665_v30, 0.0  ;;  %v666_v30 = vmul.f32 %v8268_v22, %v8268_v22  ;;  %v856_v49 = vsel %vm351_vm0, %v669_v5, 0.0  ;;  %v8277_v5 = vld [vmem:[#allocation17_spill] sm:$0xff] }
  0xf0   : > { %v4673_v55 = vpop.xlane.xlu2 %518  ;;  %v849_v23 = vadd.f32 %v848_v13, %v664_v53  ;;  %v672_v58 = vmul.f32 %v8277_v5, %v8277_v5 }
  0xf1   : > { %v4675_v20 = vpop.xlane.xlu1 %514 }
  0xf2   : > { %v4677_v39 = vpop.xlane.xlu0 %510 }
  0xf3   : > { %8246 = vst [vmem:[#allocation95_spill] sm:$0xff] %v4677_v39  ;;  %v8366_v39 = vld [vmem:[#allocation71_spill] sm:$0xff] }
  0xf5   : > { %826 = vadd.xlane.f32.xlu2 %v825_v54  ;;  %v844_v54 = vsel %vm351_vm0, %v663_v29, 0.0  ;;  %v852_v29 = vsel %vm351_vm0, %v667_v12, 0.0 }
  0xf6   : > { %822 = vadd.xlane.f32.xlu1 %v821_v0  ;;  %v840_v0 = vsel %vm351_vm0, %v661_v33, 0.0  ;;  %v845_v61 = vadd.f32 %v844_v54, %v662_v45  ;;  %v853_v31 = vadd.f32 %v852_v29, %v666_v30  ;;  %v8272_v45 = vld [vmem:[#allocation21_spill] sm:$0xff] }
  0xf7   : > { %818 = vadd.xlane.f32.xlu0 %v817_v19  ;;  %v841_v37 = vadd.f32 %v840_v0, %v660_v46  ;;  %v677_v15 = vmul.f32 %v8272_v45, %v8272_v45  ;;  %v8273_v46 = vld [vmem:[#allocation22_spill] sm:$0xff] }
  0xf8   : > { %v4694_v51 = vpop.xlane.xlu2 %530  ;;  %v675_v54 = vmul.f32 %v8273_v46, %v8273_v46  ;;  %v8274_v0 = vld [vmem:[#allocation14_spill] sm:$0xff] }
  0xf9   : > { %8251 = vst [vmem:[#allocation2_spill] sm:$0xff] %v4694_v51  ;;  %v4696_v44 = vpop.xlane.xlu1 %526  ;;  %v872_v62 = vsel %vm351_vm0, %v677_v15, 0.0  ;;  %v8284_v15 = vld [vmem:[#allocation30_spill] sm:$0xff] }
  0xfa   : > { %8252 = vst [vmem:[#allocation6_spill] sm:$0xff] %v4696_v44  ;;  %v4698_v43 = vpop.xlane.xlu0 %522  ;;  %v868_v12 = vsel %vm351_vm0, %v675_v54, 0.0  ;;  %v682_v46 = vmul.f32 %v8284_v15, %v8284_v15 }
  0xfb   : > { %8253 = vst [vmem:[#allocation7_spill] sm:$0xff] %v4698_v43  ;;  %v8355_v43 = vld [vmem:[#allocation65_spill] sm:$0xff] }
  0xfd   : > { %838 = vadd.xlane.f32.xlu2 %v837_v27  ;;  %v860_v27 = vsel %vm351_vm0, %v671_v7, 0.0  ;;  %v8276_v7 = vld [vmem:[#allocation25_spill] sm:$0xff] }
  0xfe   : > { %834 = vadd.xlane.f32.xlu1 %v833_v21  ;;  %v8267_v21 = vld [vmem:[#allocation19_spill] sm:$0xff]  ;;  %v861_v53 = vadd.f32 %v860_v27, %v670_v16  ;;  %v674_v41 = vmul.f32 %v8276_v7, %v8276_v7 }
  0xff   : > { %830 = vadd.xlane.f32.xlu0 %v829_v25  ;;  %v668_v25 = vmul.f32 %v8267_v21, %v8267_v21 }
 0x100   : > { %v4715_v19 = vpop.xlane.xlu2 %542  ;;  %v869_v22 = vadd.f32 %v868_v12, %v674_v41 }
 0x101   : > { %8260 = vst [vmem:[#allocation3_spill] sm:$0xff] %v4715_v19  ;;  %v4717_v59 = vpop.xlane.xlu1 %538  ;;  %v857_v13 = vadd.f32 %v856_v49, %v668_v25  ;;  %v8281_v49 = vld [vmem:[#allocation27_spill] sm:$0xff] }
 0x102   : > { %8261 = vst [vmem:[#allocation9_spill] sm:$0xff] %v4717_v59  ;;  %v4719_v57 = vpop.xlane.xlu0 %534  ;;  %v683_v29 = vmul.f32 %v8281_v49, %v8281_v49  ;;  %v8291_v49 = vld [vmem:[#allocation34_spill] sm:$0xff] }
 0x103   : > { %8262 = vst [vmem:[#allocation10_spill] sm:$0xff] %v4719_v57  ;;  %v8343_v57 = vld [vmem:[#allocation73_spill] sm:$0xff] }
 0x104   : > { %v884_v54 = vsel %vm351_vm0, %v683_v29, 0.0  ;;  %v687_v29 = vmul.f32 %v8291_v49, %v8291_v49  ;;  %v717_v59 = vmul.f32 %v8343_v57, %v8343_v57  ;;  %v8349_v57 = vld [vmem:[#allocation77_spill] sm:$0xff] }
 0x105   : > { %850 = vadd.xlane.f32.xlu2 %v849_v23  ;;  %v673_v23 = vmul.f32 %v8274_v0, %v8274_v0  ;;  %v8285_v0 = vld [vmem:[#allocation31_spill] sm:$0xff]  ;;  %v885_v12 = vadd.f32 %v884_v54, %v682_v46  ;;  %v8294_v46 = vld [vmem:[#allocation37_spill] sm:$0xff] }
 0x106   : > { %846 = vadd.xlane.f32.xlu1 %v845_v61  ;;  %v8275_v61 = vld [vmem:[#allocation24_spill] sm:$0xff]  ;;  %v686_v54 = vmul.f32 %v8294_v46, %v8294_v46 }
 0x107   : > { %842 = vadd.xlane.f32.xlu0 %v841_v37  ;;  %v676_v37 = vmul.f32 %v8275_v61, %v8275_v61  ;;  %v864_v9 = vsel %vm351_vm0, %v673_v23, 0.0  ;;  %v680_v23 = vmul.f32 %v8285_v0, %v8285_v0  ;;  %v8286_v61 = vld [vmem:[#allocation23_spill] sm:$0xff]  ;;  %v8295_v0 = vld [vmem:[#allocation29_spill] sm:$0xff]  ;;  %v8301_v46 = vld [vmem:[#allocation32_spill] sm:$0xff] }
 0x108   : > { %v4736_v50 = vpop.xlane.xlu2 %554  ;;  %v865_v30 = vadd.f32 %v864_v9, %v672_v58 }
 0x109   : > { %8269 = vst [vmem:[#allocation4_spill] sm:$0xff] %v4736_v50  ;;  %v4738_v33 = vpop.xlane.xlu1 %550  ;;  %v873_v25 = vadd.f32 %v872_v62, %v676_v37  ;;  %v678_v37 = vmul.f32 %v8286_v61, %v8286_v61  ;;  %v892_v61 = vsel %vm351_vm0, %v687_v29, 0.0  ;;  %v691_v29 = vmul.f32 %v8301_v46, %v8301_v46 }
 0x10a   : > { %8270 = vst [vmem:[#allocation12_spill] sm:$0xff] %v4738_v33  ;;  %v4740_v63 = vpop.xlane.xlu0 %546  ;;  %v8341_v33 = vld [vmem:[#allocation68_spill] sm:$0xff] }
 0x10b   : > { %8271 = vst [vmem:[#allocation13_spill] sm:$0xff] %v4740_v63  ;;  %v4914_v50 = vmul.f32 0.0051020407, %v8341_v33  ;;  %v8345_v33 = vld [vmem:[#allocation69_spill] sm:$0xff] }
 0x10d   : > { %862 = vadd.xlane.f32.xlu2 %v861_v53  ;;  %v8282_v53 = vld [vmem:[#allocation28_spill] sm:$0xff]  ;;  %8342 = vst [vmem:[#allocation34_spill] sm:$0xff] %v4914_v50 }
 0x10e   : > { %858 = vadd.xlane.f32.xlu1 %v857_v13  ;;  %v681_v13 = vmul.f32 %v8282_v53, %v8282_v53  ;;  %v8292_v53 = vld [vmem:[#allocation26_spill] sm:$0xff] }
 0x10f   : > { %854 = vadd.xlane.f32.xlu0 %v853_v31  ;;  %v8283_v31 = vld [vmem:[#allocation20_spill] sm:$0xff] }
 0x110   : > { %v4757_v16 = vpop.xlane.xlu2 %566  ;;  %v679_v45 = vmul.f32 %v8283_v31, %v8283_v31  ;;  %v880_v62 = vsel %vm351_vm0, %v681_v13, 0.0  ;;  %v685_v13 = vmul.f32 %v8292_v53, %v8292_v53  ;;  %v8293_v31 = vld [vmem:[#allocation36_spill] sm:$0xff] }
 0x111   : > { %8278 = vst [vmem:[#allocation5_spill] sm:$0xff] %v4757_v16  ;;  %v4759_v27 = vpop.xlane.xlu1 %562  ;;  %v881_v9 = vadd.f32 %v880_v62, %v680_v23  ;;  %v684_v23 = vmul.f32 %v8295_v0, %v8295_v0  ;;  %v8300_v53 = vld [vmem:[#allocation40_spill] sm:$0xff] }
 0x112   : > { %8279 = vst [vmem:[#allocation15_spill] sm:$0xff] %v4759_v27  ;;  %v4761_v21 = vpop.xlane.xlu0 %558  ;;  %v876_v7 = vsel %vm351_vm0, %v679_v45, 0.0  ;;  %v688_v45 = vmul.f32 %v8293_v31, %v8293_v31  ;;  %v693_v31 = vmul.f32 %v8300_v53, %v8300_v53 }
 0x113   : > { %8280 = vst [vmem:[#allocation16_spill] sm:$0xff] %v4761_v21 }
 0x115   : > { %874 = vadd.xlane.f32.xlu2 %v873_v25  ;;  %v877_v25 = vadd.f32 %v876_v7, %v678_v37  ;;  %v888_v37 = vsel %vm351_vm0, %v685_v13, 0.0  ;;  %v8302_v13 = vld [vmem:[#allocation42_spill] sm:$0xff] }
 0x116   : > { %870 = vadd.xlane.f32.xlu1 %v869_v22  ;;  %v8290_v22 = vld [vmem:[#allocation33_spill] sm:$0xff]  ;;  %v694_v0 = vmul.f32 %v8302_v13, %v8302_v13 }
 0x117   : > { %866 = vadd.xlane.f32.xlu0 %v865_v30  ;;  %v689_v30 = vmul.f32 %v8290_v22, %v8290_v22  ;;  %v889_v22 = vadd.f32 %v888_v37, %v684_v23  ;;  %v900_v37 = vsel %vm351_vm0, %v691_v29, 0.0  ;;  %v8311_v29 = vld [vmem:[#allocation48_spill] sm:$0xff] }
 0x118   : > { %v4778_v41 = vpop.xlane.xlu2 %578 }
 0x119   : > { %8287 = vst [vmem:[#allocation8_spill] sm:$0xff] %v4778_v41  ;;  %v4780_v5 = vpop.xlane.xlu1 %574  ;;  %v896_v15 = vsel %vm351_vm0, %v689_v30, 0.0  ;;  %v8299_v30 = vld [vmem:[#allocation39_spill] sm:$0xff] }
 0x11a   : > { %8288 = vst [vmem:[#allocation18_spill] sm:$0xff] %v4780_v5  ;;  %v4782_v58 = vpop.xlane.xlu0 %570  ;;  %v695_v49 = vmul.f32 %v8299_v30, %v8299_v30  ;;  %v8324_v5 = vld [vmem:[#allocation50_spill] sm:$0xff]  ;;  %v8326_v41 = vld [vmem:[#allocation51_spill] sm:$0xff] }
 0x11b   : > { %8289 = vst [vmem:[#allocation19_spill] sm:$0xff] %v4782_v58  ;;  %v4876_v21 = vmul.f32 0.0051020407, %v8326_v41  ;;  %v8331_v41 = vld [vmem:[#allocation52_spill] sm:$0xff] }
 0x11d   : > { %886 = vadd.xlane.f32.xlu2 %v885_v12  ;;  %8327 = vst [vmem:[#allocation28_spill] sm:$0xff] %v4876_v21 }
 0x11e   : > { %882 = vadd.xlane.f32.xlu1 %v881_v9  ;;  %v897_v9 = vadd.f32 %v896_v15, %v688_v45  ;;  %v8303_v45 = vld [vmem:[#allocation43_spill] sm:$0xff] }
 0x11f   : > { %878 = vadd.xlane.f32.xlu0 %v877_v25  ;;  %v893_v25 = vadd.f32 %v892_v61, %v686_v54  ;;  %v692_v15 = vmul.f32 %v8303_v45, %v8303_v45  ;;  %v8304_v54 = vld [vmem:[#allocation35_spill] sm:$0xff]  ;;  %v904_v61 = vsel %vm351_vm0, %v693_v31, 0.0  ;;  %v8309_v45 = vld [vmem:[#allocation46_spill] sm:$0xff] }
 0x120   : > { %v4799_v62 = vpop.xlane.xlu2 %590  ;;  %v690_v23 = vmul.f32 %v8304_v54, %v8304_v54  ;;  %v8310_v54 = vld [vmem:[#allocation38_spill] sm:$0xff] }
 0x121   : > { %8296 = vst [vmem:[#allocation11_spill] sm:$0xff] %v4799_v62  ;;  %v4801_v7 = vpop.xlane.xlu1 %586  ;;  %v697_v31 = vmul.f32 %v8310_v54, %v8310_v54  ;;  %v8317_v62 = vld [vmem:[#allocation44_spill] sm:$0xff] }
 0x122   : > { %8297 = vst [vmem:[#allocation21_spill] sm:$0xff] %v4801_v7  ;;  %v4803_v12 = vpop.xlane.xlu0 %582  ;;  %v901_v46 = vadd.f32 %v900_v37, %v690_v23  ;;  %v699_v7 = vmul.f32 %v8309_v45, %v8309_v45 }
 0x123   : > { %8298 = vst [vmem:[#allocation22_spill] sm:$0xff] %v4803_v12  ;;  %v908_v12 = vsel %vm351_vm0, %v695_v49, 0.0  ;;  %v8308_v49 = vld [vmem:[#allocation45_spill] sm:$0xff]  ;;  %v912_v37 = vsel %vm351_vm0, %v697_v31, 0.0 }
 0x124   : > { %v701_v13 = vmul.f32 %v8308_v49, %v8308_v49 }
 0x125   : > { %898 = vadd.xlane.f32.xlu2 %v897_v9 }
 0x126   : > { %894 = vadd.xlane.f32.xlu1 %v893_v25  ;;  %v909_v25 = vadd.f32 %v908_v12, %v694_v0  ;;  %v8312_v12 = vld [vmem:[#allocation49_spill] sm:$0xff] }
 0x127   : > { %890 = vadd.xlane.f32.xlu0 %v889_v22  ;;  %v905_v22 = vadd.f32 %v904_v61, %v692_v15  ;;  %v698_v0 = vmul.f32 %v8312_v12, %v8312_v12  ;;  %v8313_v15 = vld [vmem:[#allocation41_spill] sm:$0xff]  ;;  %v916_v61 = vsel %vm351_vm0, %v699_v7, 0.0 }
 0x128   : > { %v4820_v30 = vpop.xlane.xlu2 %602  ;;  %v696_v23 = vmul.f32 %v8313_v15, %v8313_v15  ;;  %v703_v15 = vmul.f32 %v8317_v62, %v8317_v62  ;;  %v8318_v7 = vld [vmem:[#allocation57_spill] sm:$0xff] }
 0x129   : > { %8305 = vst [vmem:[#allocation14_spill] sm:$0xff] %v4820_v30  ;;  %v4822_v9 = vpop.xlane.xlu1 %598  ;;  %v700_v30 = vmul.f32 %v8311_v29, %v8311_v29  ;;  %v8315_v29 = vld [vmem:[#allocation54_spill] sm:$0xff]  ;;  %v706_v31 = vmul.f32 %v8318_v7, %v8318_v7 }
 0x12a   : > { %8306 = vst [vmem:[#allocation24_spill] sm:$0xff] %v4822_v9  ;;  %v4824_v53 = vpop.xlane.xlu0 %594  ;;  %v8316_v9 = vld [vmem:[#allocation55_spill] sm:$0xff] }
 0x12b   : > { %8307 = vst [vmem:[#allocation25_spill] sm:$0xff] %v4824_v53  ;;  %v920_v53 = vsel %vm351_vm0, %v701_v13, 0.0  ;;  %v707_v13 = vmul.f32 %v8315_v29, %v8315_v29  ;;  %v705_v12 = vmul.f32 %v8316_v9, %v8316_v9  ;;  %v924_v9 = vsel %vm351_vm0, %v703_v15, 0.0 }
 0x12c   : > { %v921_v54 = vadd.f32 %v920_v53, %v700_v30  ;;  %v8319_v30 = vld [vmem:[#allocation58_spill] sm:$0xff]  ;;  %v4873_v15 = vmul.f32 0.0051020407, %v8324_v5 }
 0x12d   : > { %910 = vadd.xlane.f32.xlu2 %v909_v25  ;;  %v704_v53 = vmul.f32 %v8319_v30, %v8319_v30  ;;  %v8322_v30 = vld [vmem:[#allocation64_spill] sm:$0xff] }
 0x12e   : > { %906 = vadd.xlane.f32.xlu1 %v905_v22  ;;  %v917_v22 = vadd.f32 %v916_v61, %v698_v0  ;;  %v8320_v0 = vld [vmem:[#allocation47_spill] sm:$0xff]  ;;  %v928_v61 = vsel %vm351_vm0, %v705_v12, 0.0  ;;  %v711_v58 = vmul.f32 %v8322_v30, %v8322_v30  ;;  %8325 = vst [vmem:[#allocation27_spill] sm:$0xff] %v4873_v15 }
 0x12f   : > { %902 = vadd.xlane.f32.xlu0 %v901_v46  ;;  %v913_v46 = vadd.f32 %v912_v37, %v696_v23  ;;  %v702_v23 = vmul.f32 %v8320_v0, %v8320_v0  ;;  %v929_v29 = vadd.f32 %v928_v61, %v704_v53  ;;  %v8323_v0 = vld [vmem:[#allocation53_spill] sm:$0xff] }
 0x130   : > { %v4841_v49 = vpop.xlane.xlu2 %742  ;;  %v709_v12 = vmul.f32 %v8323_v0, %v8323_v0  ;;  %v940_v5 = vsel %vm351_vm0, %v711_v58, 0.0  ;;  %v4888_v0 = vmul.f32 0.0051020407, %v8331_v41  ;;  %v4904_v58 = vmul.f32 %v4876_v21, %v4876_v21  ;;  %v8344_v21 = vld [vmem:[#allocation62_spill] sm:$0xff] }
 0x131   : > { %v739_v25 = vpop.xlane.xlu1 %738  ;;  %v715_v19 = vmul.f32 %v8344_v21, %v8344_v21  ;;  %v8351_v21 = vld [vmem:[#allocation78_spill] sm:$0xff] }
 0x132   : > { %v4843_v45 = vpop.xlane.xlu0 %606  ;;  %v936_v30 = vsel %vm351_vm0, %v709_v12, 0.0  ;;  %8332 = vst [vmem:[#allocation20_spill] sm:$0xff] %v4888_v0 }
 0x133   : > { %8314 = vst [vmem:[#allocation17_spill] sm:$0xff] %v4843_v45  ;;  %v932_v45 = vsel %vm351_vm0, %v707_v13, 0.0  ;;  %v948_v44 = vsel %vm351_vm0, %v715_v19, 0.0 }
 0x135   : > { %922 = vadd.xlane.f32.xlu2 %v921_v54  ;;  %v933_v54 = vadd.f32 %v932_v45, %v706_v31  ;;  %v8328_v45 = vld [vmem:[#allocation66_spill] sm:$0xff] }
 0x136   : > { %918 = vadd.xlane.f32.xlu1 %v917_v22  ;;  %v925_v22 = vadd.f32 %v924_v9, %v702_v23  ;;  %v712_v31 = vmul.f32 %v8328_v45, %v8328_v45  ;;  %v8329_v23 = vld [vmem:[#allocation67_spill] sm:$0xff]  ;;  %v8330_v9 = vld [vmem:[#allocation56_spill] sm:$0xff]  ;;  %v4900_v45 = vmul.f32 %v4873_v15, %v4873_v15  ;;  %v1056_v15 = vmul.f32 0.0051020407, %v739_v25  ;;  %v8347_v25 = vld [vmem:[#allocation70_spill] sm:$0xff] }
 0x137   : > { %914 = vadd.xlane.f32.xlu0 %v913_v46  ;;  %v8321_v46 = vld [vmem:[#allocation63_spill] sm:$0xff]  ;;  %v710_v61 = vmul.f32 %v8329_v23, %v8329_v23 }
 0x138   : > { %v4860_v37 = vpop.xlane.xlu2 %754  ;;  %v713_v13 = vmul.f32 %v8321_v46, %v8321_v46  ;;  %v708_v46 = vmul.f32 %v8330_v9, %v8330_v9  ;;  %v8338_v9 = vld [vmem:[#allocation61_spill] sm:$0xff] }
 0x139   : > { %v4866_v7 = vpop.xlane.xlu1 %750  ;;  %v4909_v41 = vmul.f32 0.0051020407, %v8338_v9  ;;  %v4940_v9 = vmul.f32 0.0051020407, %v8351_v21  ;;  %v714_v21 = vmul.f32 %v8355_v43, %v8355_v43  ;;  %v1057_v43 = vmul.f32 0.0051020407, %v4841_v49 }
 0x13a   : > { %v4862_v62 = vpop.xlane.xlu0 %746  ;;  %v944_v53 = vsel %vm351_vm0, %v713_v13, 0.0  ;;  %v937_v16 = vadd.f32 %v936_v30, %v708_v46  ;;  %v4931_v46 = vmul.f32 0.0051020407, %v8345_v33  ;;  %v4937_v30 = vmul.f32 0.0051020407, %v8349_v57 }
 0x13b   : > { %v945_v23 = vadd.f32 %v944_v53, %v712_v31  ;;  %8339 = vst [vmem:[#allocation33_spill] sm:$0xff] %v4909_v41  ;;  %v1120_v31 = vmul.f32 %v4888_v0, %v4888_v0  ;;  %v1059_v51 = vmul.f32 0.0051020407, %v4866_v7  ;;  %v5006_v7 = vmul.f32 0.0051020407, %v4498_v40 }
 0x13c   : > { %8346 = vst [vmem:[#allocation26_spill] sm:$0xff] %v4931_v46  ;;  %v4978_v19 = vmul.f32 %v4937_v30, %v4937_v30 }
 0x13d   : > { %934 = vadd.xlane.f32.xlu2 %v933_v54  ;;  %v8333_v54 = vld [vmem:[#allocation59_spill] sm:$0xff]  ;;  %8350 = vst [vmem:[#allocation37_spill] sm:$0xff] %v4937_v30 }
 0x13e   : > { %930 = vadd.xlane.f32.xlu1 %v929_v29  ;;  %v4891_v27 = vmul.f32 0.0051020407, %v8333_v54  ;;  %v8335_v29 = vld [vmem:[#allocation60_spill] sm:$0xff]  ;;  %v941_v54 = vadd.f32 %v940_v5, %v710_v61  ;;  %v4934_v5 = vmul.f32 0.0051020407, %v8347_v25  ;;  %8352 = vst [vmem:[#allocation29_spill] sm:$0xff] %v4940_v9 }
 0x13f   : > { %926 = vadd.xlane.f32.xlu0 %v925_v22  ;;  %v4894_v22 = vmul.f32 0.0051020407, %v8335_v29  ;;  %v8340_v29 = vld [vmem:[#allocation72_spill] sm:$0xff]  ;;  %8369 = vst [vmem:[#allocation46_spill] sm:$0xff] %v5006_v7 }
 0x140   : > { %8334 = vst [vmem:[#allocation30_spill] sm:$0xff] %v4891_v27  ;;  %v4896_v13 = vpop.xlane.xlu2 %766  ;;  %v719_v63 = vmul.f32 %v8340_v29, %v8340_v29  ;;  %v4924_v53 = vmul.f32 %v4891_v27, %v4891_v27  ;;  %v8353_v27 = vld [vmem:[#allocation75_spill] sm:$0xff]  ;;  %v8354_v25 = vld [vmem:[#allocation76_spill] sm:$0xff] }
 0x141   : > { %8336 = vst [vmem:[#allocation31_spill] sm:$0xff] %v4894_v22  ;;  %v4928_v61 = vmul.f32 %v4894_v22, %v4894_v22  ;;  %v4942_v29 = vpop.xlane.xlu1 %762  ;;  %v718_v0 = vmul.f32 %v8353_v27, %v8353_v27  ;;  %v1121_v22 = vmul.f32 %v4909_v41, %v4909_v41  ;;  %v716_v57 = vmul.f32 %v8354_v25, %v8354_v25 }
 0x142   : > { %8337 = vst [vmem:[#allocation23_spill] sm:$0xff] %v4896_v13  ;;  %v4906_v12 = vpop.xlane.xlu0 %758  ;;  %v956_v33 = vsel %vm351_vm0, %v719_v63, 0.0  ;;  %v4955_v13 = vmul.f32 %v4914_v50, %v4914_v50  ;;  %v952_v27 = vsel %vm351_vm0, %v717_v59, 0.0  ;;  %v8357_v63 = vld [vmem:[#allocation79_spill] sm:$0xff]  ;;  %v4967_v25 = vmul.f32 0.0051020407, %v4465_v52 }
 0x143   : > { %8348 = vst [vmem:[#allocation36_spill] sm:$0xff] %v4934_v5  ;;  %v4982_v59 = vmul.f32 %v4940_v9, %v4940_v9  ;;  %v8362_v52 = vld [vmem:[#allocation86_spill] sm:$0xff]  ;;  %v953_v49 = vadd.f32 %v952_v27, %v716_v57  ;;  %v721_v9 = vmul.f32 %v8366_v39, %v8366_v39  ;;  %v1058_v39 = vmul.f32 0.0051020407, %v4862_v62  ;;  %v8372_v27 = vld [vmem:[#allocation84_spill] sm:$0xff] }
 0x144   : > { %8359 = vst [vmem:[#allocation32_spill] sm:$0xff] %v4967_v25  ;;  %v4985_v50 = vmul.f32 0.0051020407, %v8362_v52  ;;  %v1187_v62 = vsub.f32 %v1059_v51, %v4928_v61  ;;  %v5041_v51 = vmul.f32 %v5006_v7, %v5006_v7 }
 0x145   : > { %946 = vadd.xlane.f32.xlu2 %v945_v23  ;;  %v1184_v23 = vsub.f32 %v1056_v15, %v1120_v31  ;;  %v4974_v15 = vmul.f32 %v4934_v5, %v4934_v5 }
 0x146   : > { %942 = vadd.xlane.f32.xlu1 %v941_v54  ;;  %v4964_v54 = vmul.f32 0.0051020407, %v8357_v63  ;;  %v957_v63 = vadd.f32 %v956_v33, %v718_v0  ;;  %8363 = vst [vmem:[#allocation35_spill] sm:$0xff] %v4985_v50  ;;  %v5000_v33 = vmul.f32 %v4967_v25, %v4967_v25  ;;  %v5016_v52 = vmul.f32 %v4985_v50, %v4985_v50 }
 0x147   : > { %938 = vadd.xlane.f32.xlu0 %v937_v16  ;;  %v4961_v16 = vmul.f32 %v4931_v46, %v4931_v46  ;;  %8361 = vst [vmem:[#allocation43_spill] sm:$0xff] %v4974_v15  ;;  %v949_v46 = vadd.f32 %v948_v44, %v714_v21  ;;  %v1248_v5 = vmax.f32 %v1184_v23, 0.0  ;;  %v8365_v15 = vld [vmem:[#allocation82_spill] sm:$0xff]  ;;  %v8367_v44 = vld [vmem:[#allocation87_spill] sm:$0xff]  ;;  %v8370_v21 = vld [vmem:[#allocation93_spill] sm:$0xff]  ;;  %v1251_v7 = vmax.f32 %v1187_v62, 0.0 }
 0x148   : > { %8358 = vst [vmem:[#allocation40_spill] sm:$0xff] %v4964_v54  ;;  %v4970_v41 = vpop.xlane.xlu2 %778  ;;  %v723_v30 = vmul.f32 %v8365_v15, %v8365_v15  ;;  %v4996_v0 = vmul.f32 %v4964_v54, %v4964_v54  ;;  %v5003_v57 = vmul.f32 0.0051020407, %v8367_v44  ;;  %v5009_v23 = vmul.f32 0.0051020407, %v8370_v21  ;;  %v8375_v44 = vld [vmem:[#allocation74_spill] sm:$0xff] }
 0x149   : > { %8356 = vst [vmem:[#allocation39_spill] sm:$0xff] %v4961_v16  ;;  %v724_v15 = vmul.f32 %v8372_v27, %v8372_v27  ;;  %v720_v21 = vmul.f32 %v8375_v44, %v8375_v44  ;;  %v5023_v25 = vadd.f32 1e-05, %v1248_v5  ;;  %v960_v54 = vsel %vm351_vm0, %v721_v9, 0.0  ;;  %v8385_v62 = vld [vmem:[#allocation92_spill] sm:$0xff] }
 0x14a   : > { %8360 = vst [vmem:[#allocation42_spill] sm:$0xff] %v4970_v41  ;;  %v771_v31 = vpop.xlane.xlu0 %770  ;;  %v8364_v41 = vld [vmem:[#allocation81_spill] sm:$0xff]  ;;  %v964_v27 = vsel %vm351_vm0, %v723_v30, 0.0  ;;  %v5045_v61 = vmul.f32 %v5009_v23, %v5009_v23  ;;  %v1186_v5 = vsub.f32 %v1058_v39, %v4904_v58 }
 0x14b   : > { %v725_v16 = vmul.f32 %v8364_v41, %v8364_v41  ;;  %8368 = vst [vmem:[#allocation45_spill] sm:$0xff] %v5003_v57  ;;  %v1185_v41 = vsub.f32 %v1057_v43, %v1121_v22  ;;  %v8374_v43 = vld [vmem:[#allocation85_spill] sm:$0xff]  ;;  %3601 = vrsqrt.f32 %v5023_v25  ;;  %vm1382_vm2 = vweird.f32 %v5023_v25 }
 0x14c   : > { %8371 = vst [vmem:[#allocation38_spill] sm:$0xff] %v5009_v23  ;;  %v722_v40 = vmul.f32 %v8374_v43, %v8374_v43  ;;  %v1064_v43 = vmul.f32 0.0051020407, %v771_v31  ;;  %v8379_v31 = vld [vmem:[#allocation89_spill] sm:$0xff]  ;;  %v8381_v23 = vld [vmem:[#allocation80_spill] sm:$0xff] }
 0x14d   : > { %958 = vadd.xlane.f32.xlu2 %v957_v63  ;;  %8373 = vst [vmem:[#allocation48_spill] sm:$0xff] %v5016_v52  ;;  %v968_v22 = vsel %vm351_vm0, %v725_v16, 0.0  ;;  %v5026_v63 = vpop.xlane.xlu1 %774  ;;  %v5035_v16 = vmul.f32 0.0051020407, %v4502_v42  ;;  %v1060_v42 = vmul.f32 0.0051020407, %v4860_v37  ;;  %v731_v50 = vmul.f32 %v8379_v31, %v8379_v31 }
 0x14e   : > { %954 = vadd.xlane.f32.xlu1 %v953_v49  ;;  %v1249_v49 = vmax.f32 %v1185_v41, 0.0  ;;  %8378 = vst [vmem:[#allocation54_spill] sm:$0xff] %v5045_v61  ;;  %v969_v9 = vadd.f32 %v968_v22, %v724_v15  ;;  %v961_v41 = vadd.f32 %v960_v54, %v720_v21  ;;  %v727_v61 = vmul.f32 %v8381_v23, %v8381_v23 }
 0x14f   : > { %950 = vadd.xlane.f32.xlu0 %v949_v46  ;;  %v5032_v46 = vmul.f32 %v5003_v57, %v5003_v57  ;;  %8377 = vst [vmem:[#allocation41_spill] sm:$0xff] %v5035_v16  ;;  %v965_v57 = vadd.f32 %v964_v27, %v722_v40  ;;  %v5060_v58 = vmul.f32 %v5035_v16, %v5035_v16  ;;  %v5063_v37 = vmul.f32 0.0051020407, %v4525_v14  ;;  %v8386_v27 = vld [vmem:[#allocation83_spill] sm:$0xff] }
 0x150   : > { %v5037_v44 = vpop.xlane.xlu2 %790  ;;  %v5065_v54 = vadd.f32 1e-05, %v1249_v49  ;;  %v1192_v39 = vsub.f32 %v1064_v43, %v4955_v13  ;;  %v5069_v15 = vmul.f32 0.0051020407, %v4527_v11  ;;  %v1250_v22 = vmax.f32 %v1186_v5, 0.0 }
 0x151   : > { %8376 = vst [vmem:[#allocation49_spill] sm:$0xff] %v5032_v46  ;;  %v8380_v46 = vld [vmem:[#allocation90_spill] sm:$0xff]  ;;  %v1061_v40 = vmul.f32 0.0051020407, %v4906_v12  ;;  %v730_v23 = vmul.f32 %v4489_v28, %v4489_v28  ;;  %v5075_v21 = vmul.f32 0.0051020407, %v4529_v8  ;;  %v728_v13 = vmul.f32 %v8385_v62, %v8385_v62  ;;  %v5094_v43 = vpop.eup %3601 }
 0x152   : > { %v5048_v30 = vpop.xlane.xlu0 %782  ;;  %v729_v52 = vmul.f32 %v8380_v46, %v8380_v46  ;;  %8382 = vst [vmem:[#allocation55_spill] sm:$0xff] %v5063_v37  ;;  %v980_v14 = vsel %vm351_vm0, %v731_v50, 0.0  ;;  %v726_v11 = vmul.f32 %v8386_v27, %v8386_v27  ;;  %v1188_v46 = vsub.f32 %v1060_v42, %v4900_v45 }
 0x153   : > { %8383 = vst [vmem:[#allocation44_spill] sm:$0xff] %v5069_v15  ;;  %v5083_v12 = vadd.f32 1e-05, %v1251_v7  ;;  %v972_v28 = vsel %vm351_vm0, %v727_v61, 0.0  ;;  %v5089_v8 = vmul.f32 %v5063_v37, %v5063_v37  ;;  %3603 = vrsqrt.f32 %v5065_v54 }
 0x154   : > { %8384 = vst [vmem:[#allocation57_spill] sm:$0xff] %v5075_v21  ;;  %v976_v49 = vsel %vm351_vm0, %v729_v52, 0.0  ;;  %v1256_v50 = vmax.f32 %v1192_v39, 0.0  ;;  %v5098_v45 = vmul.f32 %v5069_v15, %v5069_v15  ;;  %v5100_v7 = vadd.f32 1e-05, %v1250_v22 }
 0x155   : > { %970 = vadd.xlane.f32.xlu2 %v969_v9  ;;  %v1189_v52 = vsub.f32 %v1061_v40, %v4924_v53  ;;  %v5103_v61 = vpop.xlane.xlu1 %786  ;;  %v981_v5 = vadd.f32 %v980_v14, %v730_v23  ;;  %v3865_v9 = vmov 0   ;;  %v5106_v42 = vmul.f32 0.0051020407, %v4547_v34  ;;  %v8389_v53 = vld [vmem:[#allocation94_spill] sm:$0xff]  ;;  %v8390_v23 = vld [vmem:[#allocation88_spill] sm:$0xff] }
 0x156   : > { %966 = vadd.xlane.f32.xlu1 %v965_v57  ;;  %3598 = vset.pattern.permute.xlu2 %v3865_v9  ;;  %v977_v31 = vadd.f32 %v976_v49, %v728_v13  ;;  %v973_v39 = vadd.f32 %v972_v28, %v726_v11  ;;  %v1252_v62 = vmax.f32 %v1188_v46, 0.0  ;;  %3605 = vrsqrt.f32 %v5083_v12 }
 0x157   : > { %962 = vadd.xlane.f32.xlu0 %v961_v41  ;;  %8387 = vst [vmem:[#allocation58_spill] sm:$0xff] %v5106_v42  ;;  %v5109_v41 = vmul.f32 0.0051020407, %v4549_v4  ;;  %3600 = vset.pattern.permute.xlu1 %v3865_v9  ;;  %v735_v40 = vmul.f32 %v8389_v53, %v8389_v53  ;;  %v733_v14 = vmul.f32 %v8390_v23, %v8390_v23  ;;  %v5123_v4 = vmul.f32 0.0051020407, %v4551_v6 }
 0x158   : > { %v5092_v57 = vpop.xlane.xlu2 %802  ;;  %3599 = vset.pattern.permute.xlu0 %v3865_v9  ;;  %v5120_v34 = vmul.f32 %v5075_v21, %v5075_v21  ;;  %v1377_v13 = vmul.f32 %v5094_v43, %v5023_v25  ;;  %v5127_v27 = vadd.f32 1e-05, %v1256_v50  ;;  %v5130_v11 = vmul.f32 0.0051020407, %v4568_v3  ;;  %v8394_v3 = vld [vmem:[#allocation91_spill] sm:$0xff] }
 0x159   : > { %8388 = vst [vmem:[#allocation47_spill] sm:$0xff] %v5109_v41  ;;  %v5133_v46 = vmul.f32 0.0051020407, %v4570_v10  ;;  %3607 = vrsqrt.f32 %v5100_v7  ;;  %v1253_v49 = vmax.f32 %v1189_v52, 0.0  ;;  %v5136_v28 = vpop.eup %3603  ;;  %v5140_v6 = vmul.f32 %v5106_v42, %v5106_v42 }
 0x15a   : > { %v5112_v22 = vpop.xlane.xlu0 %794  ;;  %8391 = vst [vmem:[#allocation63_spill] sm:$0xff] %v5123_v4  ;;  %v734_v50 = vmul.f32 %v4521_v35, %v4521_v35  ;;  %v732_v9 = vmul.f32 %v8394_v3, %v8394_v3  ;;  %v5148_v10 = vmul.f32 %v5109_v41, %v5109_v41  ;;  %v5150_v52 = vadd.f32 1e-05, %v1252_v62 }
 0x15b   : > { %8392 = vst [vmem:[#allocation64_spill] sm:$0xff] %v5130_v11  ;;  %v984_v53 = vsel %vm351_vm0, %v733_v14, 0.0  ;;  %v1378_v35 = vmul.f32 %v5094_v43, %v1377_v13  ;;  %3609 = vrsqrt.f32 %v5127_v27  ;;  %v5167_v62 = vmul.f32 %v5130_v11, %v5130_v11 }
 0x15c   : > { %8393 = vst [vmem:[#allocation53_spill] sm:$0xff] %v5133_v46  ;;  %v5163_v23 = vpop.eup %3605  ;;  %v1387_v14 = vmul.f32 %v5136_v28, %v5065_v54  ;;  %v5175_v3 = vadd.f32 1e-05, %v1253_v49  ;;  %v5181_v13 = vmul.f32 0.0051020407, %v4591_v24  ;;  %v985_v11 = vadd.f32 %v984_v53, %v732_v9 }
 0x15d   : > { %982 = vadd.xlane.f32.xlu2 %v981_v5  ;;  %v988_v5 = vsel %vm351_vm0, %v735_v40, 0.0  ;;  %v5171_v40 = vmul.f32 %v5133_v46, %v5133_v46  ;;  %v5188_v46 = vmul.f32 0.0051020407, %v4593_v2  ;;  %v5191_v21 = vmul.f32 0.0051020407, %v4610_v1  ;;  %v5195_v49 = vpop.xlane.xlu1 %798 }
 0x15e   : > { %978 = vadd.xlane.f32.xlu1 %v977_v31  ;;  %v5156_v31 = vmul.f32 %v5123_v4, %v5123_v4  ;;  %8397 = vst [vmem:[#allocation66_spill] sm:$0xff] %v5181_v13  ;;  %v989_v4 = vadd.f32 %v988_v5, %v734_v50  ;;  %3611 = vrsqrt.f32 %v5150_v52  ;;  %v5198_v24 = vmul.f32 0.0051020407, %v4612_v36 }
 0x15f   : > { %974 = vadd.xlane.f32.xlu0 %v973_v39  ;;  %v5159_v39 = vmul.f32 0.0051020407, %v4572_v18  ;;  %v5178_v18 = vmul.f32 0.0051020407, %v4589_v17  ;;  %v5185_v37 = vpop.eup %3607  ;;  %8398 = vst [vmem:[#allocation67_spill] sm:$0xff] %v5188_v46  ;;  %v1379_v9 = vmul.f32 0.5, %v1378_v35  ;;  %v1407_v2 = vmul.f32 %v5163_v23, %v5083_v12 }
 0x160   : > { %v5183_v42 = vpop.xlane.xlu2 %814  ;;  %8399 = vst [vmem:[#allocation56_spill] sm:$0xff] %v5191_v21  ;;  %v1067_v17 = vmul.f32 0.0051020407, %v5048_v30  ;;  %v5201_v50 = vmul.f32 0.0051020407, %v4614_v32  ;;  %v1388_v30 = vmul.f32 %v5136_v28, %v1387_v14  ;;  %3613 = vrsqrt.f32 %v5175_v3 }
 0x161   : > { %8395 = vst [vmem:[#allocation50_spill] sm:$0xff] %v5159_v39  ;;  %v5207_v1 = vmul.f32 %v5159_v39, %v5159_v39  ;;  %v5210_v5 = vmul.f32 0.0051020407, %v4631_v47  ;;  %v5216_v53 = vpop.eup %3609  ;;  %v5220_v32 = vmul.f32 %v5178_v18, %v5178_v18  ;;  %v5224_v35 = vmul.f32 %v5181_v13, %v5181_v13 }
 0x162   : > { %8396 = vst [vmem:[#allocation51_spill] sm:$0xff] %v5178_v18  ;;  %v5214_v36 = vpop.xlane.xlu0 %806  ;;  %v5227_v39 = vmul.f32 0.0051020407, %v4633_v48  ;;  %v1397_v47 = vmul.f32 %v5185_v37, %v5100_v7  ;;  %v5233_v14 = vmul.f32 %v5188_v46, %v5188_v46  ;;  %v5237_v18 = vmul.f32 %v5191_v21, %v5191_v21 }
 0x163   : > { %8400 = vst [vmem:[#allocation52_spill] sm:$0xff] %v5198_v24  ;;  %v5240_v13 = vmul.f32 0.0051020407, %v4635_v38  ;;  %v1195_v48 = vsub.f32 %v1067_v17, %v4978_v19  ;;  %v5245_v41 = vmul.f32 %v5198_v24, %v5198_v24  ;;  %v1380_v46 = vsub.f32 1.5, %v1379_v9 }
 0x164   : > { %8401 = vst [vmem:[#allocation59_spill] sm:$0xff] %v5201_v50  ;;  %v5252_v16 = vpop.eup %3611  ;;  %v5256_v21 = vmul.f32 %v5210_v5, %v5210_v5  ;;  %v5259_v38 = vmul.f32 0.0051020407, %v4652_v56  ;;  %v1389_v19 = vmul.f32 0.5, %v1388_v30  ;;  %v1457_v17 = vmul.f32 %v5216_v53, %v5127_v27 }
 0x165   : > { %8402 = vst [vmem:[#allocation60_spill] sm:$0xff] %v5210_v5  ;;  %v5271_v9 = vmul.f32 0.0051020407, %v4656_v26  ;;  %v1398_v5 = vmul.f32 %v5185_v37, %v1397_v47  ;;  %v5279_v30 = vmul.f32 %v5240_v13, %v5240_v13  ;;  %v5282_v24 = vmul.f32 0.0051020407, %v4673_v55 }
 0x166   : > { %8403 = vst [vmem:[#allocation61_spill] sm:$0xff] %v5227_v39  ;;  %990 = vadd.xlane.f32.xlu1 %v989_v4  ;;  %v5249_v4 = vmul.f32 %v5201_v50, %v5201_v50  ;;  %v5265_v50 = vmul.f32 %v5227_v39, %v5227_v39  ;;  %v5275_v56 = vpop.eup %3613  ;;  %v5285_v39 = vmul.f32 0.0051020407, %v4675_v20  ;;  %v1417_v26 = vmul.f32 %v5252_v16, %v5150_v52 }
 0x167   : > { %986 = vadd.xlane.f32.xlu0 %v985_v11  ;;  %8404 = vst [vmem:[#allocation72_spill] sm:$0xff] %v5237_v18  ;;  %v1408_v11 = vmul.f32 %v5163_v23, %v1407_v2  ;;  %v5268_v2 = vmul.f32 0.0051020407, %v4654_v60  ;;  %v1259_v60 = vmax.f32 %v1195_v48, 0.0  ;;  %vm1383_vm1 = vweird.f32 %v5094_v43 }
 0x168   : > { %8405 = vst [vmem:[#allocation68_spill] sm:$0xff] %v5240_v13  ;;  %v5289_v47 = vpop.xlane.xlu2 %826  ;;  %v5295_v13 = vmul.f32 %v5259_v38, %v5259_v38  ;;  %v1062_v55 = vmul.f32 0.0051020407, %v4942_v29  ;;  %v1458_v20 = vmul.f32 %v5216_v53, %v1457_v17  ;;  %v1427_v29 = vmul.f32 %v5275_v56, %v5175_v3  ;;  %vm5332_vm3 = vmor %vm1382_vm2, %vm1383_vm1 }
 0x169   : > { %8406 = vst [vmem:[#allocation73_spill] sm:$0xff] %v5245_v41  ;;  %v1409_v15 = vmul.f32 0.5, %v1408_v11  ;;  %v5310_v48 = vmul.f32 %v5268_v2, %v5268_v2  ;;  %v1399_v11 = vmul.f32 0.5, %v1398_v5  ;;  %v5317_v17 = vmul.f32 %v5271_v9, %v5271_v9 }
 0x16a   : > { %8407 = vst [vmem:[#allocation62_spill] sm:$0xff] %v5249_v4  ;;  %v5338_v25 = vmul.f32 %v5285_v39, %v5285_v39  ;;  %vm1393_vm4 = vweird.f32 %v5136_v28  ;;  %v8426_v4 = vld [vmem:[#allocation2_spill] sm:$0xff]  ;;  %vm1392_vm5 = vweird.f32 %v5065_v54  ;;  %vm1413_vm7 = vweird.f32 %v5163_v23 }
 0x16b   : > { %8408 = vst [vmem:[#allocation69_spill] sm:$0xff] %v5256_v21  ;;  %v1381_v21 = vmul.f32 %v5094_v43, %v1380_v46  ;;  %v1390_v46 = vsub.f32 1.5, %v1389_v19  ;;  %v5349_v41 = vmul.f32 0.0051020407, %v8426_v4  ;;  %v1400_v5 = vsub.f32 1.5, %v1399_v11  ;;  %vm5364_vm6 = vmor %vm1392_vm5, %vm1393_vm4 }
 0x16c   : > { %8409 = vst [vmem:[#allocation70_spill] sm:$0xff] %v5259_v38  ;;  %v5321_v38 = vmul.f32 %v5282_v24, %v5282_v24  ;;  %vm1412_vm8 = vweird.f32 %v5083_v12  ;;  %vm1403_vm9 = vweird.f32 %v5185_v37  ;;  %vm1402_vm11 = vweird.f32 %v5100_v7  ;;  %v8449_v7 = vld [vmem:[#allocation10_spill] sm:$0xff] }
 0x16d   : > { %8410 = vst [vmem:[#allocation77_spill] sm:$0xff] %v5265_v50  ;;  %v5326_v50 = vadd.f32 1e-05, %v1259_v60  ;;  %v2016_v60 = vld [vmem:[%s5306_s22] sm:$0xff]  ;;  %v1391_v18 = vmul.f32 %v5136_v28, %v1390_v46  ;;  %vm5399_vm10 = vmor %vm1412_vm8, %vm1413_vm7  ;;  %vm1463_vm13 = vweird.f32 %v5216_v53  ;;  %vm1462_vm14 = vweird.f32 %v5127_v27 }
 0x16e   : > { %8411 = vst [vmem:[#allocation78_spill] sm:$0xff] %v5268_v2  ;;  %v5328_v2 = vpop.xlane.xlu0 %818  ;;  %vm5421_vm12 = vmor %vm1402_vm11, %vm1403_vm9  ;;  %vm1423_vm1 = vweird.f32 %v5252_v16  ;;  %vm1422_vm2 = vweird.f32 %v5150_v52  ;;  %vm1432_vm5 = vweird.f32 %v5175_v3 }
 0x16f   : > { %8412 = vst [vmem:[#allocation75_spill] sm:$0xff] %v5271_v9  ;;  %v1410_v9 = vsub.f32 1.5, %v1409_v15  ;;  %3615 = vrsqrt.f32 %v5326_v50  ;;  %v1395_v54 = vsel %vm5364_vm6, %v5136_v28, %v1391_v18  ;;  %v8439_v28 = vld [vmem:[#allocation3_spill] sm:$0xff]  ;;  %vm5447_vm15 = vmor %vm1462_vm14, %vm1463_vm13  ;;  %vm1492_vm8 = vweird.f32 %v5326_v50 }
 0x170   : > { %8413 = vst [vmem:[#allocation76_spill] sm:$0xff] %v5279_v30  ;;  %v5299_v30 = vpop.xlane.xlu1 %810  ;;  %v5392_v18 = vmul.f32 0.0051020407, %v8439_v28  ;;  %vm5480_vm4 = vmor %vm1422_vm2, %vm1423_vm1 }
 0x171   : > { %8414 = vst [vmem:[#allocation65_spill] sm:$0xff] %v5282_v24  ;;  %v1418_v24 = vmul.f32 %v5252_v16, %v1417_v26  ;;  %v1428_v26 = vmul.f32 %v5275_v56, %v1427_v29 }
 0x172   : > { %8415 = vst [vmem:[#allocation79_spill] sm:$0xff] %v5285_v39  ;;  %v8428_v39 = vld [vmem:[#allocation6_spill] sm:$0xff] }
 0x173   : > { %8416 = vst [vmem:[#allocation86_spill] sm:$0xff] %v5295_v13  ;;  %v8420_v13 = vld [vmem:[#allocation95_spill] sm:$0xff]  ;;  %v1419_v4 = vmul.f32 0.5, %v1418_v24 }
 0x174   : > { %8417 = vst [vmem:[#allocation81_spill] sm:$0xff] %v5310_v48  ;;  %v5324_v19 = vmul.f32 0.0051020407, %v8420_v13  ;;  %v1385_v13 = vsel %vm5332_vm3, %v5094_v43, %v1381_v21  ;;  %v1459_v48 = vmul.f32 0.5, %v1458_v20  ;;  %v8430_v21 = vld [vmem:[#allocation23_spill] sm:$0xff]  ;;  %vm1433_vm3 = vweird.f32 %v5275_v56 }
 0x175   : > { %8418 = vst [vmem:[#allocation82_spill] sm:$0xff] %v5317_v17  ;;  %v1063_v43 = vmul.f32 0.0051020407, %v8430_v21  ;;  %v5357_v15 = vmul.f32 %v2016_v60, %v1385_v13  ;;  %v8435_v20 = vld [vmem:[#allocation7_spill] sm:$0xff]  ;;  %v1429_v13 = vmul.f32 0.5, %v1428_v26  ;;  %v5378_v60 = vpop.xlane.xlu2 %838  ;;  %v1420_v28 = vsub.f32 1.5, %v1419_v4  ;;  %vm5510_vm6 = vmor %vm1432_vm5, %vm1433_vm3 }
 0x176   : > { %8419 = vst [vmem:[#allocation71_spill] sm:$0xff] %v5321_v38  ;;  %v8425_v38 = vld [vmem:[#allocation43_spill] sm:$0xff]  ;;  %v5371_v46 = vmul.f32 0.0051020407, %v8435_v20  ;;  %v1460_v29 = vsub.f32 1.5, %v1459_v48 }
 0x177   : > { %8421 = vst [vmem:[#allocation87_spill] sm:$0xff] %v5324_v19  ;;  %v1190_v17 = vsub.f32 %v1062_v55, %v8425_v38  ;;  %v5362_v38 = vmul.f32 %v5324_v19, %v5324_v19  ;;  %v1411_v55 = vmul.f32 %v5163_v23, %v1410_v9  ;;  %2338 = vperm.xlu2 %3598, %v5357_v15   ;;  %v2017_v24 = vld [vmem:[%s5306_s22 + $0x8] sm:$0xff]  ;;  %v5428_v4 = vmul.f32 0.0051020407, %v8449_v7  ;;  %v8454_v7 = vld [vmem:[#allocation12_spill] sm:$0xff] }
 0x178   : > { %8424 = vst [vmem:[#allocation93_spill] sm:$0xff] %v5338_v25  ;;  %v5352_v25 = vmul.f32 0.0051020407, %v8428_v39  ;;  %v1401_v9 = vmul.f32 %v5185_v37, %v1400_v5  ;;  %v8441_v48 = vld [vmem:[#allocation39_spill] sm:$0xff]  ;;  %v5395_v39 = vpop.xlane.xlu1 %822  ;;  %v5403_v5 = vmul.f32 %v2017_v24, %v1395_v54  ;;  %v2018_v24 = vld [vmem:[%s5306_s22 + $0x10] sm:$0xff]  ;;  %v1430_v12 = vsub.f32 1.5, %v1429_v13 }
 0x179   : > { %8427 = vst [vmem:[#allocation84_spill] sm:$0xff] %v5349_v41  ;;  %v1254_v11 = vmax.f32 %v1190_v17, 0.0  ;;  %v5385_v17 = vmul.f32 %v5349_v41, %v5349_v41  ;;  %v1191_v26 = vsub.f32 %v1063_v43, %v8441_v48  ;;  %v1415_v20 = vsel %vm5399_vm10, %v5163_v23, %v1411_v55  ;;  %v2019_v41 = vld [vmem:[%s5306_s22 + $0x18] sm:$0xff]  ;;  %v5410_v43 = vpop.eup %3615 }
 0x17a   : > { %8429 = vst [vmem:[#allocation85_spill] sm:$0xff] %v5352_v25  ;;  %v5389_v21 = vmul.f32 %v5352_v25, %v5352_v25  ;;  %v8445_v48 = vld [vmem:[#allocation9_spill] sm:$0xff]  ;;  %v1461_v23 = vmul.f32 %v5216_v53, %v1460_v29  ;;  %v1070_v55 = vmul.f32 0.0051020407, %v5112_v22  ;;  %v1487_v22 = vmul.f32 %v5410_v43, %v5326_v50 }
 0x17b   : > { %8431 = vst [vmem:[#allocation74_spill] sm:$0xff] %v5357_v15  ;;  %v5413_v19 = vmul.f32 0.0051020407, %v8445_v48  ;;  %v5415_v25 = vadd.f32 1e-05, %v1254_v11  ;;  %v5417_v15 = vpop.xlane.xlu0 %830  ;;  %2343 = vperm.xlu0 %3599, %v5403_v5   ;;  %v1405_v11 = vsel %vm5421_vm12, %v5185_v37, %v1401_v9  ;;  %v8451_v48 = vld [vmem:[#allocation4_spill] sm:$0xff]  ;;  %v1421_v37 = vmul.f32 %v5252_v16, %v1420_v28 }
 0x17c   : > { %8432 = vst [vmem:[#allocation89_spill] sm:$0xff] %v5362_v38  ;;  %v1255_v29 = vmax.f32 %v1191_v26, 0.0  ;;  %v5443_v38 = vmul.f32 0.0051020407, %v8454_v7  ;;  %v5456_v27 = vmul.f32 %v2018_v24, %v1405_v11  ;;  %v1465_v9 = vsel %vm5447_vm15, %v5216_v53, %v1461_v23  ;;  %v2024_v26 = vld [vmem:[%s5306_s22 + $0x40] sm:$0xff] }
 0x17d   : > { %8436 = vst [vmem:[#allocation90_spill] sm:$0xff] %v5371_v46  ;;  %3617 = vrsqrt.f32 %v5415_v25  ;;  %v1431_v28 = vmul.f32 %v5275_v56, %v1430_v12  ;;  %v5472_v11 = vmul.f32 %v5392_v18, %v5392_v18  ;;  %v1065_v53 = vmul.f32 0.0051020407, %v5026_v63  ;;  %v5485_v23 = vpop.xlane.xlu2 %850  ;;  %v2020_v63 = vld [vmem:[%s5306_s22 + $0x20] sm:$0xff] }
 0x17e   : > { %8437 = vst [vmem:[#allocation80_spill] sm:$0xff] %v5385_v17  ;;  %v5437_v17 = vmul.f32 0.0051020407, %v8451_v48  ;;  %v5468_v48 = vmul.f32 %v5371_v46, %v5371_v46  ;;  %v5474_v24 = vadd.f32 1e-05, %v1255_v29  ;;  %v1488_v52 = vmul.f32 %v5410_v43, %v1487_v22  ;;  %v8465_v22 = vld [vmem:[#allocation13_spill] sm:$0xff] }
 0x17f   : > { %8438 = vst [vmem:[#allocation92_spill] sm:$0xff] %v5389_v21  ;;  %v5439_v21 = vmul.f32 %v2019_v41, %v1415_v20  ;;  %v8458_v41 = vld [vmem:[#allocation42_spill] sm:$0xff]  ;;  %v1198_v20 = vsub.f32 %v1070_v55, %v5000_v33  ;;  %2348 = vperm.xlu1 %3600, %v5456_v27   ;;  %v5487_v55 = vmul.f32 %v2024_v26, %v1465_v9  ;;  %v5503_v54 = vmul.f32 0.0051020407, %v8465_v22  ;;  %v8471_v22 = vld [vmem:[#allocation5_spill] sm:$0xff]  ;;  %v8475_v46 = vld [vmem:[#allocation16_spill] sm:$0xff] }
 0x180   : > { %8440 = vst [vmem:[#allocation83_spill] sm:$0xff] %v5392_v18  ;;  %v1066_v13 = vmul.f32 0.0051020407, %v8458_v41  ;;  %v1425_v12 = vsel %vm5480_vm4, %v5252_v16, %v1421_v37  ;;  %v5496_v29 = vmul.f32 %v5413_v19, %v5413_v19  ;;  %v5500_v7 = vmul.f32 %v5428_v4, %v5428_v4  ;;  %v5506_v9 = vpop.xlane.xlu1 %834 }
 0x181   : > { %8444 = vst [vmem:[#allocation94_spill] sm:$0xff] %v5403_v5  ;;  %2353 = vperm.xlu2 %3598, %v5439_v21   ;;  %v5516_v3 = vmul.f32 %v5437_v17, %v5437_v17  ;;  %v5520_v37 = vmul.f32 %v5443_v38, %v5443_v38  ;;  %v1262_v26 = vmax.f32 %v1198_v20, 0.0  ;;  %v5530_v18 = vmul.f32 0.0051020407, %v8471_v22 }
 0x182   : > { %8446 = vst [vmem:[#allocation88_spill] sm:$0xff] %v5413_v19  ;;  %v1194_v41 = vsub.f32 %v1066_v13, %v4982_v59  ;;  %v1435_v59 = vsel %vm5510_vm6, %v5275_v56, %v1431_v28  ;;  %v2021_v13 = vld [vmem:[%s5306_s22 + $0x28] sm:$0xff]  ;;  %v5536_v19 = vmul.f32 0.0051020407, %v8475_v46  ;;  %v5540_v20 = vmul.f32 %v2020_v63, %v1425_v12  ;;  %v8482_v63 = vld [vmem:[#allocation18_spill] sm:$0xff] }
 0x183   : > { %8450 = vst [vmem:[#allocation91_spill] sm:$0xff] %v5428_v4  ;;  %2378 = vperm.xlu0 %3599, %v5487_v55   ;;  %v5527_v33 = vpop.eup %3617  ;;  %v8473_v4 = vld [vmem:[#allocation15_spill] sm:$0xff]  ;;  %3619 = vrsqrt.f32 %v5474_v24  ;;  %v1193_v56 = vsub.f32 %v1065_v53, %v4996_v0  ;;  %v1489_v28 = vmul.f32 0.5, %v1488_v52  ;;  %v1073_v16 = vmul.f32 0.0051020407, %v5214_v36 }
 0x184   : > { %8452 = vst [vmem:[#allocation95_spill] sm:$0xff] %v5437_v17  ;;  %v5533_v17 = vmul.f32 0.0051020407, %v8473_v4  ;;  %v1069_v4 = vmul.f32 0.0051020407, %v5037_v44  ;;  %v5550_v46 = vmul.f32 %v2021_v13, %v1435_v59  ;;  %v5554_v12 = vmul.f32 %v5503_v54, %v5503_v54  ;;  %v8486_v52 = vld [vmem:[#allocation19_spill] sm:$0xff] }
 0x185   : > { %8453 = vst [vmem:[#allocation43_spill] sm:$0xff] %v5439_v21  ;;  %v1258_v21 = vmax.f32 %v1194_v41, 0.0  ;;  %v1068_v0 = vmul.f32 0.0051020407, %v5103_v61  ;;  %v5560_v36 = vadd.f32 1e-05, %v1262_v26  ;;  %v5564_v53 = vmul.f32 %v5530_v18, %v5530_v18 }
 0x186   : > { %8455 = vst [vmem:[#allocation2_spill] sm:$0xff] %v5443_v38  ;;  %v5538_v38 = vpop.xlane.xlu0 %842  ;;  %v5568_v44 = vmul.f32 %v5533_v17, %v5533_v17  ;;  %v1437_v41 = vmul.f32 %v5527_v33, %v5415_v25  ;;  %v5578_v61 = vmul.f32 %v5536_v19, %v5536_v19  ;;  %v1257_v26 = vmax.f32 %v1193_v56, 0.0  ;;  %v8494_v56 = vld [vmem:[#allocation21_spill] sm:$0xff] }
 0x187   : > { %8459 = vst [vmem:[#allocation6_spill] sm:$0xff] %v5456_v27  ;;  %v5557_v27 = vmul.f32 0.0051020407, %v8482_v63  ;;  %2363 = vperm.xlu1 %3600, %v5550_v46   ;;  %v1201_v59 = vsub.f32 %v1073_v16, %v5041_v51  ;;  %v1490_v13 = vsub.f32 1.5, %v1489_v28  ;;  %v5598_v51 = vmul.f32 0.0051020407, %v8494_v56 }
 0x188   : > { %8460 = vst [vmem:[#allocation23_spill] sm:$0xff] %v5472_v11  ;;  %v8496_v28 = vld [vmem:[#allocation49_spill] sm:$0xff]  ;;  %3621 = vrsqrt.f32 %v5560_v36  ;;  %v5613_v5 = vpop.xlane.xlu1 %846  ;;  %v5615_v56 = vadd.f32 1e-05, %v1257_v26  ;;  %vm1493_vm7 = vweird.f32 %v5410_v43  ;;  %vm1442_vm10 = vweird.f32 %v5415_v25 }
 0x189   : > { %8463 = vst [vmem:[#allocation7_spill] sm:$0xff] %v5487_v55  ;;  %v8478_v55 = vld [vmem:[#allocation8_spill] sm:$0xff]  ;;  %2358 = vperm.xlu2 %3598, %v5540_v20   ;;  %v1196_v16 = vsub.f32 %v1068_v0, %v8496_v28  ;;  %v1265_v0 = vmax.f32 %v1201_v59, 0.0  ;;  %v1491_v28 = vmul.f32 %v5410_v43, %v1490_v13  ;;  %v5630_v26 = vmul.f32 %v5598_v51, %v5598_v51  ;;  %v8502_v59 = vld [vmem:[#allocation14_spill] sm:$0xff]  ;;  %vm1494_vm9 = vmor %vm1492_vm8, %vm1493_vm7 }
 0x18a   : > { %8464 = vst [vmem:[#allocation3_spill] sm:$0xff] %v5500_v7  ;;  %v5546_v22 = vmul.f32 0.0051020407, %v8478_v55  ;;  %v5571_v55 = vmul.f32 0.0051020407, %v8486_v52  ;;  %vm1443_vm11 = vweird.f32 %v5527_v33  ;;  %vm1452_vm14 = vweird.f32 %v5474_v24 }
 0x18b   : > { %8466 = vst [vmem:[#allocation39_spill] sm:$0xff] %v5503_v54  ;;  %v5588_v54 = vadd.f32 1e-05, %v1258_v21  ;;  %v5633_v13 = vmul.f32 0.0051020407, %v8502_v59  ;;  %v1495_v50 = vsel %vm1494_vm9, %v5410_v43, %v1491_v28  ;;  %vm1444_vm12 = vmor %vm1442_vm10, %vm1443_vm11  ;;  %vm1522_vm1 = vweird.f32 %v5560_v36 }
 0x18c   : > { %8469 = vst [vmem:[#allocation9_spill] sm:$0xff] %v5516_v3  ;;  %v5583_v63 = vmul.f32 %v5546_v22, %v5546_v22  ;;  %v5606_v21 = vmul.f32 %v5571_v55, %v5571_v55  ;;  %v1074_v59 = vmul.f32 0.0051020407, %v5299_v30  ;;  %v1071_v30 = vmul.f32 0.0051020407, %v5195_v49 }
 0x18d   : > { %8470 = vst [vmem:[#allocation10_spill] sm:$0xff] %v5520_v37  ;;  %3623 = vrsqrt.f32 %v5588_v54  ;;  %vm1472_vm5 = vweird.f32 %v5615_v56  ;;  %vm1482_vm8 = vweird.f32 %v5588_v54 }
 0x18e   : > { %8472 = vst [vmem:[#allocation4_spill] sm:$0xff] %v5530_v18  ;;  %v8490_v18 = vld [vmem:[#allocation11_spill] sm:$0xff]  ;;  %3625 = vrsqrt.f32 %v5615_v56  ;;  %v1202_v49 = vsub.f32 %v1074_v59, %v5120_v34 }
 0x18f   : > { %8474 = vst [vmem:[#allocation12_spill] sm:$0xff] %v5533_v17  ;;  %v5586_v52 = vmul.f32 0.0051020407, %v8490_v18  ;;  %v8492_v17 = vld [vmem:[#allocation48_spill] sm:$0xff] }
 0x190   : > { %8476 = vst [vmem:[#allocation42_spill] sm:$0xff] %v5536_v19  ;;  %v5595_v19 = vmul.f32 %v5557_v27, %v5557_v27 }
 0x191   : > { %8477 = vst [vmem:[#allocation13_spill] sm:$0xff] %v5540_v20  ;;  %v1197_v20 = vsub.f32 %v1069_v4, %v8492_v17  ;;  %v8498_v17 = vld [vmem:[#allocation22_spill] sm:$0xff]  ;;  %v1438_v4 = vmul.f32 %v5527_v33, %v1437_v41  ;;  %v5626_v41 = vpop.xlane.xlu0 %854 }
 0x192   : > { %8479 = vst [vmem:[#allocation5_spill] sm:$0xff] %v5546_v22  ;;  %v5602_v22 = vpop.xlane.xlu2 %862  ;;  %v5609_v18 = vmul.f32 0.0051020407, %v8498_v17 }
 0x193   : > { %8480 = vst [vmem:[#allocation15_spill] sm:$0xff] %v5550_v46  ;;  %v5591_v46 = vpop.eup %3619 }
 0x194   : > { %8481 = vst [vmem:[#allocation16_spill] sm:$0xff] %v5554_v12  ;;  %v1447_v17 = vmul.f32 %v5591_v46, %v5474_v24  ;;  %vm1453_vm13 = vweird.f32 %v5591_v46 }
 0x195   : > { %8483 = vst [vmem:[#allocation8_spill] sm:$0xff] %v5557_v27  ;;  %v1072_v27 = vmul.f32 0.0051020407, %v5092_v57  ;;  %v1261_v57 = vmax.f32 %v1197_v20, 0.0  ;;  %v1075_v20 = vmul.f32 0.0051020407, %v5183_v42  ;;  %vm1454_vm15 = vmor %vm1452_vm14, %vm1453_vm13 }
 0x196   : > { %8484 = vst [vmem:[#allocation18_spill] sm:$0xff] %v5564_v53  ;;  %v5642_v53 = vpop.eup %3621  ;;  %v1076_v42 = vmul.f32 0.0051020407, %v5328_v2  ;;  %v5672_v2 = vmul.f32 %v5633_v13, %v5633_v13 }
 0x197   : > { %8485 = vst [vmem:[#allocation96_spill] sm:$0xff] %v5568_v44  ;;  %v2027_v44 = vld [vmem:[%s5306_s22 + $0x58] sm:$0xff]  ;;  %v5665_v43 = vpop.eup %3623  ;;  %vm1523_vm2 = vweird.f32 %v5642_v53 }
 0x198   : > { %8487 = vst [vmem:[#allocation19_spill] sm:$0xff] %v5571_v55  ;;  %v5621_v55 = vmul.f32 %v5586_v52, %v5586_v52  ;;  %v1477_v59 = vmul.f32 %v5665_v43, %v5588_v54  ;;  %vm1524_vm3 = vmor %vm1522_vm1, %vm1523_vm2  ;;  %vm1483_vm7 = vweird.f32 %v5665_v43 }
 0x199   : > { %8488 = vst [vmem:[#allocation97_spill] sm:$0xff] %v5578_v61  ;;  %v8506_v61 = vld [vmem:[#allocation54_spill] sm:$0xff]  ;;  %vm1484_vm9 = vmor %vm1482_vm8, %vm1483_vm7 }
 0x19a   : > { %8489 = vst [vmem:[#allocation98_spill] sm:$0xff] %v5583_v63  ;;  %v1200_v63 = vsub.f32 %v1072_v27, %v8506_v61  ;;  %v1448_v27 = vmul.f32 %v5591_v46, %v1447_v17  ;;  %v5654_v61 = vadd.f32 1e-05, %v1261_v57  ;;  %v1203_v17 = vsub.f32 %v1075_v20, %v5098_v45  ;;  %v5686_v20 = vpop.xlane.xlu1 %858 }
 0x19b   : > { %8491 = vst [vmem:[#allocation11_spill] sm:$0xff] %v5586_v52  ;;  %v8504_v52 = vld [vmem:[#allocation24_spill] sm:$0xff]  ;;  %v1078_v45 = vmul.f32 0.0051020407, %v5289_v47 }
 0x19c   : > { %8493 = vst [vmem:[#allocation48_spill] sm:$0xff] %v5595_v19  ;;  %v1260_v19 = vmax.f32 %v1196_v16, 0.0  ;;  %v8508_v16 = vld [vmem:[#allocation25_spill] sm:$0xff]  ;;  %v1264_v28 = vmax.f32 %v1200_v63, 0.0  ;;  %v1449_v63 = vmul.f32 0.5, %v1448_v27  ;;  %v1199_v27 = vsub.f32 %v1071_v30, %v5060_v58 }
 0x19d   : > { %8495 = vst [vmem:[#allocation21_spill] sm:$0xff] %v5598_v51  ;;  %v5646_v51 = vadd.f32 1e-05, %v1265_v0  ;;  %v5663_v0 = vmul.f32 %v2027_v44, %v1495_v50  ;;  %v5680_v44 = vpop.xlane.xlu2 %874  ;;  %v5688_v50 = vpop.eup %3625  ;;  %v1267_v47 = vmax.f32 %v1203_v17, 0.0  ;;  %v1206_v30 = vsub.f32 %v1078_v45, %v5148_v10 }
 0x19e   : > { %8497 = vst [vmem:[#allocation49_spill] sm:$0xff] %v5606_v21  ;;  %v5637_v21 = vmul.f32 0.0051020407, %v8504_v52  ;;  %v5651_v52 = vmul.f32 %v5609_v18, %v5609_v18  ;;  %v1467_v58 = vmul.f32 %v5688_v50, %v5615_v56  ;;  %vm1473_vm4 = vweird.f32 %v5688_v50 }
 0x19f   : > { %8499 = vst [vmem:[#allocation22_spill] sm:$0xff] %v5609_v18  ;;  %v1517_v18 = vmul.f32 %v5642_v53, %v5560_v36  ;;  %3627 = vrsqrt.f32 %v5646_v51  ;;  %2393 = vperm.xlu0 %3599, %v5663_v0   ;;  %vm1474_vm6 = vmor %vm1472_vm5, %vm1473_vm4  ;;  %vm1552_vm11 = vweird.f32 %v5646_v51  ;;  %vm1512_vm2 = vweird.f32 %v5654_v61 }
 0x1a0   : > { %8500 = vst [vmem:[#allocation99_spill] sm:$0xff] %v5621_v55  ;;  %v1439_v55 = vmul.f32 0.5, %v1438_v4  ;;  %v5658_v4 = vmul.f32 0.0051020407, %v8508_v16  ;;  %3629 = vrsqrt.f32 %v5654_v61  ;;  %v5698_v16 = vadd.f32 1e-05, %v1264_v28 }
 0x1a1   : > { %8501 = vst [vmem:[#allocation100_spill] sm:$0xff] %v5630_v26  ;;  %v5660_v26 = vadd.f32 1e-05, %v1260_v19  ;;  %v5676_v19 = vmul.f32 %v5637_v21, %v5637_v21 }
 0x1a2   : > { %8503 = vst [vmem:[#allocation14_spill] sm:$0xff] %v5633_v13  ;;  %v1440_v57 = vsub.f32 1.5, %v1439_v55  ;;  %v1204_v55 = vsub.f32 %v1076_v42, %v5089_v8  ;;  %v5692_v34 = vmul.f32 %v5658_v4, %v5658_v4  ;;  %v1518_v8 = vmul.f32 %v5642_v53, %v1517_v18  ;;  %v5701_v42 = vpop.xlane.xlu0 %866 }
 0x1a3   : > { %8505 = vst [vmem:[#allocation24_spill] sm:$0xff] %v5637_v21  ;;  %3631 = vrsqrt.f32 %v5660_v26  ;;  %v1266_v21 = vmax.f32 %v1202_v49, 0.0  ;;  %v1450_v18 = vsub.f32 1.5, %v1449_v63  ;;  %v1079_v49 = vmul.f32 0.0051020407, %v5417_v15 }
 0x1a4   : > { %8507 = vst [vmem:[#allocation54_spill] sm:$0xff] %v5651_v52  ;;  %v1441_v13 = vmul.f32 %v5527_v33, %v1440_v57  ;;  %v1268_v28 = vmax.f32 %v1204_v55, 0.0  ;;  %v1263_v57 = vmax.f32 %v1199_v27, 0.0  ;;  %3633 = vrsqrt.f32 %v5698_v16 }
 0x1a5   : > { %8509 = vst [vmem:[#allocation25_spill] sm:$0xff] %v5658_v4  ;;  %v1077_v4 = vmul.f32 0.0051020407, %v5395_v39  ;;  %v5711_v17 = vpop.eup %3627  ;;  %v5725_v45 = vadd.f32 1e-05, %v1266_v21  ;;  %v1451_v15 = vmul.f32 %v5591_v46, %v1450_v18  ;;  %v1207_v24 = vsub.f32 %v1079_v49, %v5140_v6 }
 0x1a6   : > { %8510 = vst [vmem:[#allocation101_spill] sm:$0xff] %v5663_v0  ;;  %v2022_v0 = vld [vmem:[%s5306_s22 + $0x30] sm:$0xff]  ;;  %v1445_v39 = vsel %vm1444_vm12, %v5527_v33, %v1441_v13  ;;  %v5716_v25 = vpop.eup %3629  ;;  %v2023_v33 = vld [vmem:[%s5306_s22 + $0x38] sm:$0xff]  ;;  %v1468_v13 = vmul.f32 %v5688_v50, %v1467_v58  ;;  %v1547_v27 = vmul.f32 %v5711_v17, %v5646_v51  ;;  %v5746_v58 = vadd.f32 1e-05, %v1263_v57 }
 0x1a7   : > { %8511 = vst [vmem:[#allocation102_spill] sm:$0xff] %v5672_v2  ;;  %v5721_v10 = vmul.f32 %v2022_v0, %v1445_v39  ;;  %v1205_v55 = vsub.f32 %v1077_v4, %v5156_v31  ;;  %v1478_v31 = vmul.f32 %v5665_v43, %v1477_v59  ;;  %v1507_v21 = vmul.f32 %v5716_v25, %v5654_v61  ;;  %v5744_v0 = vpop.xlane.xlu2 %886 }
 0x1a8   : > { %8512 = vst [vmem:[#allocation103_spill] sm:$0xff] %v5676_v19  ;;  %v1519_v19 = vmul.f32 0.5, %v1518_v8  ;;  %v1270_v8 = vmax.f32 %v1206_v30, 0.0  ;;  %v1455_v4 = vsel %vm1454_vm15, %v5591_v46, %v1451_v15  ;;  %v5749_v30 = vpop.xlane.xlu1 %870  ;;  %v1081_v6 = vmul.f32 0.0051020407, %v5378_v60 }
 0x1a9   : > { %8513 = vst [vmem:[#allocation104_spill] sm:$0xff] %v5692_v34  ;;  %v5719_v34 = vadd.f32 1e-05, %v1267_v47  ;;  %v5723_v63 = vpop.eup %3631  ;;  %v5734_v47 = vadd.f32 1e-05, %v1268_v28  ;;  %2368 = vperm.xlu2 %3598, %v5721_v10   ;;  %v5751_v28 = vmul.f32 %v2023_v33, %v1455_v4  ;;  %v1269_v39 = vmax.f32 %v1205_v55, 0.0 }
 0x1aa   : > { %8514 = vst [vmem:[#allocation105_spill] sm:$0xff] %v5721_v10  ;;  %v1520_v18 = vsub.f32 1.5, %v1519_v19  ;;  %v1497_v59 = vmul.f32 %v5723_v63, %v5660_v26  ;;  %v5757_v46 = vpop.eup %3633  ;;  %v1469_v57 = vmul.f32 0.5, %v1468_v13  ;;  %v1548_v49 = vmul.f32 %v5711_v17, %v1547_v27  ;;  %v5764_v19 = vpop.xlane.xlu0 %878  ;;  %v2030_v27 = vld [vmem:[%s5306_s22 + $0x70] sm:$0xff] }
 0x1ab   : > { %3635 = vrsqrt.f32 %v5719_v34  ;;  %8515 = vst [vmem:[#allocation106_spill] sm:$0xff] %v5751_v28  ;;  %v5760_v15 = vadd.f32 1e-05, %v1270_v8  ;;  %2373 = vperm.xlu1 %3600, %v5751_v28   ;;  %v1479_v33 = vmul.f32 0.5, %v1478_v31  ;;  %v1508_v4 = vmul.f32 %v5716_v25, %v1507_v21 }
 0x1ac   : > { %3637 = vrsqrt.f32 %v5725_v45  ;;  %v1080_v55 = vmul.f32 0.0051020407, %v5506_v9  ;;  %v1271_v60 = vmax.f32 %v1207_v24, 0.0  ;;  %v1521_v13 = vmul.f32 %v5642_v53, %v1520_v18 }
 0x1ad   : > { %3639 = vrsqrt.f32 %v5734_v47  ;;  %v1498_v8 = vmul.f32 %v5723_v63, %v1497_v59  ;;  %v1537_v10 = vmul.f32 %v5757_v46, %v5698_v16  ;;  %v5776_v31 = vadd.f32 1e-05, %v1269_v39 }
 0x1ae   : > { %3641 = vrsqrt.f32 %v5746_v58  ;;  %v1209_v21 = vsub.f32 %v1081_v6, %v5171_v40  ;;  %v1549_v24 = vmul.f32 0.5, %v1548_v49  ;;  %v1525_v36 = vsel %vm1524_vm3, %v5642_v53, %v1521_v13  ;;  %v2025_v53 = vld [vmem:[%s5306_s22 + $0x48] sm:$0xff] }
 0x1af   : > { %3643 = vrsqrt.f32 %v5760_v15  ;;  %v1470_v18 = vsub.f32 1.5, %v1469_v57  ;;  %v1208_v59 = vsub.f32 %v1080_v55, %v5207_v1  ;;  %v5786_v2 = vadd.f32 1e-05, %v1271_v60  ;;  %v5802_v60 = vpop.xlane.xlu2 %898 }
 0x1b0   : > { %v5788_v39 = vmul.f32 %v2030_v27, %v1525_v36  ;;  %v1082_v6 = vmul.f32 0.0051020407, %v5538_v38  ;;  %v1480_v57 = vsub.f32 1.5, %v1479_v33  ;;  %3645 = vrsqrt.f32 %v5776_v31  ;;  %v5808_v13 = vpop.xlane.xlu1 %882 }
 0x1b1   : > { %v5779_v9 = vpop.eup %3635  ;;  %v1471_v49 = vmul.f32 %v5688_v50, %v1470_v18  ;;  %v1273_v55 = vmax.f32 %v1209_v21, 0.0  ;;  %v2026_v21 = vld [vmem:[%s5306_s22 + $0x50] sm:$0xff]  ;;  %v1272_v18 = vmax.f32 %v1208_v59, 0.0  ;;  %3647 = vrsqrt.f32 %v5786_v2 }
 0x1b2   : > { %v5783_v28 = vpop.eup %3637  ;;  %8516 = vst [vmem:[#allocation107_spill] sm:$0xff] %v5788_v39  ;;  %v1567_v1 = vmul.f32 %v5779_v9, %v5719_v34  ;;  %2408 = vperm.xlu0 %3599, %v5788_v39   ;;  %v1481_v27 = vmul.f32 %v5665_v43, %v1480_v57  ;;  %v1084_v39 = vmul.f32 0.0051020407, %v5485_v23  ;;  %v5824_v57 = vpop.xlane.xlu0 %890  ;;  %v1550_v54 = vsub.f32 1.5, %v1549_v24 }
 0x1b3   : > { %v5791_v40 = vpop.eup %3639  ;;  %v1557_v56 = vmul.f32 %v5783_v28, %v5725_v45  ;;  %v1475_v33 = vsel %vm1474_vm6, %v5688_v50, %v1471_v49  ;;  %v1210_v50 = vsub.f32 %v1082_v6, %v5167_v62  ;;  %v5829_v23 = vadd.f32 1e-05, %v1273_v55 }
 0x1b4   : > { %v5804_v38 = vpop.eup %3641  ;;  %v1577_v36 = vmul.f32 %v5791_v40, %v5734_v47  ;;  %v5817_v52 = vmul.f32 %v2025_v53, %v1475_v33  ;;  %v1485_v49 = vsel %vm1484_vm9, %v5665_v43, %v1481_v27  ;;  %v1568_v59 = vmul.f32 %v5779_v9, %v1567_v1  ;;  %v8519_v33 = vld [vmem:[#allocation17_spill] sm:$0xff] }
 0x1b5   : > { %v5819_v12 = vpop.eup %3643  ;;  %v1527_v3 = vmul.f32 %v5804_v38, %v5746_v58  ;;  %v5832_v53 = vmul.f32 %v2026_v21, %v1485_v49  ;;  %v5835_v37 = vmul.f32 0.0051020407, %v8519_v33  ;;  %v1509_v62 = vmul.f32 0.5, %v1508_v4 }
 0x1b6   : > { %8517 = vst [vmem:[#allocation108_spill] sm:$0xff] %v5817_v52  ;;  %2383 = vperm.xlu2 %3598, %v5817_v52   ;;  %v1499_v6 = vmul.f32 0.5, %v1498_v8  ;;  %v1558_v43 = vmul.f32 %v5783_v28, %v1557_v56  ;;  %v5838_v27 = vpop.eup %3645  ;;  %v1597_v24 = vmul.f32 %v5819_v12, %v5760_v15  ;;  %v5842_v11 = vadd.f32 1e-05, %v1272_v18 }
 0x1b7   : > { %8518 = vst [vmem:[#allocation109_spill] sm:$0xff] %v5832_v53  ;;  %v1212_v1 = vsub.f32 %v1084_v39, %v5224_v35  ;;  %v1083_v55 = vmul.f32 0.0051020407, %v5613_v5  ;;  %2388 = vperm.xlu1 %3600, %v5832_v53   ;;  %v1538_v21 = vmul.f32 %v5757_v46, %v1537_v10  ;;  %v1578_v4 = vmul.f32 %v5791_v40, %v1577_v36  ;;  %v5855_v35 = vpop.eup %3647  ;;  %v2033_v36 = vld [vmem:[%s5306_s22 + $0x88] sm:$0xff] }
 0x1b8   : > { %8520 = vst [vmem:[#allocation17_spill] sm:$0xff] %v5835_v37  ;;  %v1274_v8 = vmax.f32 %v1210_v50, 0.0  ;;  %v1551_v56 = vmul.f32 %v5711_v17, %v1550_v54  ;;  %v1528_v49 = vmul.f32 %v5804_v38, %v1527_v3  ;;  %v5851_v33 = vmul.f32 0.5, %v1568_v59  ;;  %v5867_v54 = vpop.xlane.xlu2 %910  ;;  %v5871_v52 = vpop.xlane.xlu1 %894 }
 0x1b9   : > { %3649 = vrsqrt.f32 %v5829_v23  ;;  %vm1553_vm10 = vweird.f32 %v5711_v17  ;;  %v5857_v5 = vmul.f32 0.5, %v1558_v43  ;;  %v1587_v10 = vmul.f32 %v5838_v27, %v5776_v31 }
 0x1ba   : > { %v1085_v39 = vmul.f32 0.0051020407, %v5626_v41  ;;  %v1598_v3 = vmul.f32 %v5819_v12, %v1597_v24  ;;  %3651 = vrsqrt.f32 %v5842_v11  ;;  %v1276_v18 = vmax.f32 %v1212_v1, 0.0  ;;  %vm1554_vm12 = vmor %vm1552_vm11, %vm1553_vm10 }
 0x1bb   : > { %v1211_v50 = vsub.f32 %v1083_v55, %v5233_v14  ;;  %v1579_v59 = vmul.f32 0.5, %v1578_v4  ;;  %v5869_v43 = vadd.f32 1e-05, %v1274_v8  ;;  %v1555_v41 = vsel %vm1554_vm12, %v5711_v17, %v1551_v56  ;;  %v2028_v4 = vld [vmem:[%s5306_s22 + $0x60] sm:$0xff]  ;;  %v5884_v17 = vpop.xlane.xlu0 %902 }
 0x1bc   : > { %v1500_v51 = vsub.f32 1.5, %v1499_v6  ;;  %v1607_v24 = vmul.f32 %v5855_v35, %v5786_v2  ;;  %v5876_v53 = vmul.f32 %v2033_v36, %v1555_v41  ;;  %vm1503_vm13 = vweird.f32 %v5723_v63 }
 0x1bd   : > { %v1510_v14 = vsub.f32 1.5, %v1509_v62  ;;  %v1213_v1 = vsub.f32 %v1085_v39, %v5220_v32  ;;  %vm1502_vm14 = vweird.f32 %v5660_v26  ;;  %vm1513_vm15 = vweird.f32 %v5716_v25  ;;  %v2029_v62 = vld [vmem:[%s5306_s22 + $0x68] sm:$0xff] }
 0x1be   : > { %8521 = vst [vmem:[#allocation110_spill] sm:$0xff] %v5876_v53  ;;  %v1501_v55 = vmul.f32 %v5723_v63, %v1500_v51  ;;  %v1588_v8 = vmul.f32 %v5838_v27, %v1587_v10  ;;  %v5889_v56 = vadd.f32 1e-05, %v1276_v18  ;;  %2423 = vperm.xlu0 %3599, %v5876_v53   ;;  %vm1504_vm1 = vmor %vm1502_vm14, %vm1503_vm13  ;;  %3653 = vrsqrt.f32 %v5869_v43 }
 0x1bf   : > { %v5886_v6 = vpop.eup %3649  ;;  %v1511_v32 = vmul.f32 %v5716_v25, %v1510_v14  ;;  %v1087_v26 = vmul.f32 0.0051020407, %v5602_v22  ;;  %v1086_v39 = vmul.f32 0.0051020407, %v5686_v20  ;;  %vm1514_vm3 = vmor %vm1512_vm2, %vm1513_vm15  ;;  %v1608_v18 = vmul.f32 %v5855_v35, %v1607_v24 }
 0x1c0   : > { %v1505_v36 = vsel %vm1504_vm1, %v5723_v63, %v1501_v55  ;;  %v5899_v10 = vpop.eup %3651  ;;  %v1580_v14 = vsub.f32 1.5, %v1579_v59  ;;  %v1627_v61 = vmul.f32 %v5886_v6, %v5829_v23  ;;  %v1275_v53 = vmax.f32 %v1211_v50, 0.0  ;;  %v8526_v50 = vld [vmem:[#allocation62_spill] sm:$0xff] }
 0x1c1   : > { %v5902_v41 = vmul.f32 %v2028_v4, %v1505_v36  ;;  %v1515_v51 = vsel %vm1514_vm3, %v5716_v25, %v1511_v32  ;;  %v1277_v7 = vmax.f32 %v1213_v1, 0.0  ;;  %v5911_v20 = vmul.f32 %v5835_v37, %v5835_v37  ;;  %v8525_v4 = vld [vmem:[#allocation73_spill] sm:$0xff] }
 0x1c2   : > { %v5907_v22 = vmul.f32 %v2029_v62, %v1515_v51  ;;  %v1539_v63 = vmul.f32 0.5, %v1538_v21  ;;  %v1529_v55 = vmul.f32 0.5, %v1528_v49  ;;  %v1088_v24 = vmul.f32 0.0051020407, %v5701_v42  ;;  %v5925_v49 = vpop.xlane.xlu2 %922 }
 0x1c3   : > { %8522 = vst [vmem:[#allocation111_spill] sm:$0xff] %v5902_v41  ;;  %2398 = vperm.xlu2 %3598, %v5902_v41   ;;  %v1215_v32 = vsub.f32 %v1087_v26, %v8525_v4  ;;  %v1214_v1 = vsub.f32 %v1086_v39, %v8526_v50  ;;  %v5920_v62 = vmul.f32 0.5, %v1598_v3  ;;  %v5922_v36 = vmul.f32 0.5, %v1588_v8  ;;  %v5935_v3 = vpop.xlane.xlu1 %906  ;;  %v5945_v50 = vpop.xlane.xlu0 %914 }
 0x1c4   : > { %8523 = vst [vmem:[#allocation112_spill] sm:$0xff] %v5907_v22  ;;  %2403 = vperm.xlu1 %3600, %v5907_v22   ;;  %v1609_v21 = vmul.f32 0.5, %v1608_v18  ;;  %v1581_v42 = vmul.f32 %v5791_v40, %v1580_v14  ;;  %v5927_v51 = vpop.eup %3653  ;;  %v1628_v25 = vmul.f32 %v5886_v6, %v1627_v61  ;;  %3655 = vrsqrt.f32 %v5889_v56  ;;  %v8527_v18 = vld [vmem:[#allocation72_spill] sm:$0xff]  ;;  %v2036_v61 = vld [vmem:[%s5306_s22 + $0xa0] sm:$0xff] }
 0x1c5   : > { %8524 = vst [vmem:[#allocation113_spill] sm:$0xff] %v5911_v20  ;;  %v5931_v26 = vadd.f32 1e-05, %v1275_v53  ;;  %v5933_v39 = vadd.f32 1e-05, %v1277_v7  ;;  %v1617_v8 = vmul.f32 %v5899_v10, %v5842_v11  ;;  %vm1612_vm4 = vweird.f32 %v5786_v2 }
 0x1c6   : > { %v1216_v14 = vsub.f32 %v1088_v24, %v8527_v18  ;;  %vm1582_vm5 = vweird.f32 %v5734_v47  ;;  %vm1583_vm6 = vweird.f32 %v5791_v40  ;;  %vm1613_vm7 = vweird.f32 %v5855_v35 }
 0x1c7   : > { %v1279_v53 = vmax.f32 %v1215_v32, 0.0  ;;  %v1278_v7 = vmax.f32 %v1214_v1, 0.0  ;;  %vm1584_vm8 = vmor %vm1582_vm5, %vm1583_vm6  ;;  %v1530_v4 = vsub.f32 1.5, %v1529_v55  ;;  %vm1563_vm9 = vweird.f32 %v5783_v28  ;;  %v2031_v55 = vld [vmem:[%s5306_s22 + $0x78] sm:$0xff] }
 0x1c8   : > { %v1610_v59 = vsub.f32 1.5, %v1609_v21  ;;  %v1637_v24 = vmul.f32 %v5927_v51, %v5869_v43  ;;  %v1585_v47 = vsel %vm1584_vm8, %v5791_v40, %v1581_v42  ;;  %vm1533_vm10 = vweird.f32 %v5804_v38  ;;  %vm5998_vm5 = vmor %vm1612_vm4, %vm1613_vm7 }
 0x1c9   : > { %3657 = vrsqrt.f32 %v5933_v39  ;;  %v5953_v18 = vmul.f32 %v2036_v61, %v1585_v47  ;;  %v1531_v32 = vmul.f32 %v5804_v38, %v1530_v4  ;;  %vm1532_vm11 = vweird.f32 %v5746_v58 }
 0x1ca   : > { %vm1562_vm12 = vweird.f32 %v5725_v45  ;;  %3659 = vrsqrt.f32 %v5931_v26  ;;  %v1090_v1 = vmul.f32 0.0051020407, %v5680_v44  ;;  %v1280_v21 = vmax.f32 %v1216_v14, 0.0  ;;  %vm1534_vm13 = vmor %vm1532_vm11, %vm1533_vm10  ;;  %v5961_v42 = vpop.eup %3655  ;;  %v2032_v14 = vld [vmem:[%s5306_s22 + $0x80] sm:$0xff] }
 0x1cb   : > { %8528 = vst [vmem:[#allocation73_spill] sm:$0xff] %v5953_v18  ;;  %v1540_v40 = vsub.f32 1.5, %v1539_v63  ;;  %vm1573_vm14 = vweird.f32 %v5779_v9  ;;  %v5964_v61 = vadd.f32 1e-05, %v1279_v53  ;;  %v1091_v4 = vmul.f32 0.0051020407, %v5764_v19  ;;  %2438 = vperm.xlu0 %3599, %v5953_v18   ;;  %vm1564_vm8 = vmor %vm1562_vm12, %vm1563_vm9 }
 0x1cc   : > { %v1535_v58 = vsel %vm1534_vm13, %v5804_v38, %v1531_v32  ;;  %vm1543_vm15 = vweird.f32 %v5757_v46  ;;  %v1638_v47 = vmul.f32 %v5927_v51, %v1637_v24  ;;  %vm1542_vm1 = vweird.f32 %v5698_v16  ;;  %v8530_v32 = vld [vmem:[#allocation77_spill] sm:$0xff] }
 0x1cd   : > { %v5971_v44 = vmul.f32 %v2031_v55, %v1535_v58  ;;  %v1541_v63 = vmul.f32 %v5757_v46, %v1540_v40  ;;  %vm1572_vm2 = vweird.f32 %v5719_v34  ;;  %v1618_v19 = vmul.f32 %v5899_v10, %v1617_v8  ;;  %vm1544_vm3 = vmor %vm1542_vm1, %vm1543_vm15  ;;  %v5988_v40 = vpop.xlane.xlu2 %934 }
 0x1ce   : > { %v5979_v37 = vadd.f32 1e-05, %v1278_v7  ;;  %v1611_v38 = vmul.f32 %v5855_v35, %v1610_v59  ;;  %v1218_v24 = vsub.f32 %v1090_v1, %v8530_v32  ;;  %v1089_v55 = vmul.f32 0.0051020407, %v5749_v30  ;;  %v8533_v30 = vld [vmem:[#allocation69_spill] sm:$0xff]  ;;  %vm1574_vm9 = vmor %vm1572_vm2, %vm1573_vm14 }
 0x1cf   : > { %8529 = vst [vmem:[#allocation62_spill] sm:$0xff] %v5971_v44  ;;  %v5984_v58 = vadd.f32 1e-05, %v1280_v21  ;;  %2413 = vperm.xlu2 %3598, %v5971_v44   ;;  %v1545_v16 = vsel %vm1544_vm3, %v5757_v46, %v1541_v63  ;;  %v5990_v53 = vpop.eup %3657  ;;  %v5992_v8 = vmul.f32 0.5, %v1628_v25  ;;  %3661 = vrsqrt.f32 %v5964_v61  ;;  %v6006_v46 = vpop.xlane.xlu1 %918  ;;  %v2039_v32 = vld [vmem:[%s5306_s22 + $0xb8] sm:$0xff] }
 0x1d0   : > { %v1219_v7 = vsub.f32 %v1091_v4, %v8533_v30  ;;  %v6004_v1 = vmul.f32 %v2032_v14, %v1545_v16  ;;  %v6008_v21 = vpop.eup %3659  ;;  %vm1593_vm6 = vweird.f32 %v5838_v27  ;;  %v1639_v25 = vmul.f32 0.5, %v1638_v47 }
 0x1d1   : > { %v1093_v63 = vmul.f32 0.0051020407, %v5744_v0  ;;  %v1615_v2 = vsel %vm5998_vm5, %v5855_v35, %v1611_v38  ;;  %v8535_v18 = vsub.f32 1.5, %v5857_v5  ;;  %vm1603_vm4 = vweird.f32 %v5819_v12  ;;  %v6027_v0 = vpop.xlane.xlu0 %926 }
 0x1d2   : > { %8534 = vst [vmem:[#allocation72_spill] sm:$0xff] %v6004_v1  ;;  %v1590_v14 = vsub.f32 1.5, %v5922_v36  ;;  %v6021_v16 = vmul.f32 0.5, %v1618_v19  ;;  %v1657_v47 = vmul.f32 %v5961_v42, %v5889_v56  ;;  %3663 = vrsqrt.f32 %v5979_v37  ;;  %2418 = vperm.xlu1 %3600, %v6004_v1   ;;  %v2034_v36 = vld [vmem:[%s5306_s22 + $0x90] sm:$0xff] }
 0x1d3   : > { %v1561_v4 = vmul.f32 %v5783_v28, %v8535_v18  ;;  %vm1592_vm7 = vweird.f32 %v5776_v31  ;;  %v1667_v35 = vmul.f32 %v5990_v53, %v5933_v39  ;;  %v1282_v5 = vmax.f32 %v1218_v24, 0.0  ;;  %v8536_v18 = vld [vmem:[#allocation76_spill] sm:$0xff] }
 0x1d4   : > { %v1217_v38 = vsub.f32 %v1089_v55, %v8536_v18  ;;  %3665 = vrsqrt.f32 %v5984_v58  ;;  %vm1602_vm10 = vweird.f32 %v5760_v15  ;;  %v1092_v59 = vmul.f32 0.0051020407, %v5808_v13  ;;  %v8538_v55 = vld [vmem:[#allocation81_spill] sm:$0xff]  ;;  %vm6109_vm1 = vmor %vm1592_vm7, %vm1593_vm6 }
 0x1d5   : > { %v1283_v30 = vmax.f32 %v1219_v7, 0.0  ;;  %v6042_v44 = vmul.f32 %v2039_v32, %v1615_v2  ;;  %v1640_v24 = vsub.f32 1.5, %v1639_v25  ;;  %vm1642_vm11 = vweird.f32 %v5869_v43  ;;  %v6047_v1 = vpop.eup %3661  ;;  %v2035_v2 = vld [vmem:[%s5306_s22 + $0x98] sm:$0xff]  ;;  %v6082_v19 = vpop.xlane.xlu2 %946  ;;  %vm6123_vm2 = vmor %vm1602_vm10, %vm1603_vm4 }
 0x1d6   : > { %v1221_v18 = vsub.f32 %v1093_v63, %v8538_v55  ;;  %v1565_v41 = vsel %vm1564_vm8, %v5783_v28, %v1561_v4  ;;  %v1647_v22 = vmul.f32 %v6008_v21, %v5931_v26  ;;  %v8540_v7 = vsub.f32 1.5, %v5851_v33  ;;  %v8541_v33 = vld [vmem:[#allocation82_spill] sm:$0xff] }
 0x1d7   : > { %8537 = vst [vmem:[#allocation77_spill] sm:$0xff] %v6042_v44  ;;  %2453 = vperm.xlu0 %3599, %v6042_v44   ;;  %v6053_v13 = vmul.f32 %v2034_v36, %v1565_v41  ;;  %v1658_v28 = vmul.f32 %v5961_v42, %v1657_v47  ;;  %v1668_v63 = vmul.f32 %v5990_v53, %v1667_v35  ;;  %v6065_v32 = vadd.f32 1e-05, %v1282_v5 }
 0x1d8   : > { %v1571_v25 = vmul.f32 %v5779_v9, %v8540_v7  ;;  %v1281_v4 = vmax.f32 %v1217_v38, 0.0  ;;  %v6067_v55 = vpop.eup %3663  ;;  %vm1643_vm12 = vweird.f32 %v5927_v51  ;;  %v1220_v41 = vsub.f32 %v1092_v59, %v8541_v33  ;;  %v6087_v33 = vpop.xlane.xlu1 %930 }
 0x1d9   : > { %8539 = vst [vmem:[#allocation69_spill] sm:$0xff] %v6053_v13  ;;  %v6071_v36 = vadd.f32 1e-05, %v1283_v30  ;;  %2428 = vperm.xlu2 %3598, %v6053_v13   ;;  %vm1623_vm13 = vweird.f32 %v5899_v10  ;;  %v1285_v47 = vmax.f32 %v1221_v18, 0.0  ;;  %v1094_v35 = vmul.f32 0.0051020407, %v5824_v57  ;;  %vm1644_vm15 = vmor %vm1642_vm11, %vm1643_vm12 }
 0x1da   : > { %v1575_v34 = vsel %vm1574_vm9, %v5779_v9, %v1571_v25  ;;  %v6075_v7 = vpop.eup %3665  ;;  %v1641_v38 = vmul.f32 %v5927_v51, %v1640_v24  ;;  %v1648_v59 = vmul.f32 %v6008_v21, %v1647_v22  ;;  %v1687_v30 = vmul.f32 %v6047_v1, %v5964_v61  ;;  %v2042_v9 = vld [vmem:[%s5306_s22 + $0xd0] sm:$0xff] }
 0x1db   : > { %v6079_v5 = vmul.f32 %v2035_v2, %v1575_v34  ;;  %v1591_v25 = vmul.f32 %v5838_v27, %v1590_v14  ;;  %v8543_v18 = vsub.f32 1.5, %v5920_v62  ;;  %vm1622_vm14 = vweird.f32 %v5842_v11  ;;  %v8560_v11 = vld [vmem:[#allocation71_spill] sm:$0xff] }
 0x1dc   : > { %v1677_v22 = vmul.f32 %v6067_v55, %v5979_v37  ;;  %v1669_v24 = vmul.f32 0.5, %v1668_v63  ;;  %3667 = vrsqrt.f32 %v6065_v32  ;;  %v6102_v2 = vadd.f32 1e-05, %v1281_v4  ;;  %v6117_v4 = vpop.xlane.xlu0 %938  ;;  %vm6183_vm7 = vmor %vm1622_vm14, %vm1623_vm13 }
 0x1dd   : > { %8542 = vst [vmem:[#allocation76_spill] sm:$0xff] %v6079_v5  ;;  %v1601_v57 = vmul.f32 %v5819_v12, %v8543_v18  ;;  %2433 = vperm.xlu1 %3600, %v6079_v5   ;;  %v1697_v43 = vmul.f32 %v6075_v7, %v5984_v58  ;;  %v1284_v14 = vmax.f32 %v1220_v41, 0.0  ;;  %3669 = vrsqrt.f32 %v6071_v36  ;;  %v8548_v18 = vld [vmem:[#allocation86_spill] sm:$0xff]  ;;  %v2037_v41 = vld [vmem:[%s5306_s22 + $0xa8] sm:$0xff] }
 0x1de   : > { %v1645_v63 = vsel %vm1644_vm15, %v5927_v51, %v1641_v38  ;;  %v6127_v34 = vadd.f32 1e-05, %v1285_v47  ;;  %v1222_v45 = vsub.f32 %v1094_v35, %v8548_v18  ;;  %v1595_v51 = vsel %vm6109_vm1, %v5838_v27, %v1591_v25  ;;  %v2038_v35 = vld [vmem:[%s5306_s22 + $0xb0] sm:$0xff] }
 0x1df   : > { %v6130_v44 = vmul.f32 %v2042_v9, %v1645_v63  ;;  %vm1633_vm3 = vweird.f32 %v5886_v6  ;;  %v6137_v38 = vmul.f32 0.5, %v1658_v28  ;;  %v6139_v15 = vmul.f32 0.5, %v1648_v59 }
 0x1e0   : > { %v1688_v13 = vmul.f32 %v6047_v1, %v1687_v30  ;;  %v1605_v47 = vsel %vm6123_vm2, %v5819_v12, %v1601_v57  ;;  %v1678_v9 = vmul.f32 %v6067_v55, %v1677_v22  ;;  %v1670_v63 = vsub.f32 1.5, %v1669_v24 }
 0x1e1   : > { %8549 = vst [vmem:[#allocation81_spill] sm:$0xff] %v6130_v44  ;;  %vm1672_vm5 = vweird.f32 %v5933_v39  ;;  %v1096_v27 = vmul.f32 0.0051020407, %v5802_v60  ;;  %2468 = vperm.xlu0 %3599, %v6130_v44   ;;  %vm1632_vm6 = vweird.f32 %v5829_v23  ;;  %3671 = vrsqrt.f32 %v6102_v2 }
 0x1e2   : > { %v6152_v28 = vadd.f32 1e-05, %v1284_v14  ;;  %v1095_v59 = vmul.f32 0.0051020407, %v5871_v52  ;;  %v6155_v30 = vmul.f32 %v2037_v41, %v1595_v51  ;;  %v6157_v12 = vpop.eup %3667  ;;  %v1698_v25 = vmul.f32 %v6075_v7, %v1697_v43  ;;  %v8552_v43 = vld [vmem:[#allocation93_spill] sm:$0xff]  ;;  %v6177_v51 = vpop.xlane.xlu2 %958  ;;  %vm6241_vm9 = vmor %vm1632_vm6, %vm1633_vm3 }
 0x1e3   : > { %3673 = vrsqrt.f32 %v6127_v34  ;;  %v1286_v57 = vmax.f32 %v1222_v45, 0.0  ;;  %v6161_v60 = vmul.f32 %v2038_v35, %v1605_v47  ;;  %v6163_v22 = vpop.eup %3669  ;;  %v6167_v14 = vmul.f32 0.5, %v1688_v13  ;;  %v8555_v47 = vld [vmem:[#allocation89_spill] sm:$0xff] }
 0x1e4   : > { %8550 = vst [vmem:[#allocation82_spill] sm:$0xff] %v6155_v30  ;;  %vm1673_vm4 = vweird.f32 %v5990_v53  ;;  %2443 = vperm.xlu2 %3598, %v6155_v30   ;;  %v6171_v52 = vmul.f32 0.5, %v1678_v9  ;;  %v1224_v31 = vsub.f32 %v1096_v27, %v8552_v43  ;;  %v1097_v45 = vmul.f32 0.0051020407, %v5884_v17  ;;  %v6191_v9 = vpop.xlane.xlu1 %942  ;;  %v6223_v30 = vpop.xlane.xlu0 %950 }
 0x1e5   : > { %8551 = vst [vmem:[#allocation86_spill] sm:$0xff] %v6161_v60  ;;  %2448 = vperm.xlu1 %3600, %v6161_v60   ;;  %v1671_v18 = vmul.f32 %v5990_v53, %v1670_v63  ;;  %v1717_v41 = vmul.f32 %v6157_v12, %v6065_v32  ;;  %v1223_v17 = vsub.f32 %v1095_v59, %v8555_v47  ;;  %v1099_v35 = vmul.f32 0.0051020407, %v5867_v54  ;;  %v2045_v63 = vld [vmem:[%s5306_s22 + $0xe8] sm:$0xff]  ;;  %vm6201_vm8 = vmor %vm1672_vm5, %vm1673_vm4  ;;  %v2040_v47 = vld [vmem:[%s5306_s22 + $0xc0] sm:$0xff] }
 0x1e6   : > { %v8556_v27 = vsub.f32 1.5, %v6021_v16  ;;  %v1699_v24 = vmul.f32 0.5, %v1698_v25  ;;  %3675 = vrsqrt.f32 %v6152_v28  ;;  %v1727_v54 = vmul.f32 %v6163_v22, %v6071_v36 }
 0x1e7   : > { %v6208_v59 = vadd.f32 1e-05, %v1286_v57  ;;  %v6211_v16 = vpop.eup %3671  ;;  %v1675_v39 = vsel %vm6201_vm8, %v5990_v53, %v1671_v18  ;;  %v8559_v62 = vsub.f32 1.5, %v5992_v8  ;;  %vm1653_vm10 = vweird.f32 %v6008_v21 }
 0x1e8   : > { %v1621_v43 = vmul.f32 %v5899_v10, %v8556_v27  ;;  %v1098_v27 = vmul.f32 0.0051020407, %v5935_v3  ;;  %v1288_v60 = vmax.f32 %v1224_v31, 0.0  ;;  %v1225_v53 = vsub.f32 %v1097_v45, %v8560_v11 }
 0x1e9   : > { %v1631_v44 = vmul.f32 %v5886_v6, %v8559_v62  ;;  %v6225_v57 = vpop.eup %3673  ;;  %v6230_v18 = vmul.f32 %v2045_v63, %v1675_v39  ;;  %vm1663_vm11 = vweird.f32 %v5961_v42  ;;  %v1287_v8 = vmax.f32 %v1223_v17, 0.0  ;;  %v8562_v62 = vld [vmem:[#allocation92_spill] sm:$0xff] }
 0x1ea   : > { %v1625_v25 = vsel %vm6183_vm7, %v5899_v10, %v1621_v43  ;;  %v1227_v13 = vsub.f32 %v1099_v35, %v8562_v62  ;;  %vm1652_vm12 = vweird.f32 %v5931_v26  ;;  %v1718_v31 = vmul.f32 %v6157_v12, %v1717_v41  ;;  %v2041_v35 = vld [vmem:[%s5306_s22 + $0xc8] sm:$0xff]  ;;  %v6277_v3 = vpop.xlane.xlu2 %970 }
 0x1eb   : > { %8561 = vst [vmem:[#allocation93_spill] sm:$0xff] %v6230_v18  ;;  %v6235_v43 = vmul.f32 %v2040_v47, %v1625_v25  ;;  %v1707_v45 = vmul.f32 %v6211_v16, %v6102_v2  ;;  %v1700_v17 = vsub.f32 1.5, %v1699_v24  ;;  %3677 = vrsqrt.f32 %v6208_v59  ;;  %2483 = vperm.xlu0 %3599, %v6230_v18   ;;  %vm1654_vm3 = vmor %vm1652_vm12, %vm1653_vm10 }
 0x1ec   : > { %vm1662_vm13 = vweird.f32 %v5889_v56  ;;  %v1747_v23 = vmul.f32 %v6225_v57, %v6127_v34  ;;  %v1728_v63 = vmul.f32 %v6163_v22, %v1727_v54  ;;  %v1226_v47 = vsub.f32 %v1098_v27, %v5468_v48  ;;  %v6261_v41 = vpop.eup %3675 }
 0x1ed   : > { %8563 = vst [vmem:[#allocation89_spill] sm:$0xff] %v6235_v43  ;;  %2458 = vperm.xlu2 %3598, %v6235_v43   ;;  %v1635_v24 = vsel %vm6241_vm9, %v5886_v6, %v1631_v44  ;;  %vm1702_vm14 = vweird.f32 %v5984_v58  ;;  %v6264_v39 = vadd.f32 1e-05, %v1288_v60  ;;  %v1289_v25 = vmax.f32 %v1225_v53, 0.0  ;;  %v6306_v58 = vpop.xlane.xlu0 %962  ;;  %vm6332_vm5 = vmor %vm1662_vm13, %vm1663_vm11 }
 0x1ee   : > { %v1102_v11 = vmul.f32 0.0051020407, %v5925_v49  ;;  %vm1703_vm15 = vweird.f32 %v6075_v7  ;;  %v6268_v54 = vadd.f32 1e-05, %v1287_v8  ;;  %v1291_v48 = vmax.f32 %v1227_v13, 0.0 }
 0x1ef   : > { %v6270_v27 = vmul.f32 %v2041_v35, %v1635_v24  ;;  %v6272_v62 = vmul.f32 0.5, %v1718_v31  ;;  %v1708_v6 = vmul.f32 %v6211_v16, %v1707_v45  ;;  %v1100_v44 = vmul.f32 0.0051020407, %v5945_v50  ;;  %v6285_v31 = vpop.xlane.xlu1 %954  ;;  %v2048_v35 = vld [vmem:[%s5306_s22 + $0x100] sm:$0xff]  ;;  %vm1704_vm1 = vmor %vm1702_vm14, %vm1703_vm15 }
 0x1f0   : > { %v1701_v60 = vmul.f32 %v6075_v7, %v1700_v17  ;;  %v1748_v49 = vmul.f32 %v6225_v57, %v1747_v23  ;;  %v1737_v53 = vmul.f32 %v6261_v41, %v6152_v28  ;;  %v6282_v8 = vmul.f32 0.5, %v1728_v63 }
 0x1f1   : > { %8566 = vst [vmem:[#allocation71_spill] sm:$0xff] %v6270_v27  ;;  %v1290_v13 = vmax.f32 %v1226_v47, 0.0  ;;  %2463 = vperm.xlu1 %3600, %v6270_v27   ;;  %v6288_v45 = vpop.eup %3677  ;;  %3679 = vrsqrt.f32 %v6264_v39  ;;  %v6295_v50 = vadd.f32 1e-05, %v1289_v25  ;;  %v1230_v17 = vsub.f32 %v1102_v11, %v5496_v29  ;;  %v8568_v25 = vld [vmem:[#allocation80_spill] sm:$0xff]  ;;  %v2043_v11 = vld [vmem:[%s5306_s22 + $0xd8] sm:$0xff] }
 0x1f2   : > { %v1101_v23 = vmul.f32 0.0051020407, %v6006_v46  ;;  %3681 = vrsqrt.f32 %v6268_v54  ;;  %v6300_v63 = vadd.f32 1e-05, %v1291_v48  ;;  %v1705_v47 = vsel %vm1704_vm1, %v6075_v7, %v1701_v60 }
 0x1f3   : > { %v8567_v24 = vsub.f32 1.5, %v6139_v15  ;;  %vm1683_vm2 = vweird.f32 %v6067_v55  ;;  %v1228_v18 = vsub.f32 %v1100_v44, %v8568_v25  ;;  %v1103_v29 = vmul.f32 0.0051020407, %v6027_v0 }
 0x1f4   : > { %v6311_v46 = vmul.f32 %v2048_v35, %v1705_v47  ;;  %v8570_v48 = vsub.f32 1.5, %v6137_v38  ;;  %v6322_v60 = vmul.f32 0.5, %v1708_v6  ;;  %v1757_v0 = vmul.f32 %v6288_v45, %v6208_v59  ;;  %v8573_v6 = vld [vmem:[#allocation3_spill] sm:$0xff]  ;;  %v2044_v47 = vld [vmem:[%s5306_s22 + $0xe0] sm:$0xff] }
 0x1f5   : > { %v1651_v10 = vmul.f32 %v6008_v21, %v8567_v24  ;;  %v6326_v44 = vadd.f32 1e-05, %v1290_v13  ;;  %vm1682_vm6 = vweird.f32 %v5979_v37  ;;  %3683 = vrsqrt.f32 %v6295_v50 }
 0x1f6   : > { %8569 = vst [vmem:[#allocation92_spill] sm:$0xff] %v6311_v46  ;;  %v1661_v7 = vmul.f32 %v5961_v42, %v8570_v48  ;;  %v1294_v26 = vmax.f32 %v1230_v17, 0.0  ;;  %v1229_v35 = vsub.f32 %v1101_v23, %v8573_v6  ;;  %2498 = vperm.xlu0 %3599, %v6311_v46   ;;  %v1738_v24 = vmul.f32 %v6261_v41, %v1737_v53  ;;  %v6397_v46 = vpop.xlane.xlu0 %974  ;;  %vm1684_vm13 = vmor %vm1682_vm6, %vm1683_vm2 }
 0x1f7   : > { %v1655_v13 = vsel %vm1654_vm3, %v6008_v21, %v1651_v10  ;;  %v1730_v56 = vsub.f32 1.5, %v6282_v8  ;;  %v6349_v15 = vpop.eup %3679  ;;  %vm1693_vm4 = vweird.f32 %v6047_v1  ;;  %v6352_v17 = vmul.f32 0.5, %v1748_v49  ;;  %v8575_v10 = vld [vmem:[#allocation23_spill] sm:$0xff]  ;;  %v6378_v6 = vpop.xlane.xlu1 %966 }
 0x1f8   : > { %v6344_v25 = vmul.f32 %v2043_v11, %v1655_v13  ;;  %v1665_v48 = vsel %vm6332_vm5, %v5961_v42, %v1661_v7  ;;  %3685 = vrsqrt.f32 %v6300_v63  ;;  %v1292_v21 = vmax.f32 %v1228_v18, 0.0  ;;  %v6356_v53 = vpop.eup %3681  ;;  %v6369_v7 = vpop.xlane.xlu2 %982 }
 0x1f9   : > { %v1231_v23 = vsub.f32 %v1103_v29, %v8575_v10  ;;  %vm1733_vm7 = vweird.f32 %v6163_v22  ;;  %v1758_v8 = vmul.f32 %v6288_v45, %v1757_v0  ;;  %3687 = vrsqrt.f32 %v6326_v44 }
 0x1fa   : > { %8574 = vst [vmem:[#allocation80_spill] sm:$0xff] %v6344_v25  ;;  %2473 = vperm.xlu2 %3598, %v6344_v25   ;;  %v6362_v42 = vmul.f32 %v2044_v47, %v1665_v48  ;;  %vm1692_vm8 = vweird.f32 %v5964_v61  ;;  %v6366_v18 = vadd.f32 1e-05, %v1294_v26  ;;  %v1293_v29 = vmax.f32 %v1229_v35, 0.0  ;;  %v2051_v35 = vld [vmem:[%s5306_s22 + $0x118] sm:$0xff] }
 0x1fb   : > { %v1105_v11 = vmul.f32 0.0051020407, %v5988_v40  ;;  %vm1713_vm10 = vweird.f32 %v6211_v16  ;;  %v6372_v0 = vmul.f32 0.5, %v1738_v24  ;;  %vm1732_vm11 = vweird.f32 %v6071_v36  ;;  %v6382_v13 = vpop.eup %3683  ;;  %vm6441_vm14 = vmor %vm1692_vm8, %vm1693_vm4 }
 0x1fc   : > { %8576 = vst [vmem:[#allocation3_spill] sm:$0xff] %v6362_v42  ;;  %v1777_v38 = vmul.f32 %v6349_v15, %v6264_v39  ;;  %2478 = vperm.xlu1 %3600, %v6362_v42   ;;  %v1731_v26 = vmul.f32 %v6163_v22, %v1730_v56  ;;  %vm1734_vm9 = vmor %vm1732_vm11, %vm1733_vm7  ;;  %v6387_v47 = vadd.f32 1e-05, %v1292_v21  ;;  %v1295_v36 = vmax.f32 %v1231_v23, 0.0  ;;  %v2046_v42 = vld [vmem:[%s5306_s22 + $0xf0] sm:$0xff] }
 0x1fd   : > { %v1106_v24 = vmul.f32 0.0051020407, %v6117_v4  ;;  %vm1712_vm12 = vweird.f32 %v6102_v2  ;;  %v1767_v48 = vmul.f32 %v6356_v53, %v6268_v54  ;;  %v1759_v56 = vmul.f32 0.5, %v1758_v8  ;;  %v8578_v4 = vld [vmem:[#allocation10_spill] sm:$0xff] }
 0x1fe   : > { %v1735_v10 = vsel %vm1734_vm9, %v6163_v22, %v1731_v26  ;;  %v8577_v49 = vsub.f32 1.5, %v6171_v52  ;;  %v6399_v25 = vpop.eup %3685  ;;  %3689 = vrsqrt.f32 %v6366_v18  ;;  %v6402_v21 = vadd.f32 1e-05, %v1293_v29  ;;  %v8580_v26 = vld [vmem:[#allocation9_spill] sm:$0xff]  ;;  %vm6476_vm5 = vmor %vm1712_vm12, %vm1713_vm10 }
 0x1ff   : > { %v1233_v23 = vsub.f32 %v1105_v11, %v8578_v4  ;;  %v6405_v43 = vmul.f32 %v2051_v35, %v1735_v10  ;;  %v6408_v8 = vpop.eup %3687  ;;  %v1778_v52 = vmul.f32 %v6349_v15, %v1777_v38  ;;  %v1104_v29 = vmul.f32 0.0051020407, %v6087_v33 }
 0x200   : > { %v1681_v40 = vmul.f32 %v6067_v55, %v8577_v49  ;;  %v1787_v49 = vmul.f32 %v6382_v13, %v6295_v50  ;;  %3691 = vrsqrt.f32 %v6387_v47  ;;  %v6420_v11 = vadd.f32 1e-05, %v1295_v36 }
 0x201   : > { %8579 = vst [vmem:[#allocation23_spill] sm:$0xff] %v6405_v43  ;;  %v1234_v35 = vsub.f32 %v1106_v24, %v8580_v26  ;;  %2513 = vperm.xlu0 %3599, %v6405_v43   ;;  %v1768_v10 = vmul.f32 %v6356_v53, %v1767_v48  ;;  %v1760_v4 = vsub.f32 1.5, %v1759_v56  ;;  %v1807_v38 = vmul.f32 %v6399_v25, %v6300_v63  ;;  %v2047_v43 = vld [vmem:[%s5306_s22 + $0xf8] sm:$0xff] }
 0x202   : > { %v1685_v37 = vsel %vm1684_vm13, %v6067_v55, %v1681_v40  ;;  %v1797_v33 = vmul.f32 %v6408_v8, %v6326_v44  ;;  %3693 = vrsqrt.f32 %v6402_v21  ;;  %v1297_v36 = vmax.f32 %v1233_v23, 0.0  ;;  %v8585_v40 = vld [vmem:[#allocation16_spill] sm:$0xff] }
 0x203   : > { %v6428_v22 = vmul.f32 %v2046_v42, %v1685_v37  ;;  %v8582_v24 = vsub.f32 1.5, %v6167_v14  ;;  %vm1762_vm15 = vweird.f32 %v6208_v59  ;;  %vm1763_vm1 = vweird.f32 %v6288_v45  ;;  %v6458_v37 = vpop.permute.xlu2 %2338 }
 0x204   : > { %v1788_v42 = vmul.f32 %v6382_v13, %v1787_v49  ;;  %v1232_v48 = vsub.f32 %v1104_v29, %v8585_v40  ;;  %v6450_v14 = vpop.eup %3689  ;;  %vm1723_vm2 = vweird.f32 %v6157_v12  ;;  %3695 = vrsqrt.f32 %v6420_v11  ;;  %8586 = vst [vmem:[#allocation9_spill] sm:$0xff] %v6458_v37  ;;  %vm6492_vm6 = vmor %vm1762_vm15, %vm1763_vm1  ;;  %v8593_v37 = vld [vmem:[#allocation18_spill] sm:$0xff] }
 0x205   : > { %8581 = vst [vmem:[#allocation10_spill] sm:$0xff] %v6428_v22  ;;  %v1691_v26 = vmul.f32 %v6047_v1, %v8582_v24  ;;  %2488 = vperm.xlu2 %3598, %v6428_v22   ;;  %v1298_v61 = vmax.f32 %v1234_v35, 0.0  ;;  %v1109_v56 = vmul.f32 0.0051020407, %v6223_v30  ;;  %v6460_v49 = vmul.f32 0.5, %v1778_v52  ;;  %v6467_v22 = vpop.xlane.xlu1 %978 }
 0x206   : > { %v6462_v29 = vmul.f32 0.5, %v1768_v10  ;;  %v1808_v24 = vmul.f32 %v6399_v25, %v1807_v38  ;;  %v6469_v35 = vpop.eup %3691  ;;  %vm1722_vm3 = vweird.f32 %v6065_v32  ;;  %v1798_v30 = vmul.f32 %v6408_v8, %v1797_v33  ;;  %v2054_v10 = vld [vmem:[%s5306_s22 + $0x130] sm:$0xff] }
 0x207   : > { %v1695_v23 = vsel %vm6441_vm14, %v6047_v1, %v1691_v26  ;;  %v6481_v52 = vadd.f32 1e-05, %v1297_v36  ;;  %v8590_v38 = vsub.f32 1.5, %v6322_v60  ;;  %v1789_v55 = vmul.f32 0.5, %v1788_v42  ;;  %v2049_v60 = vld [vmem:[%s5306_s22 + $0x108] sm:$0xff]  ;;  %vm6561_vm12 = vmor %vm1722_vm3, %vm1723_vm2 }
 0x208   : > { %v6465_v40 = vmul.f32 %v2047_v43, %v1695_v23  ;;  %v1761_v43 = vmul.f32 %v6288_v45, %v1760_v4  ;;  %v1837_v33 = vmul.f32 %v6450_v14, %v6366_v18  ;;  %v1296_v36 = vmax.f32 %v1232_v48, 0.0  ;;  %v6501_v23 = vpop.xlane.xlu0 %986 }
 0x209   : > { %v1711_v26 = vmul.f32 %v6211_v16, %v8590_v38  ;;  %v1108_v4 = vmul.f32 0.0051020407, %v6082_v19  ;;  %v6503_v38 = vpop.eup %3693  ;;  %vm1743_vm4 = vweird.f32 %v6261_v41  ;;  %v6506_v59 = vadd.f32 1e-05, %v1298_v61 }
 0x20a   : > { %8587 = vst [vmem:[#allocation16_spill] sm:$0xff] %v6465_v40  ;;  %2493 = vperm.xlu1 %3600, %v6465_v40   ;;  %v1237_v27 = vsub.f32 %v1109_v56, %v8593_v37  ;;  %v1765_v42 = vsel %vm6492_vm6, %v6288_v45, %v1761_v43  ;;  %v1817_v5 = vmul.f32 %v6469_v35, %v6387_v47  ;;  %v6521_v61 = vpop.eup %3695  ;;  %vm1753_vm7 = vweird.f32 %v6225_v57 }
 0x20b   : > { %v1715_v19 = vsel %vm6476_vm5, %v6211_v16, %v1711_v26  ;;  %v6519_v20 = vmul.f32 %v2054_v10, %v1765_v42  ;;  %vm1742_vm8 = vweird.f32 %v6152_v28  ;;  %v6525_v45 = vmul.f32 0.5, %v1808_v24 }
 0x20c   : > { %v6527_v56 = vmul.f32 0.5, %v1798_v30  ;;  %3697 = vrsqrt.f32 %v6481_v52  ;;  %v6530_v16 = vmul.f32 %v2049_v60, %v1715_v19  ;;  %v1838_v37 = vmul.f32 %v6450_v14, %v1837_v33  ;;  %v8594_v30 = vld [vmem:[#allocation96_spill] sm:$0xff]  ;;  %v6543_v33 = vpop.permute.xlu2 %2353  ;;  %vm6615_vm5 = vmor %vm1742_vm8, %vm1743_vm4 }
 0x20d   : > { %v1827_v1 = vmul.f32 %v6503_v38, %v6402_v21  ;;  %v6535_v43 = vadd.f32 1e-05, %v1296_v36  ;;  %v1112_v10 = vmul.f32 0.0051020407, %v6306_v58  ;;  %2528 = vperm.xlu0 %3599, %v6519_v20   ;;  %vm1752_vm10 = vweird.f32 %v6127_v34  ;;  %8595 = vst [vmem:[#allocation18_spill] sm:$0xff] %v6543_v33  ;;  %v2050_v19 = vld [vmem:[%s5306_s22 + $0x110] sm:$0xff] }
 0x20e   : > { %v1790_v24 = vsub.f32 1.5, %v1789_v55  ;;  %v1236_v26 = vsub.f32 %v1108_v4, %v8594_v30  ;;  %3699 = vrsqrt.f32 %v6506_v59  ;;  %v1301_v2 = vmax.f32 %v1237_v27, 0.0  ;;  %2503 = vperm.xlu2 %3598, %v6530_v16   ;;  %v6570_v4 = vpop.xlane.xlu1 %990  ;;  %v2057_v33 = vld [vmem:[%s5306_s22 + $0x148] sm:$0xff]  ;;  %vm6642_vm4 = vmor %vm1752_vm10, %vm1753_vm7 }
 0x20f   : > { %vm1792_vm11 = vweird.f32 %v6295_v50  ;;  %vm1793_vm9 = vweird.f32 %v6382_v13  ;;  %v1818_v58 = vmul.f32 %v6469_v35, %v1817_v5  ;;  %v1847_v36 = vmul.f32 %v6521_v61, %v6420_v11  ;;  %v8603_v50 = vld [vmem:[#allocation97_spill] sm:$0xff] }
 0x210   : > { %v1107_v60 = vmul.f32 0.0051020407, %v6191_v9  ;;  %v8596_v27 = vsub.f32 1.5, %v6272_v62  ;;  %v6565_v30 = vmul.f32 0.5, %v1838_v37  ;;  %v1828_v55 = vmul.f32 %v6503_v38, %v1827_v1  ;;  %v8599_v9 = vld [vmem:[#allocation98_spill] sm:$0xff]  ;;  %vm6588_vm14 = vmor %vm1792_vm11, %vm1793_vm9 }
 0x211   : > { %3701 = vrsqrt.f32 %v6535_v43  ;;  %v1240_v62 = vsub.f32 %v1112_v10, %v8599_v9  ;;  %vm1773_vm13 = vweird.f32 %v6356_v53  ;;  %v1300_v32 = vmax.f32 %v1236_v26, 0.0 }
 0x212   : > { %v1721_v42 = vmul.f32 %v6157_v12, %v8596_v27  ;;  %v6572_v27 = vpop.permute.xlu0 %2343  ;;  %v6574_v48 = vpop.eup %3697  ;;  %v6577_v40 = vadd.f32 1e-05, %v1301_v2  ;;  %v1791_v1 = vmul.f32 %v6382_v13, %v1790_v24  ;;  %v1819_v9 = vmul.f32 0.5, %v1818_v58 }
 0x213   : > { %vm1822_vm15 = vweird.f32 %v6387_v47  ;;  %v1848_v26 = vmul.f32 %v6521_v61, %v1847_v36  ;;  %vm1783_vm1 = vweird.f32 %v6349_v15  ;;  %vm1772_vm2 = vweird.f32 %v6268_v54  ;;  %v8617_v47 = vld [vmem:[#allocation48_spill] sm:$0xff] }
 0x214   : > { %v1725_v37 = vsel %vm6561_vm12, %v6157_v12, %v1721_v42  ;;  %v8602_v12 = vsub.f32 1.5, %v6372_v0  ;;  %v6599_v42 = vpop.eup %3699  ;;  %vm1823_vm3 = vweird.f32 %v6469_v35  ;;  %v1235_v58 = vsub.f32 %v1107_v60, %v8603_v50  ;;  %v6634_v50 = vpop.permute.xlu2 %2358 }
 0x215   : > { %v6594_v2 = vmul.f32 %v2050_v19, %v1725_v37  ;;  %v1795_v36 = vsel %vm6588_vm14, %v6382_v13, %v1791_v1  ;;  %v8604_v19 = vsub.f32 1.5, %v6352_v17  ;;  %v1867_v60 = vmul.f32 %v6574_v48, %v6481_v52  ;;  %v2052_v17 = vld [vmem:[%s5306_s22 + $0x120] sm:$0xff]  ;;  %8607 = vst [vmem:[#allocation96_spill] sm:$0xff] %v6634_v50  ;;  %v2053_v37 = vld [vmem:[%s5306_s22 + $0x128] sm:$0xff]  ;;  %vm1824_vm12 = vmor %vm1822_vm15, %vm1823_vm3 }
 0x216   : > { %v1741_v24 = vmul.f32 %v6261_v41, %v8602_v12  ;;  %v1304_v12 = vmax.f32 %v1240_v62, 0.0  ;;  %v6623_v13 = vmul.f32 %v2057_v33, %v1795_v36  ;;  %vm1782_vm6 = vweird.f32 %v6264_v39  ;;  %vm6700_vm14 = vmor %vm1772_vm2, %vm1773_vm13 }
 0x217   : > { %v1751_v0 = vmul.f32 %v6225_v57, %v8604_v19  ;;  %2508 = vperm.xlu1 %3600, %v6594_v2   ;;  %v6627_v1 = vadd.f32 1e-05, %v1300_v32  ;;  %3703 = vrsqrt.f32 %v6577_v40  ;;  %v1115_v28 = vmul.f32 0.0051020407, %v6397_v46  ;;  %v6636_v62 = vpop.eup %3701  ;;  %vm6723_vm13 = vmor %vm1782_vm6, %vm1783_vm1 }
 0x218   : > { %v1745_v10 = vsel %vm6615_vm5, %v6261_v41, %v1741_v24  ;;  %v6646_v32 = vmul.f32 0.5, %v1828_v55  ;;  %v1820_v36 = vsub.f32 1.5, %v1819_v9  ;;  %v1849_v46 = vmul.f32 0.5, %v1848_v26  ;;  %2543 = vperm.xlu0 %3599, %v6623_v13  }
 0x219   : > { %v1877_v19 = vmul.f32 %v6599_v42, %v6506_v59  ;;  %v1299_v41 = vmax.f32 %v1235_v58, 0.0  ;;  %v1110_v24 = vmul.f32 0.0051020407, %v6285_v31  ;;  %v6652_v5 = vmul.f32 %v2052_v17, %v1745_v10  ;;  %v6664_v58 = vpop.permute.xlu1 %2348  ;;  %v2060_v10 = vld [vmem:[%s5306_s22 + $0x160] sm:$0xff] }
 0x21a   : > { %v1755_v34 = vsel %vm6642_vm4, %v6225_v57, %v1751_v0  ;;  %vm1803_vm7 = vweird.f32 %v6408_v8  ;;  %v1868_v55 = vmul.f32 %v6574_v48, %v1867_v60  ;;  %vm1852_vm8 = vweird.f32 %v6420_v11  ;;  %v8610_v57 = vld [vmem:[#allocation99_spill] sm:$0xff]  ;;  %v6678_v33 = vpop.permute.xlu0 %2378 }
 0x21b   : > { %v1111_v9 = vmul.f32 0.0051020407, %v6177_v51  ;;  %v6662_v26 = vadd.f32 1e-05, %v1304_v12  ;;  %v1857_v31 = vmul.f32 %v6636_v62, %v6535_v43  ;;  %vm1853_vm10 = vweird.f32 %v6521_v61  ;;  %2518 = vperm.xlu2 %3598, %v6652_v5   ;;  %8611 = vst [vmem:[#allocation98_spill] sm:$0xff] %v6678_v33 }
 0x21c   : > { %3705 = vrsqrt.f32 %v6627_v1  ;;  %v1243_v0 = vsub.f32 %v1115_v28, %v8610_v57  ;;  %vm1802_vm11 = vweird.f32 %v6326_v44  ;;  %v1850_v60 = vsub.f32 1.5, %v1849_v46  ;;  %v8612_v46 = vld [vmem:[#allocation49_spill] sm:$0xff]  ;;  %vm6753_vm2 = vmor %vm1852_vm8, %vm1853_vm10 }
 0x21d   : > { %v1878_v51 = vmul.f32 %v6599_v42, %v1877_v19  ;;  %v6674_v12 = vmul.f32 %v2053_v37, %v1755_v34  ;;  %v1821_v17 = vmul.f32 %v6469_v35, %v1820_v36  ;;  %v6680_v50 = vpop.eup %3703  ;;  %vm1813_vm9 = vweird.f32 %v6399_v25  ;;  %vm6778_vm5 = vmor %vm1802_vm11, %vm1803_vm7 }
 0x21e   : > { %v6687_v28 = vadd.f32 1e-05, %v1299_v41  ;;  %v1238_v37 = vsub.f32 %v1110_v24, %v8612_v46  ;;  %v8613_v19 = vsub.f32 1.5, %v6462_v29  ;;  %v8614_v34 = vsub.f32 1.5, %v6460_v49  ;;  %v2055_v29 = vld [vmem:[%s5306_s22 + $0x138] sm:$0xff] }
 0x21f   : > { %v1239_v41 = vsub.f32 %v1111_v9, %v8617_v47  ;;  %v1113_v24 = vmul.f32 0.0051020407, %v6378_v6  ;;  %3707 = vrsqrt.f32 %v6662_v26  ;;  %2523 = vperm.xlu1 %3600, %v6674_v12   ;;  %v1825_v49 = vsel %vm1824_vm12, %v6469_v35, %v1821_v17  ;;  %v6717_v6 = vpop.permute.xlu2 %2368 }
 0x220   : > { %v1771_v36 = vmul.f32 %v6356_v53, %v8613_v19  ;;  %v1781_v57 = vmul.f32 %v6349_v15, %v8614_v34  ;;  %vm1812_vm15 = vweird.f32 %v6300_v63  ;;  %v1307_v46 = vmax.f32 %v1243_v0, 0.0  ;;  %8618 = vst [vmem:[#allocation97_spill] sm:$0xff] %v6717_v6 }
 0x221   : > { %v1118_v54 = vmul.f32 0.0051020407, %v6501_v23  ;;  %v6712_v19 = vmul.f32 %v2060_v10, %v1825_v49  ;;  %v1858_v0 = vmul.f32 %v6636_v62, %v1857_v31  ;;  %v1879_v17 = vmul.f32 0.5, %v1878_v51  ;;  %v2056_v31 = vld [vmem:[%s5306_s22 + $0x140] sm:$0xff]  ;;  %v6772_v35 = vpop.permute.xlu1 %2363  ;;  %vm6815_vm8 = vmor %vm1812_vm15, %vm1813_vm9 }
 0x222   : > { %v1775_v9 = vsel %vm6700_vm14, %v6356_v53, %v1771_v36  ;;  %v1907_v23 = vmul.f32 %v6680_v50, %v6577_v40  ;;  %v1851_v10 = vmul.f32 %v6521_v61, %v1850_v60  ;;  %v6731_v33 = vpop.eup %3705  ;;  %3709 = vrsqrt.f32 %v6687_v28 }
 0x223   : > { %v1302_v53 = vmax.f32 %v1238_v37, 0.0  ;;  %2558 = vperm.xlu0 %3599, %v6712_v19   ;;  %v6735_v39 = vmul.f32 %v2055_v29, %v1775_v9  ;;  %v1785_v36 = vsel %vm6723_vm13, %v6349_v15, %v1781_v57  ;;  %v1830_v51 = vsub.f32 1.5, %v6646_v32  ;;  %v8624_v32 = vld [vmem:[#allocation54_spill] sm:$0xff]  ;;  %v2058_v15 = vld [vmem:[%s5306_s22 + $0x150] sm:$0xff] }
 0x224   : > { %vm1833_vm1 = vweird.f32 %v6503_v38  ;;  %v1303_v60 = vmax.f32 %v1239_v41, 0.0  ;;  %v1114_v34 = vmul.f32 0.0051020407, %v6277_v3  ;;  %v8621_v47 = vsub.f32 1.5, %v6527_v56  ;;  %v8625_v41 = vld [vmem:[#allocation102_spill] sm:$0xff] }
 0x225   : > { %v6747_v49 = vmul.f32 0.5, %v1868_v55  ;;  %v1241_v57 = vsub.f32 %v1113_v24, %v8624_v32  ;;  %v6758_v29 = vadd.f32 1e-05, %v1307_v46  ;;  %v1246_v3 = vsub.f32 %v1118_v54, %v8625_v41  ;;  %2533 = vperm.xlu2 %3598, %v6735_v39   ;;  %v6762_v56 = vpop.eup %3707  ;;  %v2063_v46 = vld [vmem:[%s5306_s22 + $0x178] sm:$0xff] }
 0x226   : > { %v1801_v37 = vmul.f32 %v6408_v8, %v8621_v47  ;;  %vm1832_vm3 = vweird.f32 %v6402_v21  ;;  %v1880_v55 = vsub.f32 1.5, %v1879_v17  ;;  %v1908_v9 = vmul.f32 %v6680_v50, %v1907_v23  ;;  %v2059_v54 = vld [vmem:[%s5306_s22 + $0x158] sm:$0xff] }
 0x227   : > { %v6766_v11 = vmul.f32 %v2056_v31, %v1785_v36  ;;  %v1855_v24 = vsel %vm6753_vm2, %v6521_v61, %v1851_v10  ;;  %vm1843_vm6 = vweird.f32 %v6450_v14  ;;  %v6783_v17 = vmul.f32 0.5, %v1858_v0  ;;  %v8629_v31 = vld [vmem:[#allocation100_spill] sm:$0xff]  ;;  %vm6865_vm14 = vmor %vm1832_vm3, %vm1833_vm1 }
 0x228   : > { %vm1882_vm4 = vweird.f32 %v6506_v59  ;;  %v6786_v23 = vadd.f32 1e-05, %v1302_v53  ;;  %v8628_v61 = vsub.f32 1.5, %v6525_v45  ;;  %v1897_v36 = vmul.f32 %v6731_v33, %v6627_v1  ;;  %v6801_v53 = vpop.permute.xlu0 %2393  ;;  %v6803_v32 = vpop.eup %3709 }
 0x229   : > { %v6793_v44 = vadd.f32 1e-05, %v1303_v60  ;;  %v1242_v47 = vsub.f32 %v1114_v34, %v8629_v31  ;;  %2538 = vperm.xlu1 %3600, %v6766_v11   ;;  %v1805_v0 = vsel %vm6778_vm5, %v6408_v8, %v1801_v37  ;;  %vm1842_vm7 = vweird.f32 %v6366_v18  ;;  %v6809_v34 = vpop.permute.xlu2 %2383 }
 0x22a   : > { %v1811_v10 = vmul.f32 %v6399_v25, %v8628_v61  ;;  %v1305_v45 = vmax.f32 %v1241_v57, 0.0  ;;  %3711 = vrsqrt.f32 %v6758_v29  ;;  %v1310_v60 = vmax.f32 %v1246_v3, 0.0  ;;  %8630 = vst [vmem:[#allocation99_spill] sm:$0xff] %v6809_v34  ;;  %vm6902_vm1 = vmor %vm1842_vm7, %vm1843_vm6 }
 0x22b   : > { %v6807_v41 = vmul.f32 %v2063_v46, %v1855_v24  ;;  %vm1883_vm10 = vweird.f32 %v6599_v42  ;;  %v1909_v37 = vmul.f32 0.5, %v1908_v9  ;;  %v1937_v57 = vmul.f32 %v6762_v56, %v6662_v26 }
 0x22c   : > { %v1881_v3 = vmul.f32 %v6599_v42, %v1880_v55  ;;  %3713 = vrsqrt.f32 %v6786_v23  ;;  %v1116_v24 = vmul.f32 0.0051020407, %v6467_v22  ;;  %v6826_v46 = vmul.f32 %v2058_v15, %v1805_v0  ;;  %vm6841_vm9 = vmor %vm1882_vm4, %vm1883_vm10  ;;  %v2066_v15 = vld [vmem:[%s5306_s22 + $0x190] sm:$0xff] }
 0x22d   : > { %2573 = vperm.xlu0 %3599, %v6807_v41   ;;  %v1815_v63 = vsel %vm6815_vm8, %v6399_v25, %v1811_v10  ;;  %v1887_v9 = vmul.f32 %v6803_v32, %v6687_v28  ;;  %3715 = vrsqrt.f32 %v6793_v44  ;;  %v1306_v55 = vmax.f32 %v1242_v47, 0.0 }
 0x22e   : > { %v1831_v61 = vmul.f32 %v6503_v38, %v1830_v51  ;;  %vm1863_vm11 = vweird.f32 %v6636_v62  ;;  %v6845_v25 = vadd.f32 1e-05, %v1305_v45  ;;  %v1117_v10 = vmul.f32 0.0051020407, %v6369_v7  ;;  %2548 = vperm.xlu2 %3598, %v6826_v46  }
 0x22f   : > { %v6848_v31 = vadd.f32 1e-05, %v1310_v60  ;;  %vm1862_vm12 = vweird.f32 %v6535_v43  ;;  %v1910_v51 = vsub.f32 1.5, %v1909_v37  ;;  %v1938_v47 = vmul.f32 %v6762_v56, %v1937_v57  ;;  %v8637_v37 = vld [vmem:[#allocation104_spill] sm:$0xff] }
 0x230   : > { %v6853_v0 = vmul.f32 %v2059_v54, %v1815_v63  ;;  %v1885_v59 = vsel %vm6841_vm9, %v6599_v42, %v1881_v3  ;;  %v6859_v45 = vpop.eup %3711  ;;  %v1870_v60 = vsub.f32 1.5, %v6747_v49  ;;  %v1860_v8 = vsub.f32 1.5, %v6783_v17  ;;  %v2061_v49 = vld [vmem:[%s5306_s22 + $0x168] sm:$0xff]  ;;  %v6884_v17 = vpop.permute.xlu1 %2373  ;;  %vm6948_vm6 = vmor %vm1862_vm12, %vm1863_vm11 }
 0x231   : > { %v1244_v57 = vsub.f32 %v1116_v24, %v8637_v37  ;;  %v8638_v63 = vsub.f32 1.5, %v6565_v30  ;;  %v1898_v3 = vmul.f32 %v6731_v33, %v1897_v36  ;;  %v1888_v54 = vmul.f32 %v6803_v32, %v1887_v9  ;;  %v8639_v30 = vld [vmem:[#allocation103_spill] sm:$0xff] }
 0x232   : > { %v6877_v22 = vadd.f32 1e-05, %v1306_v55  ;;  %2553 = vperm.xlu1 %3600, %v6853_v0   ;;  %v1835_v21 = vsel %vm6865_vm14, %v6503_v38, %v1831_v61  ;;  %v6886_v24 = vpop.eup %3713  ;;  %vm1872_vm15 = vweird.f32 %v6481_v52  ;;  %vm1913_vm13 = vweird.f32 %v6680_v50  ;;  %v6894_v55 = vpop.permute.xlu2 %2398 }
 0x233   : > { %v1841_v42 = vmul.f32 %v6450_v14, %v8638_v63  ;;  %v1245_v36 = vsub.f32 %v1117_v10, %v8639_v30  ;;  %3717 = vrsqrt.f32 %v6848_v31  ;;  %v6892_v9 = vmul.f32 %v2066_v15, %v1885_v59  ;;  %8640 = vst [vmem:[#allocation49_spill] sm:$0xff] %v6894_v55  ;;  %v6896_v7 = vpop.eup %3715  ;;  %v6910_v15 = vpop.permute.xlu0 %2408 }
 0x234   : > { %3719 = vrsqrt.f32 %v6845_v25  ;;  %v1939_v61 = vmul.f32 0.5, %v1938_v47  ;;  %v1967_v10 = vmul.f32 %v6859_v45, %v6758_v29  ;;  %v1911_v59 = vmul.f32 %v6680_v50, %v1910_v51  ;;  %v2062_v47 = vld [vmem:[%s5306_s22 + $0x170] sm:$0xff] }
 0x235   : > { %v1308_v37 = vmax.f32 %v1244_v57, 0.0  ;;  %v1119_v63 = vmul.f32 0.0051020407, %v6570_v4  ;;  %2588 = vperm.xlu0 %3599, %v6892_v9   ;;  %v6914_v18 = vmul.f32 %v2061_v49, %v1835_v21  ;;  %v1845_v30 = vsel %vm6902_vm1, %v6450_v14, %v1841_v42  ;;  %v2064_v21 = vld [vmem:[%s5306_s22 + $0x180] sm:$0xff] }
 0x236   : > { %v1889_v55 = vmul.f32 0.5, %v1888_v54  ;;  %v1917_v34 = vmul.f32 %v6886_v24, %v6786_v23  ;;  %vm1912_vm2 = vweird.f32 %v6577_v40  ;;  %v1861_v51 = vmul.f32 %v6636_v62, %v1860_v8  ;;  %v2069_v54 = vld [vmem:[%s5306_s22 + $0x1a8] sm:$0xff] }
 0x237   : > { %v1899_v57 = vmul.f32 0.5, %v1898_v3  ;;  %v1927_v4 = vmul.f32 %v6896_v7, %v6793_v44  ;;  %vm6928_vm3 = vmor %vm1912_vm2, %vm1913_vm13  ;;  %3721 = vrsqrt.f32 %v6877_v22  ;;  %v1309_v14 = vmax.f32 %v1245_v36, 0.0  ;;  %2563 = vperm.xlu2 %3598, %v6914_v18  }
 0x238   : > { %v1940_v42 = vsub.f32 1.5, %v1939_v61  ;;  %v1968_v40 = vmul.f32 %v6859_v45, %v1967_v10  ;;  %v6935_v8 = vmul.f32 %v2062_v47, %v1845_v30  ;;  %v1915_v3 = vsel %vm6928_vm3, %v6680_v50, %v1911_v59  ;;  %v8647_v61 = vld [vmem:[#allocation113_spill] sm:$0xff] }
 0x239   : > { %v6941_v49 = vpop.eup %3717  ;;  %vm1873_vm5 = vweird.f32 %v6574_v48  ;;  %v6952_v38 = vadd.f32 1e-05, %v1308_v37  ;;  %v1247_v10 = vsub.f32 %v1119_v63, %v8647_v61  ;;  %v1871_v30 = vmul.f32 %v6574_v48, %v1870_v60 }
 0x23a   : > { %v6956_v50 = vpop.eup %3719  ;;  %v1890_v59 = vsub.f32 1.5, %v1889_v55  ;;  %vm1893_vm4 = vweird.f32 %v6803_v32  ;;  %v1918_v47 = vmul.f32 %v6886_v24, %v1917_v34  ;;  %2568 = vperm.xlu1 %3600, %v6935_v8   ;;  %v1865_v43 = vsel %vm6948_vm6, %v6636_v62, %v1861_v51  ;;  %v6970_v55 = vpop.permute.xlu2 %2413  ;;  %vm6976_vm7 = vmor %vm1872_vm15, %vm1873_vm5 }
 0x23b   : > { %v1900_v37 = vsub.f32 1.5, %v1899_v57  ;;  %v1928_v6 = vmul.f32 %v6896_v7, %v1927_v4  ;;  %v6966_v63 = vadd.f32 1e-05, %v1309_v14  ;;  %v6968_v60 = vmul.f32 %v2069_v54, %v1915_v3  ;;  %8648 = vst [vmem:[#allocation48_spill] sm:$0xff] %v6970_v55  ;;  %v6984_v4 = vpop.permute.xlu1 %2388  ;;  %v2065_v54 = vld [vmem:[%s5306_s22 + $0x188] sm:$0xff]  ;;  %v7000_v55 = vpop.permute.xlu0 %2423 }
 0x23c   : > { %vm1943_vm8 = vweird.f32 %v6762_v56  ;;  %v1969_v62 = vmul.f32 0.5, %v1968_v40  ;;  %v1997_v51 = vmul.f32 %v6941_v49, %v6848_v31  ;;  %v1941_v57 = vmul.f32 %v6762_v56, %v1940_v42 }
 0x23d   : > { %v6986_v14 = vpop.eup %3721  ;;  %3723 = vrsqrt.f32 %v6952_v38  ;;  %v1311_v3 = vmax.f32 %v1247_v10, 0.0  ;;  %2603 = vperm.xlu0 %3599, %v6968_v60   ;;  %v6990_v52 = vmul.f32 %v2064_v21, %v1865_v43  ;;  %v1875_v40 = vsel %vm6976_vm7, %v6574_v48, %v1871_v30 }
 0x23e   : > { %v1919_v36 = vmul.f32 0.5, %v1918_v47  ;;  %v1947_v42 = vmul.f32 %v6956_v50, %v6845_v25  ;;  %vm1942_vm10 = vweird.f32 %v6662_v26  ;;  %v1891_v61 = vmul.f32 %v6803_v32, %v1890_v59 }
 0x23f   : > { %vm1892_vm11 = vweird.f32 %v6687_v28  ;;  %v1929_v10 = vmul.f32 0.5, %v1928_v6  ;;  %vm7005_vm9 = vmor %vm1942_vm10, %vm1943_vm8  ;;  %3725 = vrsqrt.f32 %v6966_v63  ;;  %2578 = vperm.xlu2 %3598, %v6990_v52   ;;  %v1970_v48 = vsub.f32 1.5, %v1969_v62  ;;  %v2072_v6 = vld [vmem:[%s5306_s22 + $0x1c0] sm:$0xff] }
 0x240   : > { %v1998_v26 = vmul.f32 %v6941_v49, %v1997_v51  ;;  %v7012_v30 = vmul.f32 %v2065_v54, %v1875_v40  ;;  %v1945_v28 = vsel %vm7005_vm9, %v6762_v56, %v1941_v57  ;;  %vm1903_vm12 = vweird.f32 %v6731_v33  ;;  %vm7021_vm14 = vmor %vm1892_vm11, %vm1893_vm4  ;;  %v2067_v57 = vld [vmem:[%s5306_s22 + $0x198] sm:$0xff] }
 0x241   : > { %v1957_v47 = vmul.f32 %v6986_v14, %v6877_v22  ;;  %v7027_v21 = vadd.f32 1e-05, %v1311_v3  ;;  %v1901_v34 = vmul.f32 %v6731_v33, %v1900_v37  ;;  %v1920_v62 = vsub.f32 1.5, %v1919_v36 }
 0x242   : > { %v1948_v51 = vmul.f32 %v6956_v50, %v1947_v42  ;;  %2583 = vperm.xlu1 %3600, %v7012_v30   ;;  %v1895_v56 = vsel %vm7021_vm14, %v6803_v32, %v1891_v61  ;;  %vm1902_vm15 = vweird.f32 %v6627_v1  ;;  %vm1923_vm13 = vweird.f32 %v6886_v24  ;;  %v7042_v37 = vpop.permute.xlu2 %2428 }
 0x243   : > { %v7036_v40 = vpop.eup %3723  ;;  %v7040_v3 = vmul.f32 %v2072_v6, %v1945_v28  ;;  %vm7046_vm1 = vmor %vm1902_vm15, %vm1903_vm12  ;;  %v1930_v36 = vsub.f32 1.5, %v1929_v10  ;;  %vm1973_vm2 = vweird.f32 %v6859_v45  ;;  %v1999_v32 = vmul.f32 0.5, %v1998_v26  ;;  %v2068_v28 = vld [vmem:[%s5306_s22 + $0x1a0] sm:$0xff]  ;;  %v7067_v59 = vpop.permute.xlu1 %2403 }
 0x244   : > { %v1971_v42 = vmul.f32 %v6859_v45, %v1970_v48  ;;  %v1958_v1 = vmul.f32 %v6986_v14, %v1957_v47  ;;  %3727 = vrsqrt.f32 %v7027_v21  ;;  %v7057_v43 = vmul.f32 %v2067_v57, %v1895_v56 }
 0x245   : > { %v7052_v61 = vpop.eup %3725  ;;  %2618 = vperm.xlu0 %3599, %v7040_v3   ;;  %v1905_v10 = vsel %vm7046_vm1, %v6731_v33, %v1901_v34  ;;  %v1949_v6 = vmul.f32 0.5, %v1948_v51  ;;  %v1977_v48 = vmul.f32 %v7036_v40, %v6952_v38  ;;  %vm1972_vm3 = vweird.f32 %v6758_v29  ;;  %v7083_v51 = vpop.permute.xlu0 %2438 }
 0x246   : > { %v1921_v26 = vmul.f32 %v6886_v24, %v1920_v62  ;;  %vm7071_vm5 = vmor %vm1972_vm3, %vm1973_vm2  ;;  %vm1922_vm6 = vweird.f32 %v6786_v23  ;;  %v2000_v33 = vsub.f32 1.5, %v1999_v32  ;;  %v7077_v34 = vmul.f32 %v2068_v28, %v1905_v10  ;;  %v2075_v62 = vld [vmem:[%s5306_s22 + $0x1d8] sm:$0xff]  ;;  %v2070_v10 = vld [vmem:[%s5306_s22 + $0x1b0] sm:$0xff] }
 0x247   : > { %2593 = vperm.xlu2 %3598, %v7057_v43   ;;  %v1975_v29 = vsel %vm7071_vm5, %v6859_v45, %v1971_v42  ;;  %vm1933_vm4 = vweird.f32 %v6896_v7  ;;  %vm7088_vm7 = vmor %vm1922_vm6, %vm1923_vm13  ;;  %v1959_v57 = vmul.f32 0.5, %v1958_v1  ;;  %v1987_v23 = vmul.f32 %v7052_v61, %v6966_v63 }
 0x248   : > { %v1931_v54 = vmul.f32 %v6896_v7, %v1930_v36  ;;  %v1950_v32 = vsub.f32 1.5, %v1949_v6  ;;  %v1978_v45 = vmul.f32 %v7036_v40, %v1977_v48  ;;  %v1925_v42 = vsel %vm7088_vm7, %v6886_v24, %v1921_v26  ;;  %v2073_v36 = vld [vmem:[%s5306_s22 + $0x1c8] sm:$0xff] }
 0x249   : > { %vm1932_vm8 = vweird.f32 %v6793_v44  ;;  %v7104_v1 = vmul.f32 %v2075_v62, %v1975_v29  ;;  %vm1953_vm11 = vweird.f32 %v6956_v50  ;;  %vm2003_vm9 = vweird.f32 %v6941_v49  ;;  %v2071_v29 = vld [vmem:[%s5306_s22 + $0x1b8] sm:$0xff] }
 0x24a   : > { %2598 = vperm.xlu1 %3600, %v7077_v34   ;;  %v7101_v28 = vpop.eup %3727  ;;  %v7106_v47 = vpop.permute.xlu2 %2443  ;;  %vm7108_vm10 = vmor %vm1932_vm8, %vm1933_vm4  ;;  %v2001_v6 = vmul.f32 %v6941_v49, %v2000_v33  ;;  %v1960_v24 = vsub.f32 1.5, %v1959_v57  ;;  %v1988_v48 = vmul.f32 %v7052_v61, %v1987_v23  ;;  %v7117_v44 = vmul.f32 %v2070_v10, %v1925_v42  ;;  %v8670_v57 = vld [vmem:[#allocation94_spill] sm:$0xff] }
 0x24b   : > { %8661 = vst [vmem:[#allocation54_spill] sm:$0xff] %v7106_v47  ;;  %v1935_v26 = vsel %vm7108_vm10, %v6896_v7, %v1931_v54  ;;  %v1979_v62 = vmul.f32 0.5, %v1978_v45  ;;  %v2007_v56 = vmul.f32 %v7101_v28, %v7027_v21  ;;  %vm2002_vm12 = vweird.f32 %v6848_v31  ;;  %v2078_v54 = vld [vmem:[%s5306_s22 + $0x1f0] sm:$0xff]  ;;  %v7139_v31 = vpop.permute.xlu1 %2418  ;;  %v2147_v47 = vld [vmem:[%s7167_s25 + $0x18] sm:$0xff] }
 0x24c   : > { %v1951_v33 = vmul.f32 %v6956_v50, %v1950_v32  ;;  %vm7127_vm14 = vmor %vm2002_vm12, %vm2003_vm9  ;;  %vm1952_vm15 = vweird.f32 %v6845_v25  ;;  %v7133_v23 = vmul.f32 %v2071_v29, %v1935_v26  ;;  %vm1963_vm13 = vweird.f32 %v6986_v14  ;;  %v2145_v32 = vld [vmem:[%s7167_s25 + $0x8] sm:$0xff] }
 0x24d   : > { %2633 = vperm.xlu0 %3599, %v7104_v1   ;;  %v2005_v7 = vsel %vm7127_vm14, %v6941_v49, %v2001_v6  ;;  %vm7144_vm1 = vmor %vm1952_vm15, %vm1953_vm11  ;;  %v1989_v45 = vmul.f32 0.5, %v1988_v48  ;;  %v1961_v25 = vmul.f32 %v6986_v14, %v1960_v24  ;;  %v1980_v42 = vsub.f32 1.5, %v1979_v62  ;;  %v7155_v6 = vpop.permute.xlu0 %2453 }
 0x24e   : > { %v2008_v10 = vmul.f32 %v7101_v28, %v2007_v56  ;;  %v1955_v49 = vsel %vm7144_vm1, %v6956_v50, %v1951_v33  ;;  %vm1962_vm2 = vweird.f32 %v6877_v22  ;;  %v7158_v26 = vmul.f32 %v2078_v54, %v2005_v7  ;;  %v2074_v22 = vld [vmem:[%s5306_s22 + $0x1d0] sm:$0xff]  ;;  %v8669_v33 = vld [vmem:[#allocation33_spill] sm:$0xff] }
 0x24f   : > { %2608 = vperm.xlu2 %3598, %v7117_v44   ;;  %vm1964_vm3 = vmor %vm1962_vm2, %vm1963_vm13  ;;  %v1990_v24 = vsub.f32 1.5, %v1989_v45  ;;  %v7170_v50 = vmul.f32 %v2073_v36, %v1955_v49  ;;  %vm1983_vm5 = vweird.f32 %v7036_v40  ;;  %v1981_v56 = vmul.f32 %v7036_v40, %v1980_v42  ;;  %v2076_v42 = vld [vmem:[%s5306_s22 + $0x1e0] sm:$0xff] }
 0x250   : > { %v1965_v29 = vsel %vm1964_vm3, %v6986_v14, %v1961_v25  ;;  %v2009_v62 = vmul.f32 0.5, %v2008_v10  ;;  %v2209_v7 = vmul.f32 %v8670_v57, %v8669_v33  ;;  %vm1982_vm6 = vweird.f32 %v6952_v38  ;;  %v2148_v57 = vld [vmem:[%s7167_s25 + $0x20] sm:$0xff] }
 0x251   : > { %v7180_v54 = vmul.f32 %v2074_v22, %v1965_v29  ;;  %vm1993_vm4 = vweird.f32 %v7052_v61  ;;  %vm1984_vm7 = vmor %vm1982_vm6, %vm1983_vm5  ;;  %v1991_v14 = vmul.f32 %v7052_v61, %v1990_v24  ;;  %vm1992_vm8 = vweird.f32 %v6966_v63  ;;  %v2077_v22 = vld [vmem:[%s5306_s22 + $0x1e8] sm:$0xff]  ;;  %v8673_v63 = vld [vmem:[#allocation13_spill] sm:$0xff] }
 0x252   : > { %2613 = vperm.xlu1 %3600, %v7133_v23   ;;  %v7160_v48 = vpop.permute.xlu2 %2458  ;;  %v2010_v45 = vsub.f32 1.5, %v2009_v62  ;;  %v1985_v25 = vsel %vm1984_vm7, %v7036_v40, %v1981_v56  ;;  %v2273_v38 = vsub.f32 %v2145_v32, %v2209_v7  ;;  %vm1994_vm10 = vmor %vm1992_vm8, %vm1993_vm4  ;;  %vm2013_vm11 = vweird.f32 %v7101_v28  ;;  %v8672_v62 = vld [vmem:[#allocation27_spill] sm:$0xff]  ;;  %v2079_v7 = vld [vmem:[%s5306_s22 + $0x1f8] sm:$0xff] }
 0x253   : > { %8668 = vst [vmem:[#allocation102_spill] sm:$0xff] %v7160_v48  ;;  %v7188_v10 = vpop.permute.xlu1 %2433  ;;  %v7195_v24 = vmul.f32 %v2076_v42, %v1985_v25  ;;  %v1995_v29 = vsel %vm1994_vm10, %v7052_v61, %v1991_v14  ;;  %v2212_v56 = vmul.f32 %v8673_v63, %v8672_v62  ;;  %vm2012_vm9 = vweird.f32 %v7027_v21  ;;  %v8674_v14 = vld [vmem:[#allocation20_spill] sm:$0xff]  ;;  %v8679_v62 = vld [vmem:[#allocation26_spill] sm:$0xff] }
 0x254   : > { %v2011_v40 = vmul.f32 %v7101_v28, %v2010_v45  ;;  %v7205_v33 = vmul.f32 %v2077_v22, %v1995_v29  ;;  %vm2014_vm12 = vmor %vm2012_vm9, %vm2013_vm11  ;;  %v8675_v45 = vld [vmem:[#allocation74_spill] sm:$0xff] }
 0x255   : > { %2648 = vperm.xlu0 %3599, %v7158_v26   ;;  %v7193_v36 = vpop.permute.xlu0 %2468  ;;  %v2276_v32 = vsub.f32 %v2148_v57, %v2212_v56  ;;  %v2208_v25 = vmul.f32 %v8675_v45, %v8674_v14  ;;  %v8680_v63 = vld [vmem:[#allocation106_spill] sm:$0xff]  ;;  %v2151_v56 = vld [vmem:[%s7167_s25 + $0x38] sm:$0xff]  ;;  %v8681_v57 = vld [vmem:[#allocation28_spill] sm:$0xff] }
 0x256   : > { %v2015_v61 = vsel %vm2014_vm12, %v7101_v28, %v2011_v40  ;;  %v2215_v28 = vmul.f32 %v8680_v63, %v8679_v62  ;;  %v8682_v14 = vld [vmem:[#allocation6_spill] sm:$0xff]  ;;  %v8686_v63 = vld [vmem:[#allocation29_spill] sm:$0xff] }
 0x257   : > { %2623 = vperm.xlu2 %3598, %v7170_v50   ;;  %v7215_v21 = vmul.f32 %v2079_v7, %v2015_v61  ;;  %v2210_v45 = vmul.f32 %v8682_v14, %v8681_v57  ;;  %v2146_v61 = vld [vmem:[%s7167_s25 + $0x10] sm:$0xff] }
 0x258   : > { %v2279_v7 = vsub.f32 %v2151_v56, %v2215_v28  ;;  %v2154_v57 = vld [vmem:[%s7167_s25 + $0x50] sm:$0xff]  ;;  %v8690_v28 = vld [vmem:[#allocation30_spill] sm:$0xff]  ;;  %v8691_v56 = vld [vmem:[#allocation15_spill] sm:$0xff] }
 0x259   : > { %8676 = vst [vmem:[#allocation104_spill] sm:$0xff] %v7215_v21  ;;  %v2274_v48 = vsub.f32 %v2146_v61, %v2210_v45  ;;  %v2149_v45 = vld [vmem:[%s7167_s25 + $0x28] sm:$0xff] }
 0x25a   : > { %2628 = vperm.xlu1 %3600, %v7180_v54   ;;  %v7191_v49 = vpop.permute.xlu2 %2473 }
 0x25b   : > { %8671 = vst [vmem:[#allocation100_spill] sm:$0xff] %v7191_v49  ;;  %v7213_v42 = vpop.permute.xlu1 %2448  ;;  %v8684_v49 = vld [vmem:[#allocation43_spill] sm:$0xff] }
 0x25d   : > { %2791 = vperm.xlu0 %3599, %v2273_v38   ;;  %v2144_v38 = vld [vmem:[%s7167_s25] sm:$0xff]  ;;  %v7220_v22 = vpop.permute.xlu0 %2483 }
 0x25e   : > { %8678 = vst [vmem:[#allocation113_spill] sm:$0xff] %v7220_v22  ;;  %v2272_v40 = vsub.f32 %v2144_v38, %v2208_v25  ;;  %v8687_v22 = vld [vmem:[#allocation109_spill] sm:$0xff] }
 0x25f   : > { %2638 = vperm.xlu2 %3598, %v7195_v24   ;;  %v2218_v25 = vmul.f32 %v8687_v22, %v8686_v63  ;;  %v8694_v63 = vld [vmem:[#allocation35_spill] sm:$0xff] }
 0x261   : > { %v2282_v61 = vsub.f32 %v2154_v57, %v2218_v25 }
 0x262   : > { %2643 = vperm.xlu1 %3600, %v7205_v33   ;;  %v7218_v29 = vpop.permute.xlu2 %2488 }
 0x263   : > { %8677 = vst [vmem:[#allocation103_spill] sm:$0xff] %v7218_v29  ;;  %v7232_v62 = vpop.permute.xlu1 %2463 }
 0x264   : > { %8685 = vst [vmem:[#allocation33_spill] sm:$0xff] %v7232_v62 }
 0x265   : > { %2806 = vperm.xlu0 %3599, %v2276_v32   ;;  %v8683_v32 = vld [vmem:[#allocation31_spill] sm:$0xff] }
 0x266   : > { %v2211_v29 = vmul.f32 %v8684_v49, %v8683_v32  ;;  %v2213_v49 = vmul.f32 %v8691_v56, %v8690_v28  ;;  %v8693_v32 = vld [vmem:[#allocation105_spill] sm:$0xff]  ;;  %v2157_v28 = vld [vmem:[%s7167_s25 + $0x68] sm:$0xff] }
 0x267   : > { %2653 = vperm.xlu2 %3598, %v7215_v21   ;;  %v8698_v56 = vld [vmem:[#allocation7_spill] sm:$0xff] }
 0x268   : > { %v7239_v14 = vpop.permute.xlu0 %2498  ;;  %v2277_v22 = vsub.f32 %v2149_v45, %v2213_v49  ;;  %v2152_v49 = vld [vmem:[%s7167_s25 + $0x40] sm:$0xff] }
 0x269   : > { %8689 = vst [vmem:[#allocation27_spill] sm:$0xff] %v7239_v14 }
 0x26a   : > { %2786 = vperm.xlu1 %3600, %v2272_v40   ;;  %v7236_v38 = vpop.permute.xlu2 %2503  ;;  %v2275_v40 = vsub.f32 %v2147_v47, %v2211_v29 }
 0x26b   : > { %8688 = vst [vmem:[#allocation94_spill] sm:$0xff] %v7236_v38  ;;  %v8695_v38 = vld [vmem:[#allocation112_spill] sm:$0xff] }
 0x26c   : > { %v2221_v47 = vmul.f32 %v8695_v38, %v8694_v63 }
 0x26d   : > { %2821 = vperm.xlu0 %3599, %v2279_v7   ;;  %v8692_v7 = vld [vmem:[#allocation36_spill] sm:$0xff] }
 0x26e   : > { %v2214_v62 = vmul.f32 %v8693_v32, %v8692_v7  ;;  %v7249_v14 = vpop.permute.xlu1 %2478  ;;  %v2285_v45 = vsub.f32 %v2157_v28, %v2221_v47  ;;  %v8702_v7 = vld [vmem:[#allocation108_spill] sm:$0xff]  ;;  %v2153_v32 = vld [vmem:[%s7167_s25 + $0x48] sm:$0xff]  ;;  %v2155_v28 = vld [vmem:[%s7167_s25 + $0x58] sm:$0xff] }
 0x26f   : > { %2796 = vperm.xlu2 %3598, %v2274_v48   ;;  %v2150_v48 = vld [vmem:[%s7167_s25 + $0x30] sm:$0xff]  ;;  %8696 = vst [vmem:[#allocation13_spill] sm:$0xff] %v7249_v14 }
 0x270   : > { %v2278_v29 = vsub.f32 %v2150_v48, %v2214_v62  ;;  %v8704_v48 = vld [vmem:[#allocation72_spill] sm:$0xff] }
 0x272   : > { %2801 = vperm.xlu1 %3600, %v2275_v40   ;;  %v8697_v40 = vld [vmem:[#allocation34_spill] sm:$0xff] }
 0x273   : > { %v2216_v21 = vmul.f32 %v8698_v56, %v8697_v40  ;;  %v7256_v57 = vpop.permute.xlu0 %2513  ;;  %v2160_v56 = vld [vmem:[%s7167_s25 + $0x80] sm:$0xff] }
 0x274   : > { %8700 = vst [vmem:[#allocation74_spill] sm:$0xff] %v7256_v57 }
 0x275   : > { %2836 = vperm.xlu0 %3599, %v2282_v61   ;;  %v7254_v25 = vpop.permute.xlu2 %2518  ;;  %v8701_v61 = vld [vmem:[#allocation40_spill] sm:$0xff]  ;;  %v2280_v62 = vsub.f32 %v2152_v49, %v2216_v21  ;;  %v8709_v49 = vld [vmem:[#allocation45_spill] sm:$0xff] }
 0x276   : > { %8699 = vst [vmem:[#allocation20_spill] sm:$0xff] %v7254_v25  ;;  %v2217_v38 = vmul.f32 %v8702_v7, %v8701_v61  ;;  %v8706_v25 = vld [vmem:[#allocation101_spill] sm:$0xff] }
 0x277   : > { %2811 = vperm.xlu2 %3598, %v2277_v22   ;;  %v8703_v22 = vld [vmem:[#allocation38_spill] sm:$0xff] }
 0x278   : > { %v2224_v63 = vmul.f32 %v8704_v48, %v8703_v22  ;;  %v2281_v40 = vsub.f32 %v2153_v32, %v2217_v38  ;;  %v8712_v32 = vld [vmem:[#allocation44_spill] sm:$0xff] }
 0x27a   : > { %2816 = vperm.xlu1 %3600, %v2278_v29   ;;  %v8705_v29 = vld [vmem:[#allocation37_spill] sm:$0xff]  ;;  %v2288_v21 = vsub.f32 %v2160_v56, %v2224_v63  ;;  %v2158_v56 = vld [vmem:[%s7167_s25 + $0x70] sm:$0xff] }
 0x27b   : > { %v2219_v14 = vmul.f32 %v8706_v25, %v8705_v29  ;;  %v8713_v25 = vld [vmem:[#allocation76_spill] sm:$0xff] }
 0x27c   : > { %v7269_v47 = vpop.permute.xlu1 %2493  ;;  %v2227_v22 = vmul.f32 %v8713_v25, %v8712_v32  ;;  %v8714_v29 = vld [vmem:[#allocation32_spill] sm:$0xff]  ;;  %v8720_v32 = vld [vmem:[#allocation47_spill] sm:$0xff] }
 0x27d   : > { %2851 = vperm.xlu0 %3599, %v2285_v45   ;;  %8708 = vst [vmem:[#allocation106_spill] sm:$0xff] %v7269_v47  ;;  %v8710_v45 = vld [vmem:[#allocation111_spill] sm:$0xff]  ;;  %v2283_v38 = vsub.f32 %v2155_v28, %v2219_v14 }
 0x27e   : > { %v2220_v61 = vmul.f32 %v8710_v45, %v8709_v49  ;;  %v8718_v45 = vld [vmem:[#allocation62_spill] sm:$0xff] }
 0x27f   : > { %2826 = vperm.xlu2 %3598, %v2280_v62   ;;  %v7267_v57 = vpop.permute.xlu2 %2533  ;;  %v7274_v7 = vpop.permute.xlu0 %2528  ;;  %v2156_v62 = vld [vmem:[%s7167_s25 + $0x60] sm:$0xff] }
 0x280   : > { %8707 = vst [vmem:[#allocation26_spill] sm:$0xff] %v7267_v57  ;;  %v2284_v48 = vsub.f32 %v2156_v62, %v2220_v61  ;;  %v8715_v57 = vld [vmem:[#allocation107_spill] sm:$0xff]  ;;  %v2159_v61 = vld [vmem:[%s7167_s25 + $0x78] sm:$0xff] }
 0x281   : > { %8711 = vst [vmem:[#allocation28_spill] sm:$0xff] %v7274_v7  ;;  %v2222_v47 = vmul.f32 %v8715_v57, %v8714_v29  ;;  %v8721_v57 = vld [vmem:[#allocation86_spill] sm:$0xff] }
 0x282   : > { %2831 = vperm.xlu1 %3600, %v2281_v40   ;;  %v2163_v40 = vld [vmem:[%s7167_s25 + $0x98] sm:$0xff]  ;;  %v2230_v25 = vmul.f32 %v8721_v57, %v8720_v32 }
 0x283   : > { %v2291_v49 = vsub.f32 %v2163_v40, %v2227_v22  ;;  %v8723_v22 = vld [vmem:[#allocation110_spill] sm:$0xff]  ;;  %v8729_v32 = vld [vmem:[#allocation53_spill] sm:$0xff] }
 0x285   : > { %2866 = vperm.xlu0 %3599, %v2288_v21   ;;  %v8717_v21 = vld [vmem:[#allocation41_spill] sm:$0xff] }
 0x286   : > { %v2223_v14 = vmul.f32 %v8718_v45, %v8717_v21  ;;  %v8726_v21 = vld [vmem:[#allocation57_spill] sm:$0xff] }
 0x287   : > { %2841 = vperm.xlu2 %3598, %v2283_v38   ;;  %v2286_v38 = vsub.f32 %v2158_v56, %v2222_v47  ;;  %v8727_v45 = vld [vmem:[#allocation69_spill] sm:$0xff] }
 0x288   : > { %v7282_v63 = vpop.permute.xlu2 %2548  ;;  %v2287_v29 = vsub.f32 %v2159_v61, %v2223_v14  ;;  %v2162_v14 = vld [vmem:[%s7167_s25 + $0x90] sm:$0xff] }
 0x289   : > { %8716 = vst [vmem:[#allocation6_spill] sm:$0xff] %v7282_v63  ;;  %v7287_v28 = vpop.permute.xlu1 %2508  ;;  %v8722_v63 = vld [vmem:[#allocation46_spill] sm:$0xff] }
 0x28a   : > { %2846 = vperm.xlu1 %3600, %v2284_v48   ;;  %v7290_v62 = vpop.permute.xlu0 %2543  ;;  %v2166_v48 = vld [vmem:[%s7167_s25 + $0xb0] sm:$0xff]  ;;  %v2225_v40 = vmul.f32 %v8723_v22, %v8722_v63  ;;  %v8730_v63 = vld [vmem:[#allocation71_spill] sm:$0xff] }
 0x28b   : > { %8719 = vst [vmem:[#allocation31_spill] sm:$0xff] %v7290_v62  ;;  %v2294_v47 = vsub.f32 %v2166_v48, %v2230_v25  ;;  %v2233_v57 = vmul.f32 %v8730_v63, %v8729_v32  ;;  %v8732_v25 = vld [vmem:[#allocation73_spill] sm:$0xff]  ;;  %v8738_v32 = vld [vmem:[#allocation66_spill] sm:$0xff] }
 0x28d   : > { %2881 = vperm.xlu0 %3599, %v2291_v49   ;;  %v2161_v49 = vld [vmem:[%s7167_s25 + $0x88] sm:$0xff] }
 0x28e   : > { %v2289_v62 = vsub.f32 %v2161_v49, %v2225_v40 }
 0x28f   : > { %2856 = vperm.xlu2 %3598, %v2286_v38   ;;  %v2226_v38 = vmul.f32 %v8727_v45, %v8726_v21  ;;  %v8735_v21 = vld [vmem:[#allocation63_spill] sm:$0xff]  ;;  %v8736_v45 = vld [vmem:[#allocation82_spill] sm:$0xff] }
 0x291   : > { %v7297_v7 = vpop.permute.xlu2 %2563  ;;  %v7300_v56 = vpop.permute.xlu1 %2523  ;;  %v2290_v22 = vsub.f32 %v2162_v14, %v2226_v38  ;;  %v2165_v38 = vld [vmem:[%s7167_s25 + $0xa8] sm:$0xff] }
 0x292   : > { %8724 = vst [vmem:[#allocation43_spill] sm:$0xff] %v7297_v7  ;;  %2861 = vperm.xlu1 %3600, %v2287_v29   ;;  %v2169_v29 = vld [vmem:[%s7167_s25 + $0xc8] sm:$0xff] }
 0x293   : > { %8725 = vst [vmem:[#allocation29_spill] sm:$0xff] %v7300_v56  ;;  %v8731_v7 = vld [vmem:[#allocation55_spill] sm:$0xff]  ;;  %v2297_v40 = vsub.f32 %v2169_v29, %v2233_v57  ;;  %v8741_v57 = vld [vmem:[#allocation77_spill] sm:$0xff] }
 0x294   : > { %v2228_v48 = vmul.f32 %v8732_v25, %v8731_v7  ;;  %v8739_v7 = vld [vmem:[#allocation3_spill] sm:$0xff] }
 0x295   : > { %2896 = vperm.xlu0 %3599, %v2294_v47   ;;  %v7305_v61 = vpop.permute.xlu0 %2558  ;;  %v2164_v47 = vld [vmem:[%s7167_s25 + $0xa0] sm:$0xff]  ;;  %v2236_v63 = vmul.f32 %v8739_v7, %v8738_v32  ;;  %v8747_v32 = vld [vmem:[#allocation52_spill] sm:$0xff] }
 0x296   : > { %8728 = vst [vmem:[#allocation109_spill] sm:$0xff] %v7305_v61  ;;  %v2292_v61 = vsub.f32 %v2164_v47, %v2228_v48 }
 0x297   : > { %2871 = vperm.xlu2 %3598, %v2289_v62   ;;  %v2229_v62 = vmul.f32 %v8736_v45, %v8735_v21  ;;  %v8744_v21 = vld [vmem:[#allocation50_spill] sm:$0xff]  ;;  %v8745_v45 = vld [vmem:[#allocation89_spill] sm:$0xff] }
 0x299   : > { %v7312_v56 = vpop.permute.xlu2 %2578  ;;  %v2293_v25 = vsub.f32 %v2165_v38, %v2229_v62  ;;  %v2168_v62 = vld [vmem:[%s7167_s25 + $0xc0] sm:$0xff] }
 0x29a   : > { %8733 = vst [vmem:[#allocation30_spill] sm:$0xff] %v7312_v56  ;;  %2876 = vperm.xlu1 %3600, %v2290_v22   ;;  %v2172_v22 = vld [vmem:[%s7167_s25 + $0xe0] sm:$0xff] }
 0x29b   : > { %v7315_v49 = vpop.permute.xlu1 %2538  ;;  %v8740_v56 = vld [vmem:[#allocation58_spill] sm:$0xff]  ;;  %v2300_v48 = vsub.f32 %v2172_v22, %v2236_v63  ;;  %v8750_v63 = vld [vmem:[#allocation81_spill] sm:$0xff] }
 0x29c   : > { %8734 = vst [vmem:[#allocation15_spill] sm:$0xff] %v7315_v49  ;;  %v2231_v29 = vmul.f32 %v8741_v57, %v8740_v56  ;;  %v8748_v56 = vld [vmem:[#allocation16_spill] sm:$0xff] }
 0x29d   : > { %2911 = vperm.xlu0 %3599, %v2297_v40   ;;  %v2167_v40 = vld [vmem:[%s7167_s25 + $0xb8] sm:$0xff]  ;;  %v2239_v7 = vmul.f32 %v8748_v56, %v8747_v32 }
 0x29e   : > { %v8755_v32 = vld [vmem:[#allocation61_spill] sm:$0xff] }
 0x29f   : > { %v7320_v14 = vpop.permute.xlu0 %2573  ;;  %2886 = vperm.xlu2 %3598, %v2292_v61   ;;  %v2232_v61 = vmul.f32 %v8745_v45, %v8744_v21  ;;  %v8752_v21 = vld [vmem:[#allocation67_spill] sm:$0xff]  ;;  %v8753_v45 = vld [vmem:[#allocation80_spill] sm:$0xff] }
 0x2a0   : > { %8737 = vst [vmem:[#allocation36_spill] sm:$0xff] %v7320_v14  ;;  %v2295_v14 = vsub.f32 %v2167_v40, %v2231_v29 }
 0x2a1   : > { %v7327_v49 = vpop.permute.xlu2 %2593  ;;  %v2296_v57 = vsub.f32 %v2168_v62, %v2232_v61  ;;  %v2171_v61 = vld [vmem:[%s7167_s25 + $0xd8] sm:$0xff] }
 0x2a2   : > { %8742 = vst [vmem:[#allocation105_spill] sm:$0xff] %v7327_v49  ;;  %2891 = vperm.xlu1 %3600, %v2293_v25   ;;  %v2175_v25 = vld [vmem:[%s7167_s25 + $0xf8] sm:$0xff]  ;;  %v8749_v49 = vld [vmem:[#allocation64_spill] sm:$0xff] }
 0x2a3   : > { %v2234_v22 = vmul.f32 %v8750_v63, %v8749_v49  ;;  %v2303_v29 = vsub.f32 %v2175_v25, %v2239_v7  ;;  %v2242_v49 = vmul.f32 %v6594_v2, %v8755_v32  ;;  %v8756_v63 = vld [vmem:[#allocation51_spill] sm:$0xff]  ;;  %v8757_v7 = vld [vmem:[#allocation93_spill] sm:$0xff]  ;;  %v2174_v2 = vld [vmem:[%s7167_s25 + $0xf0] sm:$0xff] }
 0x2a4   : > { %v7330_v47 = vpop.permute.xlu1 %2553  ;;  %v2237_v25 = vmul.f32 %v8757_v7, %v8756_v63  ;;  %v8762_v7 = vld [vmem:[#allocation56_spill] sm:$0xff] }
 0x2a5   : > { %8743 = vst [vmem:[#allocation35_spill] sm:$0xff] %v7330_v47  ;;  %2926 = vperm.xlu0 %3599, %v2300_v48   ;;  %v2170_v48 = vld [vmem:[%s7167_s25 + $0xd0] sm:$0xff] }
 0x2a7   : > { %v7335_v38 = vpop.permute.xlu0 %2588  ;;  %2901 = vperm.xlu2 %3598, %v2295_v14   ;;  %v2235_v14 = vmul.f32 %v8753_v45, %v8752_v21  ;;  %v8759_v21 = vld [vmem:[#allocation59_spill] sm:$0xff]  ;;  %v8760_v45 = vld [vmem:[#allocation10_spill] sm:$0xff] }
 0x2a8   : > { %8746 = vst [vmem:[#allocation112_spill] sm:$0xff] %v7335_v38  ;;  %v2298_v38 = vsub.f32 %v2170_v48, %v2234_v22 }
 0x2a9   : > { %v7342_v47 = vpop.permute.xlu2 %2608  ;;  %v2299_v56 = vsub.f32 %v2171_v61, %v2235_v14  ;;  %v8761_v61 = vld [vmem:[#allocation78_spill] sm:$0xff] }
 0x2aa   : > { %8751 = vst [vmem:[#allocation34_spill] sm:$0xff] %v7342_v47  ;;  %2906 = vperm.xlu1 %3600, %v2296_v57   ;;  %v2178_v57 = vld [vmem:[%s7167_s25 + $0x110] sm:$0xff]  ;;  %v2245_v32 = vmul.f32 %v6674_v12, %v8761_v61  ;;  %v2177_v12 = vld [vmem:[%s7167_s25 + $0x108] sm:$0xff] }
 0x2ab   : > { %v2306_v22 = vsub.f32 %v2178_v57, %v2242_v49  ;;  %v8763_v49 = vld [vmem:[#allocation92_spill] sm:$0xff] }
 0x2ac   : > { %v7345_v40 = vpop.permute.xlu1 %2568  ;;  %v2240_v57 = vmul.f32 %v8763_v49, %v8762_v7  ;;  %v2184_v7 = vld [vmem:[%s7167_s25 + $0x140] sm:$0xff]  ;;  %v8767_v49 = vld [vmem:[#allocation60_spill] sm:$0xff] }
 0x2ad   : > { %2941 = vperm.xlu0 %3599, %v2303_v29   ;;  %v2173_v29 = vld [vmem:[%s7167_s25 + $0xe8] sm:$0xff] }
 0x2af   : > { %v7350_v62 = vpop.permute.xlu0 %2603  ;;  %2916 = vperm.xlu2 %3598, %v2298_v38   ;;  %v2238_v38 = vmul.f32 %v8760_v45, %v8759_v21  ;;  %v8765_v21 = vld [vmem:[#allocation68_spill] sm:$0xff] }
 0x2b0   : > { %8754 = vst [vmem:[#allocation7_spill] sm:$0xff] %v7350_v62  ;;  %v2301_v62 = vsub.f32 %v2173_v29, %v2237_v25 }
 0x2b1   : > { %v7357_v47 = vpop.permute.xlu2 %2623  ;;  %v2302_v63 = vsub.f32 %v2174_v2, %v2238_v38  ;;  %v8766_v2 = vld [vmem:[#allocation79_spill] sm:$0xff] }
 0x2b2   : > { %8758 = vst [vmem:[#allocation40_spill] sm:$0xff] %v7357_v47  ;;  %2921 = vperm.xlu1 %3600, %v2299_v56   ;;  %v2181_v56 = vld [vmem:[%s7167_s25 + $0x128] sm:$0xff]  ;;  %v2248_v61 = vmul.f32 %v6766_v11, %v8766_v2 }
 0x2b3   : > { %v2309_v25 = vsub.f32 %v2181_v56, %v2245_v32  ;;  %v8768_v32 = vld [vmem:[#allocation23_spill] sm:$0xff] }
 0x2b4   : > { %v7360_v48 = vpop.permute.xlu1 %2583  ;;  %v2243_v56 = vmul.f32 %v8768_v32, %v8767_v49  ;;  %v3729_v49 = vld [vmem:[%s3902_s18 + $0x20] sm:$0xff]  ;;  %v3730_v32 = vld [vmem:[%s3902_s18 + $0x28] sm:$0xff] }
 0x2b5   : > { %2956 = vperm.xlu0 %3599, %v2306_v22   ;;  %v2176_v22 = vld [vmem:[%s7167_s25 + $0x100] sm:$0xff] }
 0x2b6   : > { %v2304_v45 = vsub.f32 %v2176_v22, %v2240_v57  ;;  %v2312_v57 = vsub.f32 %v2184_v7, %v2248_v61  ;;  %v2661_v61 = vmul.f32 %v3730_v32, %v6664_v58 }
 0x2b7   : > { %v7365_v14 = vpop.permute.xlu0 %2618  ;;  %2931 = vperm.xlu2 %3598, %v2301_v62   ;;  %v2241_v62 = vmul.f32 %v6530_v16, %v8765_v21  ;;  %v2179_v16 = vld [vmem:[%s7167_s25 + $0x118] sm:$0xff] }
 0x2b8   : > { %v2307_v11 = vsub.f32 %v2179_v16, %v2243_v56 }
 0x2b9   : > { %v7372_v47 = vpop.permute.xlu2 %2638 }
 0x2ba   : > { %8764 = vst [vmem:[#allocation108_spill] sm:$0xff] %v7372_v47  ;;  %2936 = vperm.xlu1 %3600, %v2302_v63   ;;  %v2305_v63 = vsub.f32 %v2177_v12, %v2241_v62  ;;  %v2180_v62 = vld [vmem:[%s7167_s25 + $0x120] sm:$0xff]  ;;  %v8771_v12 = vld [vmem:[#allocation85_spill] sm:$0xff] }
 0x2bb   : > { %v2251_v2 = vmul.f32 %v6853_v0, %v8771_v12 }
 0x2bc   : > { %v7375_v29 = vpop.permute.xlu1 %2598 }
 0x2bd   : > { %2971 = vperm.xlu0 %3599, %v2309_v25   ;;  %v8770_v25 = vld [vmem:[#allocation75_spill] sm:$0xff] }
 0x2be   : > { %v2244_v21 = vmul.f32 %v6652_v5, %v8770_v25  ;;  %v2187_v5 = vld [vmem:[%s7167_s25 + $0x158] sm:$0xff]  ;;  %v8772_v25 = vld [vmem:[#allocation70_spill] sm:$0xff] }
 0x2bf   : > { %v7380_v38 = vpop.permute.xlu0 %2633  ;;  %2946 = vperm.xlu2 %3598, %v2304_v45   ;;  %v2246_v56 = vmul.f32 %v6519_v20, %v8772_v25  ;;  %v2315_v12 = vsub.f32 %v2187_v5, %v2251_v2  ;;  %v3731_v2 = vld [vmem:[%s3902_s18 + $0x10] sm:$0xff] }
 0x2c0   : > { %v2308_v7 = vsub.f32 %v2180_v62, %v2244_v21  ;;  %v2658_v32 = vmul.f32 %v3731_v2, %v6572_v27  ;;  %v8774_v25 = vld [vmem:[#allocation88_spill] sm:$0xff] }
 0x2c1   : > { %v7387_v47 = vpop.permute.xlu2 %2653 }
 0x2c2   : > { %8769 = vst [vmem:[#allocation38_spill] sm:$0xff] %v7387_v47  ;;  %2951 = vperm.xlu1 %3600, %v2305_v63   ;;  %v2660_v63 = vmul.f32 %v3729_v49, %v6664_v58  ;;  %v8773_v47 = vld [vmem:[#allocation87_spill] sm:$0xff] }
 0x2c3   : > { %v2247_v58 = vmul.f32 %v6735_v39, %v8773_v47  ;;  %v3733_v47 = vld [vmem:[%s3902_s18 + $0x50] sm:$0xff] }
 0x2c4   : > { %v7390_v22 = vpop.permute.xlu1 %2613 }
 0x2c5   : > { %2986 = vperm.xlu0 %3599, %v2312_v57   ;;  %v2182_v57 = vld [vmem:[%s7167_s25 + $0x130] sm:$0xff] }
 0x2c6   : > { %v2310_v20 = vsub.f32 %v2182_v57, %v2246_v56  ;;  %v2254_v56 = vmul.f32 %v6935_v8, %v8774_v25  ;;  %v2185_v8 = vld [vmem:[%s7167_s25 + $0x148] sm:$0xff] }
 0x2c7   : > { %v7395_v45 = vpop.permute.xlu0 %2648  ;;  %2961 = vperm.xlu2 %3598, %v2307_v11  }
 0x2c9   : > { %v2797_v16 = vpop.permute.xlu2 %2796 }
 0x2ca   : > { %2966 = vperm.xlu1 %3600, %v2308_v7   ;;  %v3108_v11 = vadd.f32 %v2797_v16, %v2660_v63  ;;  %v3109_v0 = vadd.f32 %v2797_v16, %v2661_v61  ;;  %v2183_v63 = vld [vmem:[%s7167_s25 + $0x138] sm:$0xff]  ;;  %v2666_v7 = vmul.f32 %v3733_v47, %v6772_v35 }
 0x2cb   : > { %v3732_v61 = vld [vmem:[%s3902_s18 + $0x18] sm:$0xff] }
 0x2cc   : > { %v7407_v49 = vpop.permute.xlu1 %2628  ;;  %v3236_v21 = vmax.f32 %v3108_v11, 0.0  ;;  %v3237_v62 = vmax.f32 %v3109_v0, 0.0  ;;  %v2659_v39 = vmul.f32 %v3732_v61, %v6572_v27  ;;  %v3734_v16 = vld [vmem:[%s3902_s18 + $0x58] sm:$0xff]  ;;  %v2190_v27 = vld [vmem:[%s7167_s25 + $0x170] sm:$0xff] }
 0x2cd   : > { %3001 = vperm.xlu0 %3599, %v2315_v12   ;;  %v2667_v57 = vmul.f32 %v3734_v16, %v6772_v35  ;;  %v2311_v12 = vsub.f32 %v2183_v63, %v2247_v58  ;;  %v2318_v35 = vsub.f32 %v2190_v27, %v2254_v56  ;;  %v8776_v63 = vld [vmem:[#allocation90_spill] sm:$0xff]  ;;  %v2186_v16 = vld [vmem:[%s7167_s25 + $0x150] sm:$0xff]  ;;  %v3736_v56 = vld [vmem:[%s3902_s18 + $0x48] sm:$0xff] }
 0x2ce   : > { %3364 = vst [vmem:[%s7416_s28 + $0x20] sm:$0xff] %v3236_v21  ;;  %v8775_v21 = vld [vmem:[#allocation65_spill] sm:$0xff]  ;;  %v8778_v27 = vld [vmem:[#allocation98_spill] sm:$0xff] }
 0x2cf   : > { %v2792_v5 = vpop.permute.xlu0 %2791  ;;  %2976 = vperm.xlu2 %3598, %v2310_v20   ;;  %3365 = vst.msk [vmem:[%s7416_s28 + $0x28] sm:$0xff] %vm351_vm0, %v3237_v62  ;;  %v2249_v2 = vmul.f32 %v6623_v13, %v8775_v21 }
 0x2d0   : > { %v3106_v11 = vadd.f32 %v2792_v5, %v2658_v32  ;;  %v3107_v0 = vadd.f32 %v2792_v5, %v2659_v39  ;;  %v2250_v32 = vmul.f32 %v6826_v46, %v8776_v63  ;;  %v8780_v63 = vld [vmem:[#allocation84_spill] sm:$0xff] }
 0x2d1   : > { %v2812_v61 = vpop.permute.xlu2 %2811  ;;  %v2313_v5 = vsub.f32 %v2185_v8, %v2249_v2 }
 0x2d2   : > { %v3234_v20 = vmax.f32 %v3106_v11, 0.0  ;;  %v3235_v62 = vmax.f32 %v3107_v0, 0.0  ;;  %2981 = vperm.xlu1 %3600, %v2311_v12   ;;  %v3114_v47 = vadd.f32 %v2812_v61, %v2666_v7  ;;  %v3115_v25 = vadd.f32 %v2812_v61, %v2667_v57  ;;  %v3735_v7 = vld [vmem:[%s3902_s18 + $0x40] sm:$0xff]  ;;  %v8777_v11 = vld [vmem:[#allocation96_spill] sm:$0xff] }
 0x2d3   : > { %v2664_v57 = vmul.f32 %v3735_v7, %v8777_v11  ;;  %v2665_v0 = vmul.f32 %v3736_v56, %v8777_v11  ;;  %v3737_v12 = vld [vmem:[%s3902_s18 + $0x80] sm:$0xff] }
 0x2d4   : > { %3362 = vst [vmem:[%s7416_s28 + $0x10] sm:$0xff] %v3234_v20  ;;  %v7437_v58 = vpop.permute.xlu1 %2643  ;;  %v3242_v13 = vmax.f32 %v3114_v47, 0.0  ;;  %v3243_v39 = vmax.f32 %v3115_v25, 0.0  ;;  %v2672_v46 = vmul.f32 %v3737_v12, %v8778_v27  ;;  %v8779_v61 = vld [vmem:[#allocation2_spill] sm:$0xff]  ;;  %v3738_v20 = vld [vmem:[%s3902_s18 + $0x88] sm:$0xff]  ;;  %v2314_v25 = vsub.f32 %v2186_v16, %v2250_v32 }
 0x2d5   : > { %3363 = vst.msk [vmem:[%s7416_s28 + $0x18] sm:$0xff] %vm351_vm0, %v3235_v62  ;;  %3016 = vperm.xlu0 %3599, %v2318_v35   ;;  %v2257_v2 = vmul.f32 %v7012_v30, %v8779_v61  ;;  %v2673_v62 = vmul.f32 %v3738_v20, %v8778_v27  ;;  %v2193_v35 = vld [vmem:[%s7167_s25 + $0x188] sm:$0xff]  ;;  %v2188_v11 = vld [vmem:[%s7167_s25 + $0x160] sm:$0xff]  ;;  %v8781_v61 = vld [vmem:[#allocation9_spill] sm:$0xff] }
 0x2d6   : > { %3370 = vst [vmem:[%s7416_s28 + $0x50] sm:$0xff] %v3242_v13  ;;  %v2252_v13 = vmul.f32 %v6712_v19, %v8780_v63  ;;  %v3739_v12 = vld [vmem:[%s3902_s18] sm:$0xff]  ;;  %v8782_v27 = vld [vmem:[#allocation91_spill] sm:$0xff]  ;;  %v3741_v63 = vld [vmem:[%s3902_s18 + $0x70] sm:$0xff] }
 0x2d7   : > { %v2807_v21 = vpop.permute.xlu0 %2806  ;;  %2991 = vperm.xlu2 %3598, %v2313_v5   ;;  %3371 = vst.msk [vmem:[%s7416_s28 + $0x58] sm:$0xff] %vm351_vm0, %v3243_v39  ;;  %v2321_v16 = vsub.f32 %v2193_v35, %v2257_v2  ;;  %v2670_v2 = vmul.f32 %v3741_v63, %v6884_v17  ;;  %v3742_v35 = vld [vmem:[%s3902_s18 + $0x78] sm:$0xff] }
 0x2d8   : > { %v3112_v8 = vadd.f32 %v2807_v21, %v2664_v57  ;;  %v3113_v47 = vadd.f32 %v2807_v21, %v2665_v0  ;;  %v2656_v57 = vmul.f32 %v3739_v12, %v8781_v61  ;;  %v3740_v0 = vld [vmem:[%s3902_s18 + $0x8] sm:$0xff]  ;;  %v2253_v21 = vmul.f32 %v6914_v18, %v8782_v27  ;;  %v3743_v18 = vld [vmem:[%s3902_s18 + $0xb0] sm:$0xff]  ;;  %v3744_v12 = vld [vmem:[%s3902_s18 + $0xb8] sm:$0xff] }
 0x2d9   : > { %v2827_v7 = vpop.permute.xlu2 %2826  ;;  %v2657_v32 = vmul.f32 %v3740_v0, %v8781_v61 }
 0x2da   : > { %v3240_v5 = vmax.f32 %v3112_v8, 0.0  ;;  %v3241_v39 = vmax.f32 %v3113_v47, 0.0  ;;  %2996 = vperm.xlu1 %3600, %v2314_v25   ;;  %v3120_v56 = vadd.f32 %v2827_v7, %v2672_v46  ;;  %v3121_v30 = vadd.f32 %v2827_v7, %v2673_v62  ;;  %v2189_v25 = vld [vmem:[%s7167_s25 + $0x168] sm:$0xff] }
 0x2db   : > { %v2316_v47 = vsub.f32 %v2188_v11, %v2252_v13  ;;  %v2671_v7 = vmul.f32 %v3742_v35, %v6884_v17  ;;  %v8783_v13 = vld [vmem:[#allocation12_spill] sm:$0xff]  ;;  %v2679_v17 = vmul.f32 %v3744_v12, %v6801_v53  ;;  %v2317_v0 = vsub.f32 %v2189_v25, %v2253_v21  ;;  %v3746_v25 = vld [vmem:[%s3902_s18 + $0x38] sm:$0xff]  ;;  %v8786_v35 = vld [vmem:[#allocation39_spill] sm:$0xff] }
 0x2dc   : > { %3368 = vst [vmem:[%s7416_s28 + $0x40] sm:$0xff] %v3240_v5  ;;  %v2787_v19 = vpop.permute.xlu1 %2786  ;;  %v3248_v20 = vmax.f32 %v3120_v56, 0.0  ;;  %v3249_v46 = vmax.f32 %v3121_v30, 0.0  ;;  %v2678_v5 = vmul.f32 %v3743_v18, %v6801_v53  ;;  %v2260_v11 = vmul.f32 %v7077_v34, %v8783_v13  ;;  %v2192_v13 = vld [vmem:[%s7167_s25 + $0x180] sm:$0xff] }
 0x2dd   : > { %3369 = vst.msk [vmem:[%s7416_s28 + $0x48] sm:$0xff] %vm351_vm0, %v3241_v39  ;;  %v3104_v62 = vadd.f32 %v2787_v19, %v2656_v57  ;;  %v3105_v8 = vadd.f32 %v2787_v19, %v2657_v32  ;;  %3031 = vperm.xlu0 %3599, %v2321_v16   ;;  %v2196_v32 = vld [vmem:[%s7167_s25 + $0x1a0] sm:$0xff]  ;;  %v8784_v16 = vld [vmem:[#allocation83_spill] sm:$0xff] }
 0x2de   : > { %3376 = vst [vmem:[%s7416_s28 + $0x80] sm:$0xff] %v3248_v20  ;;  %v2255_v19 = vmul.f32 %v6807_v41, %v8784_v16  ;;  %v2324_v41 = vsub.f32 %v2196_v32, %v2260_v11  ;;  %v3747_v12 = vld [vmem:[%s3902_s18 + $0xa0] sm:$0xff] }
 0x2df   : > { %v3232_v39 = vmax.f32 %v3104_v62, 0.0  ;;  %v3233_v56 = vmax.f32 %v3105_v8, 0.0  ;;  %v2822_v30 = vpop.permute.xlu0 %2821  ;;  %3006 = vperm.xlu2 %3598, %v2316_v47   ;;  %3377 = vst.msk [vmem:[%s7416_s28 + $0x88] sm:$0xff] %vm351_vm0, %v3249_v46  ;;  %v2191_v46 = vld [vmem:[%s7167_s25 + $0x178] sm:$0xff]  ;;  %v3745_v8 = vld [vmem:[%s3902_s18 + $0x30] sm:$0xff]  ;;  %v8785_v47 = vld [vmem:[#allocation18_spill] sm:$0xff]  ;;  %v2676_v11 = vmul.f32 %v3747_v12, %v6984_v4 }
 0x2e0   : > { %v3118_v61 = vadd.f32 %v2822_v30, %v2670_v2  ;;  %v3119_v57 = vadd.f32 %v2822_v30, %v2671_v7  ;;  %v2662_v21 = vmul.f32 %v3745_v8, %v8785_v47  ;;  %v2663_v63 = vmul.f32 %v3746_v25, %v8785_v47  ;;  %v8788_v8 = vld [vmem:[#allocation95_spill] sm:$0xff] }
 0x2e1   : > { %3360 = vst [vmem:[%s7416_s28] sm:$0xff] %v3232_v39  ;;  %v2842_v27 = vpop.permute.xlu2 %2841  ;;  %v2256_v7 = vmul.f32 %v6990_v52, %v8786_v35  ;;  %v2319_v30 = vsub.f32 %v2191_v46, %v2255_v19  ;;  %v3749_v52 = vld [vmem:[%s3902_s18 + $0xe0] sm:$0xff]  ;;  %v8787_v19 = vld [vmem:[#allocation8_spill] sm:$0xff]  ;;  %v2258_v47 = vmul.f32 %v6892_v9, %v8788_v8  ;;  %v8789_v35 = vld [vmem:[#allocation97_spill] sm:$0xff] }
 0x2e2   : > { %3361 = vst.msk [vmem:[%s7416_s28 + $0x8] sm:$0xff] %vm351_vm0, %v3233_v56  ;;  %v3246_v20 = vmax.f32 %v3118_v61, 0.0  ;;  %v3247_v34 = vmax.f32 %v3119_v57, 0.0  ;;  %3011 = vperm.xlu1 %3600, %v2317_v0   ;;  %v3126_v62 = vadd.f32 %v2842_v27, %v2678_v5  ;;  %v3127_v53 = vadd.f32 %v2842_v27, %v2679_v17  ;;  %v3748_v17 = vld [vmem:[%s3902_s18 + $0xa8] sm:$0xff] }
 0x2e3   : > { %v2677_v61 = vmul.f32 %v3748_v17, %v6984_v4  ;;  %v2684_v57 = vmul.f32 %v3749_v52, %v6910_v15  ;;  %v2263_v27 = vmul.f32 %v7133_v23, %v8787_v19  ;;  %v2195_v52 = vld [vmem:[%s7167_s25 + $0x198] sm:$0xff] }
 0x2e4   : > { %3374 = vst [vmem:[%s7416_s28 + $0x70] sm:$0xff] %v3246_v20  ;;  %v2802_v2 = vpop.permute.xlu1 %2801  ;;  %v3254_v18 = vmax.f32 %v3126_v62, 0.0  ;;  %v3255_v5 = vmax.f32 %v3127_v53, 0.0  ;;  %v3750_v20 = vld [vmem:[%s3902_s18 + $0xe8] sm:$0xff]  ;;  %v2320_v62 = vsub.f32 %v2192_v13, %v2256_v7  ;;  %v2199_v53 = vld [vmem:[%s7167_s25 + $0x1b8] sm:$0xff] }
 0x2e5   : > { %3375 = vst.msk [vmem:[%s7416_s28 + $0x78] sm:$0xff] %vm351_vm0, %v3247_v34  ;;  %v3110_v39 = vadd.f32 %v2802_v2, %v2662_v21  ;;  %v3111_v56 = vadd.f32 %v2802_v2, %v2663_v63  ;;  %3046 = vperm.xlu0 %3599, %v2324_v41   ;;  %v2685_v4 = vmul.f32 %v3750_v20, %v6910_v15  ;;  %v2194_v63 = vld [vmem:[%s7167_s25 + $0x190] sm:$0xff]  ;;  %v3751_v2 = vld [vmem:[%s3902_s18 + $0x60] sm:$0xff] }
 0x2e6   : > { %3382 = vst [vmem:[%s7416_s28 + $0xb0] sm:$0xff] %v3254_v18  ;;  %v2668_v7 = vmul.f32 %v3751_v2, %v8789_v35  ;;  %v3752_v18 = vld [vmem:[%s3902_s18 + $0x68] sm:$0xff]  ;;  %v2327_v9 = vsub.f32 %v2199_v53, %v2263_v27 }
 0x2e7   : > { %v3238_v0 = vmax.f32 %v3110_v39, 0.0  ;;  %v3239_v32 = vmax.f32 %v3111_v56, 0.0  ;;  %v2837_v16 = vpop.permute.xlu0 %2836  ;;  %3021 = vperm.xlu2 %3598, %v2319_v30   ;;  %3383 = vst.msk [vmem:[%s7416_s28 + $0xb8] sm:$0xff] %vm351_vm0, %v3255_v5  ;;  %v2669_v5 = vmul.f32 %v3752_v18, %v8789_v35  ;;  %v8790_v56 = vld [vmem:[#allocation42_spill] sm:$0xff]  ;;  %v3757_v35 = vld [vmem:[%s3902_s18 + $0x90] sm:$0xff] }
 0x2e8   : > { %v3124_v34 = vadd.f32 %v2837_v16, %v2676_v11  ;;  %v3125_v46 = vadd.f32 %v2837_v16, %v2677_v61  ;;  %v2259_v30 = vmul.f32 %v7057_v43, %v8790_v56  ;;  %v2322_v61 = vsub.f32 %v2194_v63, %v2258_v47  ;;  %v3755_v43 = vld [vmem:[%s3902_s18 + $0x110] sm:$0xff]  ;;  %v8794_v56 = vld [vmem:[#allocation19_spill] sm:$0xff] }
 0x2e9   : > { %3366 = vst [vmem:[%s7416_s28 + $0x30] sm:$0xff] %v3238_v0  ;;  %v2857_v21 = vpop.permute.xlu2 %2856  ;;  %v2690_v19 = vmul.f32 %v3755_v43, %v7000_v55 }
 0x2ea   : > { %3367 = vst.msk [vmem:[%s7416_s28 + $0x38] sm:$0xff] %vm351_vm0, %v3239_v32  ;;  %v3252_v25 = vmax.f32 %v3124_v34, 0.0  ;;  %v3253_v23 = vmax.f32 %v3125_v46, 0.0  ;;  %3026 = vperm.xlu1 %3600, %v2320_v62   ;;  %v3132_v41 = vadd.f32 %v2857_v21, %v2684_v57  ;;  %v3133_v15 = vadd.f32 %v2857_v21, %v2685_v4  ;;  %v3753_v57 = vld [vmem:[%s3902_s18 + $0xd0] sm:$0xff]  ;;  %v3754_v32 = vld [vmem:[%s3902_s18 + $0xd8] sm:$0xff] }
 0x2eb   : > { %v2682_v0 = vmul.f32 %v3753_v57, %v7067_v59  ;;  %v2683_v16 = vmul.f32 %v3754_v32, %v7067_v59  ;;  %v8791_v34 = vld [vmem:[#allocation21_spill] sm:$0xff]  ;;  %v2323_v47 = vsub.f32 %v2195_v52, %v2259_v30  ;;  %v2202_v21 = vld [vmem:[%s7167_s25 + $0x1d0] sm:$0xff]  ;;  %v2262_v30 = vmul.f32 %v7117_v44, %v8794_v56  ;;  %v3759_v57 = vld [vmem:[%s3902_s18 + $0x100] sm:$0xff] }
 0x2ec   : > { %3380 = vst [vmem:[%s7416_s28 + $0xa0] sm:$0xff] %v3252_v25  ;;  %v2817_v39 = vpop.permute.xlu1 %2816  ;;  %v3260_v13 = vmax.f32 %v3132_v41, 0.0  ;;  %v3261_v12 = vmax.f32 %v3133_v15, 0.0  ;;  %v2266_v46 = vmul.f32 %v7180_v54, %v8791_v34  ;;  %v3756_v62 = vld [vmem:[%s3902_s18 + $0x118] sm:$0xff]  ;;  %v8792_v25 = vld [vmem:[#allocation4_spill] sm:$0xff]  ;;  %v2197_v15 = vld [vmem:[%s7167_s25 + $0x1a8] sm:$0xff] }
 0x2ed   : > { %3381 = vst.msk [vmem:[%s7416_s28 + $0xa8] sm:$0xff] %vm351_vm0, %v3253_v23  ;;  %v3116_v11 = vadd.f32 %v2817_v39, %v2668_v7  ;;  %v3117_v17 = vadd.f32 %v2817_v39, %v2669_v5  ;;  %3061 = vperm.xlu0 %3599, %v2327_v9   ;;  %v2691_v59 = vmul.f32 %v3756_v62, %v7000_v55  ;;  %v8793_v7 = vld [vmem:[#allocation99_spill] sm:$0xff]  ;;  %v3758_v5 = vld [vmem:[%s3902_s18 + $0x98] sm:$0xff]  ;;  %v2198_v52 = vld [vmem:[%s7167_s25 + $0x1b0] sm:$0xff] }
 0x2ee   : > { %3388 = vst [vmem:[%s7416_s28 + $0xe0] sm:$0xff] %v3260_v13  ;;  %v2261_v23 = vmul.f32 %v6968_v60, %v8792_v25  ;;  %v2674_v18 = vmul.f32 %v3757_v35, %v8793_v7  ;;  %v2675_v9 = vmul.f32 %v3758_v5, %v8793_v7  ;;  %v2330_v60 = vsub.f32 %v2202_v21, %v2266_v46  ;;  %v3760_v32 = vld [vmem:[%s3902_s18 + $0x108] sm:$0xff]  ;;  %v3761_v44 = vld [vmem:[%s3902_s18 + $0x140] sm:$0xff] }
 0x2ef   : > { %v3244_v27 = vmax.f32 %v3116_v11, 0.0  ;;  %v3245_v20 = vmax.f32 %v3117_v17, 0.0  ;;  %v2852_v4 = vpop.permute.xlu0 %2851  ;;  %3036 = vperm.xlu2 %3598, %v2322_v61   ;;  %3389 = vst.msk [vmem:[%s7416_s28 + $0xe8] sm:$0xff] %vm351_vm0, %v3261_v12  ;;  %v2696_v43 = vmul.f32 %v3761_v44, %v7083_v51  ;;  %v3762_v46 = vld [vmem:[%s3902_s18 + $0x148] sm:$0xff] }
 0x2f0   : > { %v3130_v53 = vadd.f32 %v2852_v4, %v2682_v0  ;;  %v3131_v8 = vadd.f32 %v2852_v4, %v2683_v16  ;;  %v2325_v61 = vsub.f32 %v2197_v15, %v2261_v23  ;;  %v2688_v0 = vmul.f32 %v3759_v57, %v7139_v31  ;;  %v8795_v4 = vld [vmem:[#allocation24_spill] sm:$0xff]  ;;  %v8797_v15 = vld [vmem:[#allocation49_spill] sm:$0xff] }
 0x2f1   : > { %3372 = vst [vmem:[%s7416_s28 + $0x60] sm:$0xff] %v3244_v27  ;;  %v2872_v63 = vpop.permute.xlu2 %2871  ;;  %v2689_v16 = vmul.f32 %v3760_v32, %v7139_v31  ;;  %v2269_v34 = vmul.f32 %v7205_v33, %v8795_v4  ;;  %v2697_v31 = vmul.f32 %v3762_v46, %v7083_v51 }
 0x2f2   : > { %3373 = vst.msk [vmem:[%s7416_s28 + $0x68] sm:$0xff] %vm351_vm0, %v3245_v20  ;;  %v3258_v41 = vmax.f32 %v3130_v53, 0.0  ;;  %v3259_v54 = vmax.f32 %v3131_v8, 0.0  ;;  %3041 = vperm.xlu1 %3600, %v2323_v47   ;;  %v3138_v2 = vadd.f32 %v2872_v63, %v2690_v19  ;;  %v3139_v55 = vadd.f32 %v2872_v63, %v2691_v59  ;;  %v2205_v8 = vld [vmem:[%s7167_s25 + $0x1e8] sm:$0xff]  ;;  %v8796_v47 = vld [vmem:[#allocation5_spill] sm:$0xff]  ;;  %v2200_v63 = vld [vmem:[%s7167_s25 + $0x1c0] sm:$0xff] }
 0x2f3   : > { %v2326_v53 = vsub.f32 %v2198_v52, %v2262_v30  ;;  %v2264_v21 = vmul.f32 %v7040_v3, %v8796_v47  ;;  %v2333_v3 = vsub.f32 %v2205_v8, %v2269_v34  ;;  %v3770_v47 = vld [vmem:[%s3902_s18 + $0xf8] sm:$0xff] }
 0x2f4   : > { %3386 = vst [vmem:[%s7416_s28 + $0xd0] sm:$0xff] %v3258_v41  ;;  %v2832_v39 = vpop.permute.xlu1 %2831  ;;  %v3266_v13 = vmax.f32 %v3138_v2, 0.0  ;;  %v3267_v12 = vmax.f32 %v3139_v55, 0.0  ;;  %v3764_v55 = vld [vmem:[%s3902_s18 + $0xc8] sm:$0xff] }
 0x2f5   : > { %3387 = vst.msk [vmem:[%s7416_s28 + $0xd8] sm:$0xff] %vm351_vm0, %v3259_v54  ;;  %v3122_v11 = vadd.f32 %v2832_v39, %v2674_v18  ;;  %v3123_v17 = vadd.f32 %v2832_v39, %v2675_v9  ;;  %3076 = vperm.xlu0 %3599, %v2330_v60   ;;  %v3763_v54 = vld [vmem:[%s3902_s18 + $0xc0] sm:$0xff]  ;;  %v2681_v35 = vmul.f32 %v3764_v55, %v8797_v15 }
 0x2f6   : > { %3394 = vst [vmem:[%s7416_s28 + $0x110] sm:$0xff] %v3266_v13  ;;  %v2680_v2 = vmul.f32 %v3763_v54, %v8797_v15  ;;  %v8798_v18 = vld [vmem:[#allocation22_spill] sm:$0xff]  ;;  %v2328_v30 = vsub.f32 %v2200_v63, %v2264_v21  ;;  %v2201_v13 = vld [vmem:[%s7167_s25 + $0x1c8] sm:$0xff] }
 0x2f7   : > { %v3250_v19 = vmax.f32 %v3122_v11, 0.0  ;;  %v3251_v27 = vmax.f32 %v3123_v17, 0.0  ;;  %v2867_v20 = vpop.permute.xlu0 %2866  ;;  %3051 = vperm.xlu2 %3598, %v2325_v61   ;;  %3395 = vst.msk [vmem:[%s7416_s28 + $0x118] sm:$0xff] %vm351_vm0, %v3267_v12  ;;  %v2265_v5 = vmul.f32 %v7170_v50, %v8798_v18  ;;  %v3765_v12 = vld [vmem:[%s3902_s18 + $0x130] sm:$0xff]  ;;  %v3766_v17 = vld [vmem:[%s3902_s18 + $0x138] sm:$0xff]  ;;  %v2204_v15 = vld [vmem:[%s7167_s25 + $0x1e0] sm:$0xff] }
 0x2f8   : > { %v3136_v62 = vadd.f32 %v2867_v20, %v2688_v0  ;;  %v3137_v59 = vadd.f32 %v2867_v20, %v2689_v16  ;;  %v2694_v11 = vmul.f32 %v3765_v12, %v7188_v10  ;;  %v2695_v61 = vmul.f32 %v3766_v17, %v7188_v10  ;;  %v3767_v50 = vld [vmem:[%s3902_s18 + $0x170] sm:$0xff]  ;;  %v3768_v16 = vld [vmem:[%s3902_s18 + $0x178] sm:$0xff] }
 0x2f9   : > { %3378 = vst [vmem:[%s7416_s28 + $0x90] sm:$0xff] %v3250_v19  ;;  %v2887_v25 = vpop.permute.xlu2 %2886  ;;  %v2702_v52 = vmul.f32 %v3767_v50, %v7155_v6  ;;  %v2703_v44 = vmul.f32 %v3768_v16, %v7155_v6  ;;  %v2329_v10 = vsub.f32 %v2201_v13, %v2265_v5  ;;  %v8802_v13 = vld [vmem:[#allocation14_spill] sm:$0xff]  ;;  %v2206_v50 = vld [vmem:[%s7167_s25 + $0x1f0] sm:$0xff] }
 0x2fa   : > { %3379 = vst.msk [vmem:[%s7416_s28 + $0x98] sm:$0xff] %vm351_vm0, %v3251_v27  ;;  %v3264_v23 = vmax.f32 %v3136_v62, 0.0  ;;  %v3265_v33 = vmax.f32 %v3137_v59, 0.0  ;;  %3056 = vperm.xlu1 %3600, %v2326_v53   ;;  %v3144_v41 = vadd.f32 %v2887_v25, %v2696_v43  ;;  %v3145_v51 = vadd.f32 %v2887_v25, %v2697_v31  ;;  %v8799_v27 = vld [vmem:[#allocation11_spill] sm:$0xff]  ;;  %v2203_v31 = vld [vmem:[%s7167_s25 + $0x1d8] sm:$0xff]  ;;  %v3769_v59 = vld [vmem:[%s3902_s18 + $0xf0] sm:$0xff] }
 0x2fb   : > { %v2267_v20 = vmul.f32 %v7104_v1, %v8799_v27  ;;  %v8800_v53 = vld [vmem:[#allocation48_spill] sm:$0xff]  ;;  %v8801_v25 = vld [vmem:[#allocation25_spill] sm:$0xff]  ;;  %v2270_v12 = vmul.f32 %v7158_v26, %v8802_v13 }
 0x2fc   : > { %3392 = vst [vmem:[%s7416_s28 + $0x100] sm:$0xff] %v3264_v23  ;;  %v2847_v7 = vpop.permute.xlu1 %2846  ;;  %v3272_v9 = vmax.f32 %v3144_v41, 0.0  ;;  %v3273_v60 = vmax.f32 %v3145_v51, 0.0  ;;  %v2686_v8 = vmul.f32 %v3769_v59, %v8800_v53  ;;  %v2687_v1 = vmul.f32 %v3770_v47, %v8800_v53  ;;  %v3779_v53 = vld [vmem:[%s3902_s18 + $0x1d0] sm:$0xff]  ;;  %v8808_v13 = vld [vmem:[#allocation13_spill] sm:$0xff] }
 0x2fd   : > { %3393 = vst.msk [vmem:[%s7416_s28 + $0x108] sm:$0xff] %vm351_vm0, %v3265_v33  ;;  %v3128_v39 = vadd.f32 %v2847_v7, %v2680_v2  ;;  %v3129_v56 = vadd.f32 %v2847_v7, %v2681_v35  ;;  %3091 = vperm.xlu0 %3599, %v2333_v3   ;;  %v2268_v23 = vmul.f32 %v7195_v24, %v8801_v25  ;;  %v3771_v2 = vld [vmem:[%s3902_s18 + $0x160] sm:$0xff]  ;;  %v3772_v35 = vld [vmem:[%s3902_s18 + $0x168] sm:$0xff] }
 0x2fe   : > { %3400 = vst [vmem:[%s7416_s28 + $0x140] sm:$0xff] %v3272_v9  ;;  %v2331_v54 = vsub.f32 %v2203_v31, %v2267_v20  ;;  %v2700_v55 = vmul.f32 %v3771_v2, %v7213_v42  ;;  %v2701_v3 = vmul.f32 %v3772_v35, %v7213_v42  ;;  %v3773_v24 = vld [vmem:[%s3902_s18 + $0x1a0] sm:$0xff]  ;;  %v3777_v31 = vld [vmem:[%s3902_s18 + $0x190] sm:$0xff] }
 0x2ff   : > { %v3256_v57 = vmax.f32 %v3128_v39, 0.0  ;;  %v3257_v0 = vmax.f32 %v3129_v56, 0.0  ;;  %v2882_v32 = vpop.permute.xlu0 %2881  ;;  %3066 = vperm.xlu2 %3598, %v2328_v30   ;;  %3401 = vst.msk [vmem:[%s7416_s28 + $0x148] sm:$0xff] %vm351_vm0, %v3273_v60  ;;  %v2708_v7 = vmul.f32 %v3773_v24, %v7193_v36  ;;  %v3774_v60 = vld [vmem:[%s3902_s18 + $0x1a8] sm:$0xff]  ;;  %v2332_v42 = vsub.f32 %v2204_v15, %v2268_v23  ;;  %v3780_v23 = vld [vmem:[%s3902_s18 + $0x1d8] sm:$0xff]  ;;  %v8807_v24 = vld [vmem:[#allocation54_spill] sm:$0xff] }
 0x300   : > { %v3142_v43 = vadd.f32 %v2882_v32, %v2694_v11  ;;  %v3143_v19 = vadd.f32 %v2882_v32, %v2695_v61  ;;  %v2709_v39 = vmul.f32 %v3774_v60, %v7193_v36  ;;  %v3776_v32 = vld [vmem:[%s3902_s18 + $0x128] sm:$0xff] }
 0x301   : > { %3384 = vst [vmem:[%s7416_s28 + $0xc0] sm:$0xff] %v3256_v57  ;;  %v2902_v4 = vpop.permute.xlu2 %2901  ;;  %v3775_v57 = vld [vmem:[%s3902_s18 + $0x120] sm:$0xff]  ;;  %v2693_v26 = vmul.f32 %v3776_v32, %v7042_v37  ;;  %v3786_v32 = vld [vmem:[%s3902_s18 + $0x208] sm:$0xff] }
 0x302   : > { %3385 = vst.msk [vmem:[%s7416_s28 + $0xc8] sm:$0xff] %vm351_vm0, %v3257_v0  ;;  %v3270_v34 = vmax.f32 %v3142_v43, 0.0  ;;  %v3271_v46 = vmax.f32 %v3143_v19, 0.0  ;;  %3071 = vperm.xlu1 %3600, %v2329_v10   ;;  %v3150_v62 = vadd.f32 %v2902_v4, %v2702_v52  ;;  %v3151_v6 = vadd.f32 %v2902_v4, %v2703_v44  ;;  %v8803_v44 = vld [vmem:[#allocation17_spill] sm:$0xff]  ;;  %v8804_v43 = vld [vmem:[#allocation104_spill] sm:$0xff] }
 0x303   : > { %v2692_v0 = vmul.f32 %v3775_v57, %v7042_v37  ;;  %v2271_v19 = vmul.f32 %v8804_v43, %v8803_v44  ;;  %v3778_v37 = vld [vmem:[%s3902_s18 + $0x198] sm:$0xff]  ;;  %v8809_v57 = vld [vmem:[#allocation27_spill] sm:$0xff] }
 0x304   : > { %3398 = vst [vmem:[%s7416_s28 + $0x130] sm:$0xff] %v3270_v34  ;;  %v2862_v21 = vpop.permute.xlu1 %2861  ;;  %v3278_v33 = vmax.f32 %v3150_v62, 0.0  ;;  %v3279_v63 = vmax.f32 %v3151_v6, 0.0  ;;  %v2334_v34 = vsub.f32 %v2206_v50, %v2270_v12  ;;  %v8805_v62 = vld [vmem:[#allocation33_spill] sm:$0xff] }
 0x305   : > { %3399 = vst.msk [vmem:[%s7416_s28 + $0x138] sm:$0xff] %vm351_vm0, %v3271_v46  ;;  %v3134_v41 = vadd.f32 %v2862_v21, %v2686_v8  ;;  %v3135_v51 = vadd.f32 %v2862_v21, %v2687_v1  ;;  %v2207_v46 = vld [vmem:[%s7167_s25 + $0x1f8] sm:$0xff]  ;;  %v2706_v6 = vmul.f32 %v3777_v31, %v8805_v62  ;;  %v2707_v59 = vmul.f32 %v3778_v37, %v8805_v62  ;;  %v3788_v31 = vld [vmem:[%s3902_s18 + $0x188] sm:$0xff] }
 0x306   : > { %3406 = vst [vmem:[%s7416_s28 + $0x170] sm:$0xff] %v3278_v33  ;;  %v8806_v8 = vld [vmem:[#allocation113_spill] sm:$0xff] }
 0x307   : > { %v3262_v18 = vmax.f32 %v3134_v41, 0.0  ;;  %v3263_v5 = vmax.f32 %v3135_v51, 0.0  ;;  %v2897_v9 = vpop.permute.xlu0 %2896  ;;  %3081 = vperm.xlu2 %3598, %v2331_v54   ;;  %3407 = vst.msk [vmem:[%s7416_s28 + $0x178] sm:$0xff] %vm351_vm0, %v3279_v63  ;;  %v2714_v47 = vmul.f32 %v3779_v53, %v8806_v8  ;;  %v2715_v33 = vmul.f32 %v3780_v23, %v8806_v8 }
 0x308   : > { %v3148_v56 = vadd.f32 %v2897_v9, %v2700_v55  ;;  %v3149_v30 = vadd.f32 %v2897_v9, %v2701_v3  ;;  %v2335_v51 = vsub.f32 %v2207_v46, %v2271_v19  ;;  %v3781_v3 = vld [vmem:[%s3902_s18 + $0x150] sm:$0xff] }
 0x309   : > { %3390 = vst [vmem:[%s7416_s28 + $0xf0] sm:$0xff] %v3262_v18  ;;  %v2917_v11 = vpop.permute.xlu2 %2916  ;;  %v3782_v18 = vld [vmem:[%s3902_s18 + $0x158] sm:$0xff] }
 0x30a   : > { %3391 = vst.msk [vmem:[%s7416_s28 + $0xf8] sm:$0xff] %vm351_vm0, %v3263_v5  ;;  %v3276_v17 = vmax.f32 %v3148_v56, 0.0  ;;  %v3277_v61 = vmax.f32 %v3149_v30, 0.0  ;;  %3086 = vperm.xlu1 %3600, %v2332_v42   ;;  %v3156_v52 = vadd.f32 %v2917_v11, %v2708_v7  ;;  %v3157_v36 = vadd.f32 %v2917_v11, %v2709_v39  ;;  %v3783_v42 = vld [vmem:[%s3902_s18 + $0x1c0] sm:$0xff]  ;;  %v3784_v11 = vld [vmem:[%s3902_s18 + $0x1c8] sm:$0xff] }
 0x30b   : > { %v2698_v7 = vmul.f32 %v3781_v3, %v8807_v24  ;;  %v2699_v5 = vmul.f32 %v3782_v18, %v8807_v24  ;;  %v2712_v12 = vmul.f32 %v3783_v42, %v8808_v13 }
 0x30c   : > { %3404 = vst [vmem:[%s7416_s28 + $0x160] sm:$0xff] %v3276_v17  ;;  %v2877_v16 = vpop.permute.xlu1 %2876  ;;  %v3284_v10 = vmax.f32 %v3156_v52, 0.0  ;;  %v3285_v27 = vmax.f32 %v3157_v36, 0.0  ;;  %v2713_v17 = vmul.f32 %v3784_v11, %v8808_v13  ;;  %v3785_v36 = vld [vmem:[%s3902_s18 + $0x200] sm:$0xff] }
 0x30d   : > { %3405 = vst.msk [vmem:[%s7416_s28 + $0x168] sm:$0xff] %vm351_vm0, %v3277_v61  ;;  %v3140_v20 = vadd.f32 %v2877_v16, %v2692_v0  ;;  %v3141_v4 = vadd.f32 %v2877_v16, %v2693_v26  ;;  %v2720_v0 = vmul.f32 %v3785_v36, %v8809_v57  ;;  %v2721_v26 = vmul.f32 %v3786_v32, %v8809_v57  ;;  %v3796_v36 = vld [vmem:[%s3902_s18 + $0x228] sm:$0xff] }
 0x30e   : > { %3412 = vst [vmem:[%s7416_s28 + $0x1a0] sm:$0xff] %v3284_v10  ;;  %v2725_v57 = vmul.f32 %v3796_v36, %v7287_v28 }
 0x30f   : > { %v3268_v1 = vmax.f32 %v3140_v20, 0.0  ;;  %v3269_v21 = vmax.f32 %v3141_v4, 0.0  ;;  %v2912_v25 = vpop.permute.xlu0 %2911  ;;  %3096 = vperm.xlu2 %3598, %v2334_v34   ;;  %3413 = vst.msk [vmem:[%s7416_s28 + $0x1a8] sm:$0xff] %vm351_vm0, %v3285_v27  ;;  %v3787_v4 = vld [vmem:[%s3902_s18 + $0x180] sm:$0xff] }
 0x310   : > { %v3154_v63 = vadd.f32 %v2912_v25, %v2706_v6  ;;  %v3155_v41 = vadd.f32 %v2912_v25, %v2707_v59  ;;  %v8810_v34 = vld [vmem:[#allocation102_spill] sm:$0xff]  ;;  %v3790_v25 = vld [vmem:[%s3902_s18 + $0x1f8] sm:$0xff] }
 0x311   : > { %3396 = vst [vmem:[%s7416_s28 + $0x120] sm:$0xff] %v3268_v1  ;;  %v2932_v54 = vpop.permute.xlu2 %2931  ;;  %v2704_v46 = vmul.f32 %v3787_v4, %v8810_v34  ;;  %v2705_v62 = vmul.f32 %v3788_v31, %v8810_v34  ;;  %v8811_v1 = vld [vmem:[#allocation106_spill] sm:$0xff] }
 0x312   : > { %3397 = vst.msk [vmem:[%s7416_s28 + $0x128] sm:$0xff] %vm351_vm0, %v3269_v21  ;;  %v3282_v15 = vmax.f32 %v3154_v63, 0.0  ;;  %v3283_v2 = vmax.f32 %v3155_v41, 0.0  ;;  %3101 = vperm.xlu1 %3600, %v2335_v51   ;;  %v3162_v55 = vadd.f32 %v2932_v54, %v2714_v47  ;;  %v3163_v35 = vadd.f32 %v2932_v54, %v2715_v33  ;;  %v3789_v47 = vld [vmem:[%s3902_s18 + $0x1f0] sm:$0xff]  ;;  %v8812_v54 = vld [vmem:[#allocation74_spill] sm:$0xff] }
 0x313   : > { %v2718_v21 = vmul.f32 %v3789_v47, %v8811_v1  ;;  %v2719_v23 = vmul.f32 %v3790_v25, %v8811_v1  ;;  %v3791_v51 = vld [vmem:[%s3902_s18 + $0x230] sm:$0xff] }
 0x314   : > { %3410 = vst [vmem:[%s7416_s28 + $0x190] sm:$0xff] %v3282_v15  ;;  %v2892_v9 = vpop.permute.xlu1 %2891  ;;  %v3290_v60 = vmax.f32 %v3162_v55, 0.0  ;;  %v3291_v39 = vmax.f32 %v3163_v35, 0.0  ;;  %v2726_v15 = vmul.f32 %v3791_v51, %v8812_v54 }
 0x315   : > { %3411 = vst.msk [vmem:[%s7416_s28 + $0x198] sm:$0xff] %vm351_vm0, %v3283_v2  ;;  %v3146_v56 = vadd.f32 %v2892_v9, %v2698_v7  ;;  %v3147_v30 = vadd.f32 %v2892_v9, %v2699_v5  ;;  %v3792_v2 = vld [vmem:[%s3902_s18 + $0x238] sm:$0xff] }
 0x316   : > { %3418 = vst [vmem:[%s7416_s28 + $0x1d0] sm:$0xff] %v3290_v60  ;;  %v2727_v55 = vmul.f32 %v3792_v2, %v8812_v54  ;;  %v3793_v60 = vld [vmem:[%s3902_s18 + $0x1b0] sm:$0xff] }
 0x317   : > { %v3274_v61 = vmax.f32 %v3146_v56, 0.0  ;;  %v3275_v50 = vmax.f32 %v3147_v30, 0.0  ;;  %v2927_v52 = vpop.permute.xlu0 %2926  ;;  %3419 = vst.msk [vmem:[%s7416_s28 + $0x1d8] sm:$0xff] %vm351_vm0, %v3291_v39  ;;  %v8813_v39 = vld [vmem:[#allocation100_spill] sm:$0xff]  ;;  %v3794_v30 = vld [vmem:[%s3902_s18 + $0x1b8] sm:$0xff] }
 0x318   : > { %v3160_v16 = vadd.f32 %v2927_v52, %v2712_v12  ;;  %v3161_v44 = vadd.f32 %v2927_v52, %v2713_v17  ;;  %v2710_v56 = vmul.f32 %v3793_v60, %v8813_v39  ;;  %v2711_v42 = vmul.f32 %v3794_v30, %v8813_v39 }
 0x319   : > { %3402 = vst [vmem:[%s7416_s28 + $0x150] sm:$0xff] %v3274_v61  ;;  %v2947_v43 = vpop.permute.xlu2 %2946 }
 0x31a   : > { %3403 = vst.msk [vmem:[%s7416_s28 + $0x158] sm:$0xff] %vm351_vm0, %v3275_v50  ;;  %v3288_v19 = vmax.f32 %v3160_v16, 0.0  ;;  %v3289_v10 = vmax.f32 %v3161_v44, 0.0  ;;  %v3168_v27 = vadd.f32 %v2947_v43, %v2720_v0  ;;  %v3169_v20 = vadd.f32 %v2947_v43, %v2721_v26  ;;  %v3795_v50 = vld [vmem:[%s3902_s18 + $0x220] sm:$0xff]  ;;  %v8814_v44 = vld [vmem:[#allocation28_spill] sm:$0xff] }
 0x31b   : > { %v2724_v52 = vmul.f32 %v3795_v50, %v7287_v28  ;;  %v3797_v16 = vld [vmem:[%s3902_s18 + $0x260] sm:$0xff] }
 0x31c   : > { %3416 = vst [vmem:[%s7416_s28 + $0x1c0] sm:$0xff] %v3288_v19  ;;  %v2907_v6 = vpop.permute.xlu1 %2906  ;;  %v3296_v37 = vmax.f32 %v3168_v27, 0.0  ;;  %v3297_v59 = vmax.f32 %v3169_v20, 0.0  ;;  %v2732_v43 = vmul.f32 %v3797_v16, %v8814_v44  ;;  %v3798_v19 = vld [vmem:[%s3902_s18 + $0x268] sm:$0xff] }
 0x31d   : > { %3417 = vst.msk [vmem:[%s7416_s28 + $0x1c8] sm:$0xff] %vm351_vm0, %v3289_v10  ;;  %v3152_v53 = vadd.f32 %v2907_v6, %v2704_v46  ;;  %v3153_v8 = vadd.f32 %v2907_v6, %v2705_v62  ;;  %v2733_v10 = vmul.f32 %v3798_v19, %v8814_v44  ;;  %v3799_v62 = vld [vmem:[%s3902_s18 + $0x1e0] sm:$0xff]  ;;  %v8815_v6 = vld [vmem:[#allocation103_spill] sm:$0xff] }
 0x31e   : > { %3424 = vst [vmem:[%s7416_s28 + $0x200] sm:$0xff] %v3296_v37  ;;  %v2716_v37 = vmul.f32 %v3799_v62, %v8815_v6  ;;  %v3808_v16 = vld [vmem:[%s3902_s18 + $0x288] sm:$0xff] }
 0x31f   : > { %v3280_v33 = vmax.f32 %v3152_v53, 0.0  ;;  %v3281_v63 = vmax.f32 %v3153_v8, 0.0  ;;  %v2942_v41 = vpop.permute.xlu0 %2941  ;;  %3425 = vst.msk [vmem:[%s7416_s28 + $0x208] sm:$0xff] %vm351_vm0, %v3297_v59  ;;  %v3800_v59 = vld [vmem:[%s3902_s18 + $0x1e8] sm:$0xff] }
 0x320   : > { %v3166_v35 = vadd.f32 %v2942_v41, %v2718_v21  ;;  %v3167_v3 = vadd.f32 %v2942_v41, %v2719_v23  ;;  %v2717_v53 = vmul.f32 %v3800_v59, %v8815_v6  ;;  %v3801_v23 = vld [vmem:[%s3902_s18 + $0x250] sm:$0xff]  ;;  %v3802_v41 = vld [vmem:[%s3902_s18 + $0x258] sm:$0xff] }
 0x321   : > { %3408 = vst [vmem:[%s7416_s28 + $0x180] sm:$0xff] %v3280_v33  ;;  %v2962_v24 = vpop.permute.xlu2 %2961  ;;  %v8816_v33 = vld [vmem:[#allocation29_spill] sm:$0xff] }
 0x322   : > { %3409 = vst.msk [vmem:[%s7416_s28 + $0x188] sm:$0xff] %vm351_vm0, %v3281_v63  ;;  %v3294_v7 = vmax.f32 %v3166_v35, 0.0  ;;  %v3295_v18 = vmax.f32 %v3167_v3, 0.0  ;;  %v3174_v5 = vadd.f32 %v2962_v24, %v2726_v15  ;;  %v3175_v9 = vadd.f32 %v2962_v24, %v2727_v55  ;;  %v3803_v55 = vld [vmem:[%s3902_s18 + $0x290] sm:$0xff]  ;;  %v8817_v35 = vld [vmem:[#allocation31_spill] sm:$0xff]  ;;  %v3804_v24 = vld [vmem:[%s3902_s18 + $0x298] sm:$0xff] }
 0x323   : > { %v2730_v63 = vmul.f32 %v3801_v23, %v8816_v33  ;;  %v2731_v51 = vmul.f32 %v3802_v41, %v8816_v33  ;;  %v2738_v3 = vmul.f32 %v3803_v55, %v8817_v35  ;;  %v3814_v55 = vld [vmem:[%s3902_s18 + $0x2b8] sm:$0xff] }
 0x324   : > { %3422 = vst [vmem:[%s7416_s28 + $0x1f0] sm:$0xff] %v3294_v7  ;;  %v2922_v13 = vpop.permute.xlu1 %2921  ;;  %v3302_v12 = vmax.f32 %v3174_v5, 0.0  ;;  %v3303_v11 = vmax.f32 %v3175_v9, 0.0  ;;  %v2739_v7 = vmul.f32 %v3804_v24, %v8817_v35 }
 0x325   : > { %3423 = vst.msk [vmem:[%s7416_s28 + $0x1f8] sm:$0xff] %vm351_vm0, %v3295_v18  ;;  %v3158_v17 = vadd.f32 %v2922_v13, %v2710_v56  ;;  %v3159_v61 = vadd.f32 %v2922_v13, %v2711_v42  ;;  %v3805_v42 = vld [vmem:[%s3902_s18 + $0x210] sm:$0xff]  ;;  %v8818_v13 = vld [vmem:[#allocation94_spill] sm:$0xff] }
 0x326   : > { %3430 = vst [vmem:[%s7416_s28 + $0x230] sm:$0xff] %v3302_v12  ;;  %v2722_v12 = vmul.f32 %v3805_v42, %v8818_v13 }
 0x327   : > { %v3286_v0 = vmax.f32 %v3158_v17, 0.0  ;;  %v3287_v32 = vmax.f32 %v3159_v61, 0.0  ;;  %v2957_v26 = vpop.permute.xlu0 %2956  ;;  %3431 = vst.msk [vmem:[%s7416_s28 + $0x238] sm:$0xff] %vm351_vm0, %v3303_v11  ;;  %v3806_v11 = vld [vmem:[%s3902_s18 + $0x218] sm:$0xff] }
 0x328   : > { %v3172_v27 = vadd.f32 %v2957_v26, %v2724_v52  ;;  %v3173_v20 = vadd.f32 %v2957_v26, %v2725_v57  ;;  %v2723_v17 = vmul.f32 %v3806_v11, %v8818_v13 }
 0x329   : > { %3414 = vst [vmem:[%s7416_s28 + $0x1b0] sm:$0xff] %v3286_v0  ;;  %v2977_v28 = vpop.permute.xlu2 %2976  ;;  %v3807_v0 = vld [vmem:[%s3902_s18 + $0x280] sm:$0xff] }
 0x32a   : > { %3415 = vst.msk [vmem:[%s7416_s28 + $0x1b8] sm:$0xff] %vm351_vm0, %v3287_v32  ;;  %v3300_v4 = vmax.f32 %v3172_v27, 0.0  ;;  %v3301_v34 = vmax.f32 %v3173_v20, 0.0  ;;  %v3180_v46 = vadd.f32 %v2977_v28, %v2732_v43  ;;  %v3181_v31 = vadd.f32 %v2977_v28, %v2733_v10  ;;  %v8819_v32 = vld [vmem:[#allocation15_spill] sm:$0xff]  ;;  %v3809_v27 = vld [vmem:[%s3902_s18 + $0x2c0] sm:$0xff]  ;;  %v8820_v20 = vld [vmem:[#allocation109_spill] sm:$0xff] }
 0x32b   : > { %v2736_v26 = vmul.f32 %v3807_v0, %v8819_v32  ;;  %v2737_v44 = vmul.f32 %v3808_v16, %v8819_v32  ;;  %v2744_v28 = vmul.f32 %v3809_v27, %v8820_v20 }
 0x32c   : > { %3428 = vst [vmem:[%s7416_s28 + $0x220] sm:$0xff] %v3300_v4  ;;  %v2937_v8 = vpop.permute.xlu1 %2936  ;;  %v3308_v47 = vmax.f32 %v3180_v46, 0.0  ;;  %v3309_v1 = vmax.f32 %v3181_v31, 0.0  ;;  %v3810_v4 = vld [vmem:[%s3902_s18 + $0x2c8] sm:$0xff] }
 0x32d   : > { %3429 = vst.msk [vmem:[%s7416_s28 + $0x228] sm:$0xff] %vm351_vm0, %v3301_v34  ;;  %v3164_v21 = vadd.f32 %v2937_v8, %v2716_v37  ;;  %v3165_v25 = vadd.f32 %v2937_v8, %v2717_v53  ;;  %v2745_v34 = vmul.f32 %v3810_v4, %v8820_v20  ;;  %v3811_v8 = vld [vmem:[%s3902_s18 + $0x240] sm:$0xff] }
 0x32e   : > { %3436 = vst [vmem:[%s7416_s28 + $0x260] sm:$0xff] %v3308_v47  ;;  %v8821_v47 = vld [vmem:[#allocation20_spill] sm:$0xff] }
 0x32f   : > { %v3292_v54 = vmax.f32 %v3164_v21, 0.0  ;;  %v3293_v15 = vmax.f32 %v3165_v25, 0.0  ;;  %v2972_v2 = vpop.permute.xlu0 %2971  ;;  %3437 = vst.msk [vmem:[%s7416_s28 + $0x268] sm:$0xff] %vm351_vm0, %v3309_v1  ;;  %v2728_v1 = vmul.f32 %v3811_v8, %v8821_v47  ;;  %v3812_v21 = vld [vmem:[%s3902_s18 + $0x248] sm:$0xff] }
 0x330   : > { %v3178_v18 = vadd.f32 %v2972_v2, %v2730_v63  ;;  %v3179_v5 = vadd.f32 %v2972_v2, %v2731_v51  ;;  %v2729_v25 = vmul.f32 %v3812_v21, %v8821_v47  ;;  %v3823_v21 = vld [vmem:[%s3902_s18 + $0x2a0] sm:$0xff] }
 0x331   : > { %3420 = vst [vmem:[%s7416_s28 + $0x1e0] sm:$0xff] %v3292_v54  ;;  %v2992_v9 = vpop.permute.xlu2 %2991  ;;  %v3813_v54 = vld [vmem:[%s3902_s18 + $0x2b0] sm:$0xff] }
 0x332   : > { %3421 = vst.msk [vmem:[%s7416_s28 + $0x1e8] sm:$0xff] %vm351_vm0, %v3293_v15  ;;  %v3306_v60 = vmax.f32 %v3178_v18, 0.0  ;;  %v3307_v39 = vmax.f32 %v3179_v5, 0.0  ;;  %v3186_v56 = vadd.f32 %v2992_v9, %v2738_v3  ;;  %v3187_v30 = vadd.f32 %v2992_v9, %v2739_v7  ;;  %v8822_v15 = vld [vmem:[#allocation35_spill] sm:$0xff]  ;;  %v3815_v18 = vld [vmem:[%s3902_s18 + $0x2f0] sm:$0xff] }
 0x333   : > { %v2742_v2 = vmul.f32 %v3813_v54, %v8822_v15  ;;  %v2743_v35 = vmul.f32 %v3814_v55, %v8822_v15  ;;  %v8823_v5 = vld [vmem:[#allocation36_spill] sm:$0xff] }
 0x334   : > { %3434 = vst [vmem:[%s7416_s28 + $0x250] sm:$0xff] %v3306_v60  ;;  %v2952_v61 = vpop.permute.xlu1 %2951  ;;  %v3314_v50 = vmax.f32 %v3186_v56, 0.0  ;;  %v3315_v52 = vmax.f32 %v3187_v30, 0.0  ;;  %v2750_v9 = vmul.f32 %v3815_v18, %v8823_v5  ;;  %v3816_v60 = vld [vmem:[%s3902_s18 + $0x2f8] sm:$0xff]  ;;  %v3825_v55 = vld [vmem:[%s3902_s18 + $0x310] sm:$0xff] }
 0x335   : > { %3435 = vst.msk [vmem:[%s7416_s28 + $0x258] sm:$0xff] %vm351_vm0, %v3307_v39  ;;  %v3170_v36 = vadd.f32 %v2952_v61, %v2722_v12  ;;  %v3171_v57 = vadd.f32 %v2952_v61, %v2723_v17  ;;  %v2751_v39 = vmul.f32 %v3816_v60, %v8823_v5  ;;  %v3817_v61 = vld [vmem:[%s3902_s18 + $0x270] sm:$0xff]  ;;  %v8827_v60 = vld [vmem:[#allocation7_spill] sm:$0xff] }
 0x336   : > { %3442 = vst [vmem:[%s7416_s28 + $0x290] sm:$0xff] %v3314_v50  ;;  %v8824_v50 = vld [vmem:[#allocation26_spill] sm:$0xff] }
 0x337   : > { %v3298_v43 = vmax.f32 %v3170_v36, 0.0  ;;  %v3299_v19 = vmax.f32 %v3171_v57, 0.0  ;;  %v2987_v10 = vpop.permute.xlu0 %2986  ;;  %3443 = vst.msk [vmem:[%s7416_s28 + $0x298] sm:$0xff] %vm351_vm0, %v3315_v52  ;;  %v2734_v52 = vmul.f32 %v3817_v61, %v8824_v50  ;;  %v3818_v36 = vld [vmem:[%s3902_s18 + $0x278] sm:$0xff] }
 0x338   : > { %v3184_v46 = vadd.f32 %v2987_v10, %v2736_v26  ;;  %v3185_v31 = vadd.f32 %v2987_v10, %v2737_v44  ;;  %v2735_v57 = vmul.f32 %v3818_v36, %v8824_v50  ;;  %v3820_v10 = vld [vmem:[%s3902_s18 + $0x2e8] sm:$0xff]  ;;  %v3829_v50 = vld [vmem:[%s3902_s18 + $0x2d0] sm:$0xff] }
 0x339   : > { %3426 = vst [vmem:[%s7416_s28 + $0x210] sm:$0xff] %v3298_v43  ;;  %v3007_v62 = vpop.permute.xlu2 %3006  ;;  %v3819_v43 = vld [vmem:[%s3902_s18 + $0x2e0] sm:$0xff]  ;;  %v2749_v27 = vmul.f32 %v3820_v10, %v7345_v40 }
 0x33a   : > { %3427 = vst.msk [vmem:[%s7416_s28 + $0x218] sm:$0xff] %vm351_vm0, %v3299_v19  ;;  %v3312_v6 = vmax.f32 %v3184_v46, 0.0  ;;  %v3313_v37 = vmax.f32 %v3185_v31, 0.0  ;;  %v3192_v59 = vadd.f32 %v3007_v62, %v2744_v28  ;;  %v3193_v53 = vadd.f32 %v3007_v62, %v2745_v34  ;;  %v3821_v34 = vld [vmem:[%s3902_s18 + $0x320] sm:$0xff]  ;;  %v8825_v46 = vld [vmem:[#allocation112_spill] sm:$0xff]  ;;  %v3822_v62 = vld [vmem:[%s3902_s18 + $0x328] sm:$0xff] }
 0x33b   : > { %v2748_v19 = vmul.f32 %v3819_v43, %v7345_v40  ;;  %v2756_v31 = vmul.f32 %v3821_v34, %v8825_v46 }
 0x33c   : > { %3440 = vst [vmem:[%s7416_s28 + $0x280] sm:$0xff] %v3312_v6  ;;  %v2967_v23 = vpop.permute.xlu1 %2966  ;;  %v3320_v33 = vmax.f32 %v3192_v59, 0.0  ;;  %v3321_v63 = vmax.f32 %v3193_v53, 0.0  ;;  %v2757_v6 = vmul.f32 %v3822_v62, %v8825_v46  ;;  %v3833_v46 = vld [vmem:[%s3902_s18 + $0x380] sm:$0xff]  ;;  %v3834_v62 = vld [vmem:[%s3902_s18 + $0x388] sm:$0xff] }
 0x33d   : > { %3441 = vst.msk [vmem:[%s7416_s28 + $0x288] sm:$0xff] %vm351_vm0, %v3313_v37  ;;  %v3176_v41 = vadd.f32 %v2967_v23, %v2728_v1  ;;  %v3177_v51 = vadd.f32 %v2967_v23, %v2729_v25  ;;  %v8826_v25 = vld [vmem:[#allocation6_spill] sm:$0xff] }
 0x33e   : > { %3448 = vst [vmem:[%s7416_s28 + $0x2c0] sm:$0xff] %v3320_v33  ;;  %v2740_v23 = vmul.f32 %v3823_v21, %v8826_v25  ;;  %v3824_v33 = vld [vmem:[%s3902_s18 + $0x2a8] sm:$0xff]  ;;  %v8829_v21 = vld [vmem:[#allocation30_spill] sm:$0xff] }
 0x33f   : > { %v3304_v3 = vmax.f32 %v3176_v41, 0.0  ;;  %v3305_v24 = vmax.f32 %v3177_v51, 0.0  ;;  %v3002_v7 = vpop.permute.xlu0 %3001  ;;  %3449 = vst.msk [vmem:[%s7416_s28 + $0x2c8] sm:$0xff] %vm351_vm0, %v3321_v63  ;;  %v2741_v63 = vmul.f32 %v3824_v33, %v8826_v25 }
 0x340   : > { %v3190_v56 = vadd.f32 %v3002_v7, %v2742_v2  ;;  %v3191_v30 = vadd.f32 %v3002_v7, %v2743_v35  ;;  %v2754_v35 = vmul.f32 %v3825_v55, %v7360_v48  ;;  %v3838_v55 = vld [vmem:[%s3902_s18 + $0x378] sm:$0xff] }
 0x341   : > { %3432 = vst [vmem:[%s7416_s28 + $0x240] sm:$0xff] %v3304_v3  ;;  %v3022_v42 = vpop.permute.xlu2 %3021  ;;  %v3826_v3 = vld [vmem:[%s3902_s18 + $0x318] sm:$0xff] }
 0x342   : > { %3433 = vst.msk [vmem:[%s7416_s28 + $0x248] sm:$0xff] %vm351_vm0, %v3305_v24  ;;  %v3318_v13 = vmax.f32 %v3190_v56, 0.0  ;;  %v3319_v12 = vmax.f32 %v3191_v30, 0.0  ;;  %v3198_v11 = vadd.f32 %v3022_v42, %v2750_v9  ;;  %v3199_v17 = vadd.f32 %v3022_v42, %v2751_v39  ;;  %v3827_v9 = vld [vmem:[%s3902_s18 + $0x350] sm:$0xff]  ;;  %v3828_v56 = vld [vmem:[%s3902_s18 + $0x358] sm:$0xff] }
 0x343   : > { %v2755_v24 = vmul.f32 %v3826_v3, %v7360_v48  ;;  %v2762_v39 = vmul.f32 %v3827_v9, %v8827_v60  ;;  %v2763_v30 = vmul.f32 %v3828_v56, %v8827_v60  ;;  %v3840_v9 = vld [vmem:[%s3902_s18 + $0x3b8] sm:$0xff] }
 0x344   : > { %3446 = vst [vmem:[%s7416_s28 + $0x2b0] sm:$0xff] %v3318_v13  ;;  %v2982_v0 = vpop.permute.xlu1 %2981  ;;  %v3326_v32 = vmax.f32 %v3198_v11, 0.0  ;;  %v3327_v26 = vmax.f32 %v3199_v17, 0.0  ;;  %v2775_v60 = vmul.f32 %v3840_v9, %v7380_v38 }
 0x345   : > { %3447 = vst.msk [vmem:[%s7416_s28 + $0x2b8] sm:$0xff] %vm351_vm0, %v3319_v12  ;;  %v3182_v16 = vadd.f32 %v2982_v0, %v2734_v52  ;;  %v3183_v44 = vadd.f32 %v2982_v0, %v2735_v57  ;;  %v8828_v52 = vld [vmem:[#allocation43_spill] sm:$0xff]  ;;  %v3830_v57 = vld [vmem:[%s3902_s18 + $0x2d8] sm:$0xff] }
 0x346   : > { %3454 = vst [vmem:[%s7416_s28 + $0x2f0] sm:$0xff] %v3326_v32  ;;  %v2746_v36 = vmul.f32 %v3829_v50, %v8828_v52  ;;  %v2747_v0 = vmul.f32 %v3830_v57, %v8828_v52 }
 0x347   : > { %v3310_v20 = vmax.f32 %v3182_v16, 0.0  ;;  %v3311_v28 = vmax.f32 %v3183_v44, 0.0  ;;  %v3017_v4 = vpop.permute.xlu0 %3016  ;;  %3455 = vst.msk [vmem:[%s7416_s28 + $0x2f8] sm:$0xff] %vm351_vm0, %v3327_v26 }
 0x348   : > { %v3196_v37 = vadd.f32 %v3017_v4, %v2748_v19  ;;  %v3197_v59 = vadd.f32 %v3017_v4, %v2749_v27  ;;  %v3831_v19 = vld [vmem:[%s3902_s18 + $0x340] sm:$0xff]  ;;  %v3832_v27 = vld [vmem:[%s3902_s18 + $0x348] sm:$0xff] }
 0x349   : > { %3438 = vst [vmem:[%s7416_s28 + $0x270] sm:$0xff] %v3310_v20  ;;  %v3037_v40 = vpop.permute.xlu2 %3036  ;;  %v2760_v10 = vmul.f32 %v3831_v19, %v7375_v29  ;;  %v2761_v20 = vmul.f32 %v3832_v27, %v7375_v29  ;;  %v3845_v27 = vld [vmem:[%s3902_s18 + $0x3e0] sm:$0xff] }
 0x34a   : > { %3439 = vst.msk [vmem:[%s7416_s28 + $0x278] sm:$0xff] %vm351_vm0, %v3311_v28  ;;  %v3324_v53 = vmax.f32 %v3196_v37, 0.0  ;;  %v3325_v8 = vmax.f32 %v3197_v59, 0.0  ;;  %v3204_v47 = vadd.f32 %v3037_v40, %v2756_v31  ;;  %v3205_v1 = vadd.f32 %v3037_v40, %v2757_v6 }
 0x34b   : > { %v2768_v31 = vmul.f32 %v3833_v46, %v7365_v14  ;;  %v2769_v6 = vmul.f32 %v3834_v62, %v7365_v14 }
 0x34c   : > { %3452 = vst [vmem:[%s7416_s28 + $0x2e0] sm:$0xff] %v3324_v53  ;;  %v2997_v41 = vpop.permute.xlu1 %2996  ;;  %v3332_v51 = vmax.f32 %v3204_v47, 0.0  ;;  %v3333_v54 = vmax.f32 %v3205_v1, 0.0  ;;  %v3835_v1 = vld [vmem:[%s3902_s18 + $0x300] sm:$0xff] }
 0x34d   : > { %3453 = vst.msk [vmem:[%s7416_s28 + $0x2e8] sm:$0xff] %vm351_vm0, %v3325_v8  ;;  %v3188_v15 = vadd.f32 %v2997_v41, %v2740_v23  ;;  %v3189_v2 = vadd.f32 %v2997_v41, %v2741_v63  ;;  %v2752_v25 = vmul.f32 %v3835_v1, %v8829_v21  ;;  %v3836_v23 = vld [vmem:[%s3902_s18 + $0x308] sm:$0xff] }
 0x34e   : > { %3460 = vst [vmem:[%s7416_s28 + $0x320] sm:$0xff] %v3332_v51  ;;  %v2753_v14 = vmul.f32 %v3836_v23, %v8829_v21  ;;  %v3849_v23 = vld [vmem:[%s3902_s18 + $0x3d0] sm:$0xff] }
 0x34f   : > { %v3316_v7 = vmax.f32 %v3188_v15, 0.0  ;;  %v3317_v18 = vmax.f32 %v3189_v2, 0.0  ;;  %v3032_v5 = vpop.permute.xlu0 %3031  ;;  %3461 = vst.msk [vmem:[%s7416_s28 + $0x328] sm:$0xff] %vm351_vm0, %v3333_v54  ;;  %v3837_v15 = vld [vmem:[%s3902_s18 + $0x370] sm:$0xff] }
 0x350   : > { %v3202_v42 = vadd.f32 %v3032_v5, %v2754_v35  ;;  %v3203_v13 = vadd.f32 %v3032_v5, %v2755_v24  ;;  %v2766_v2 = vmul.f32 %v3837_v15, %v7390_v22  ;;  %v2767_v35 = vmul.f32 %v3838_v55, %v7390_v22 }
 0x351   : > { %3444 = vst [vmem:[%s7416_s28 + $0x2a0] sm:$0xff] %v3316_v7  ;;  %v3052_v48 = vpop.permute.xlu2 %3051 }
 0x352   : > { %3445 = vst.msk [vmem:[%s7416_s28 + $0x2a8] sm:$0xff] %vm351_vm0, %v3317_v18  ;;  %v3330_v12 = vmax.f32 %v3202_v42, 0.0  ;;  %v3331_v11 = vmax.f32 %v3203_v13, 0.0  ;;  %v3210_v17 = vadd.f32 %v3052_v48, %v2762_v39  ;;  %v3211_v61 = vadd.f32 %v3052_v48, %v2763_v30  ;;  %v3839_v18 = vld [vmem:[%s3902_s18 + $0x3b0] sm:$0xff] }
 0x353   : > { %v2774_v5 = vmul.f32 %v3839_v18, %v7380_v38 }
 0x354   : > { %3458 = vst [vmem:[%s7416_s28 + $0x310] sm:$0xff] %v3330_v12  ;;  %v3012_v32 = vpop.permute.xlu1 %3011  ;;  %v3338_v26 = vmax.f32 %v3210_v17, 0.0  ;;  %v3339_v16 = vmax.f32 %v3211_v61, 0.0  ;;  %v3841_v12 = vld [vmem:[%s3902_s18 + $0x330] sm:$0xff]  ;;  %v3842_v61 = vld [vmem:[%s3902_s18 + $0x338] sm:$0xff] }
 0x355   : > { %3459 = vst.msk [vmem:[%s7416_s28 + $0x318] sm:$0xff] %vm351_vm0, %v3331_v11  ;;  %v3194_v44 = vadd.f32 %v3012_v32, %v2746_v36  ;;  %v3195_v43 = vadd.f32 %v3012_v32, %v2747_v0  ;;  %v8830_v11 = vld [vmem:[#allocation105_spill] sm:$0xff]  ;;  %v3843_v32 = vld [vmem:[%s3902_s18 + $0x3a0] sm:$0xff] }
 0x356   : > { %3466 = vst [vmem:[%s7416_s28 + $0x350] sm:$0xff] %v3338_v26  ;;  %v2758_v17 = vmul.f32 %v3841_v12, %v8830_v11  ;;  %v2759_v38 = vmul.f32 %v3842_v61, %v8830_v11  ;;  %v2772_v26 = vmul.f32 %v3843_v32, %v7407_v49 }
 0x357   : > { %v3322_v28 = vmax.f32 %v3194_v44, 0.0  ;;  %v3323_v4 = vmax.f32 %v3195_v43, 0.0  ;;  %v3047_v34 = vpop.permute.xlu0 %3046  ;;  %3467 = vst.msk [vmem:[%s7416_s28 + $0x358] sm:$0xff] %vm351_vm0, %v3339_v16  ;;  %v3844_v16 = vld [vmem:[%s3902_s18 + $0x3a8] sm:$0xff] }
 0x358   : > { %v3208_v37 = vadd.f32 %v3047_v34, %v2760_v10  ;;  %v3209_v59 = vadd.f32 %v3047_v34, %v2761_v20  ;;  %v2773_v44 = vmul.f32 %v3844_v16, %v7407_v49  ;;  %v2780_v20 = vmul.f32 %v3845_v27, %v7395_v45 }
 0x359   : > { %3450 = vst [vmem:[%s7416_s28 + $0x2d0] sm:$0xff] %v3322_v28  ;;  %v3067_v29 = vpop.permute.xlu2 %3066  ;;  %v3846_v28 = vld [vmem:[%s3902_s18 + $0x3e8] sm:$0xff] }
 0x35a   : > { %3451 = vst.msk [vmem:[%s7416_s28 + $0x2d8] sm:$0xff] %vm351_vm0, %v3323_v4  ;;  %v3336_v40 = vmax.f32 %v3208_v37, 0.0  ;;  %v3337_v53 = vmax.f32 %v3209_v59, 0.0  ;;  %v3216_v8 = vadd.f32 %v3067_v29, %v2768_v31  ;;  %v3217_v47 = vadd.f32 %v3067_v29, %v2769_v6  ;;  %v3847_v59 = vld [vmem:[%s3902_s18 + $0x360] sm:$0xff] }
 0x35b   : > { %v2781_v4 = vmul.f32 %v3846_v28, %v7395_v45  ;;  %v8831_v29 = vld [vmem:[#allocation34_spill] sm:$0xff] }
 0x35c   : > { %3464 = vst [vmem:[%s7416_s28 + $0x340] sm:$0xff] %v3336_v40  ;;  %v3027_v33 = vpop.permute.xlu1 %3026  ;;  %v3344_v63 = vmax.f32 %v3216_v8, 0.0  ;;  %v3345_v41 = vmax.f32 %v3217_v47, 0.0  ;;  %v2764_v40 = vmul.f32 %v3847_v59, %v8831_v29 }
 0x35d   : > { %3465 = vst.msk [vmem:[%s7416_s28 + $0x348] sm:$0xff] %vm351_vm0, %v3337_v53  ;;  %v3200_v51 = vadd.f32 %v3027_v33, %v2752_v25  ;;  %v3201_v54 = vadd.f32 %v3027_v33, %v2753_v14  ;;  %v3848_v53 = vld [vmem:[%s3902_s18 + $0x368] sm:$0xff]  ;;  %v2778_v14 = vmul.f32 %v3849_v23, %v7437_v58  ;;  %v3850_v33 = vld [vmem:[%s3902_s18 + $0x3d8] sm:$0xff] }
 0x35e   : > { %3472 = vst [vmem:[%s7416_s28 + $0x380] sm:$0xff] %v3344_v63  ;;  %v2765_v45 = vmul.f32 %v3848_v53, %v8831_v29  ;;  %v2779_v63 = vmul.f32 %v3850_v33, %v7437_v58  ;;  %v3851_v58 = vld [vmem:[%s3902_s18 + $0x390] sm:$0xff] }
 0x35f   : > { %v3328_v3 = vmax.f32 %v3200_v51, 0.0  ;;  %v3329_v24 = vmax.f32 %v3201_v54, 0.0  ;;  %v3062_v7 = vpop.permute.xlu0 %3061  ;;  %3473 = vst.msk [vmem:[%s7416_s28 + $0x388] sm:$0xff] %vm351_vm0, %v3345_v41 }
 0x360   : > { %v3214_v39 = vadd.f32 %v3062_v7, %v2766_v2  ;;  %v3215_v56 = vadd.f32 %v3062_v7, %v2767_v35  ;;  %v3852_v7 = vld [vmem:[%s3902_s18 + $0x398] sm:$0xff] }
 0x361   : > { %3456 = vst [vmem:[%s7416_s28 + $0x300] sm:$0xff] %v3328_v3  ;;  %v3082_v22 = vpop.permute.xlu2 %3081  ;;  %v8832_v3 = vld [vmem:[#allocation40_spill] sm:$0xff] }
 0x362   : > { %3457 = vst.msk [vmem:[%s7416_s28 + $0x308] sm:$0xff] %vm351_vm0, %v3329_v24  ;;  %v3342_v30 = vmax.f32 %v3214_v39, 0.0  ;;  %v3343_v42 = vmax.f32 %v3215_v56, 0.0  ;;  %v3222_v13 = vadd.f32 %v3082_v22, %v2774_v5  ;;  %v3223_v48 = vadd.f32 %v3082_v22, %v2775_v60  ;;  %v3853_v22 = vld [vmem:[%s3902_s18 + $0x3c0] sm:$0xff] }
 0x363   : > { %v2770_v24 = vmul.f32 %v3851_v58, %v8832_v3  ;;  %v2771_v18 = vmul.f32 %v3852_v7, %v8832_v3 }
 0x364   : > { %3470 = vst [vmem:[%s7416_s28 + $0x370] sm:$0xff] %v3342_v30  ;;  %v3042_v50 = vpop.permute.xlu1 %3041  ;;  %v3350_v52 = vmax.f32 %v3222_v13, 0.0  ;;  %v3351_v36 = vmax.f32 %v3223_v48, 0.0  ;;  %v8833_v30 = vld [vmem:[#allocation108_spill] sm:$0xff]  ;;  %v3854_v13 = vld [vmem:[%s3902_s18 + $0x3c8] sm:$0xff] }
 0x365   : > { %3471 = vst.msk [vmem:[%s7416_s28 + $0x378] sm:$0xff] %vm351_vm0, %v3343_v42  ;;  %v3206_v57 = vadd.f32 %v3042_v50, %v2758_v17  ;;  %v3207_v0 = vadd.f32 %v3042_v50, %v2759_v38  ;;  %v2776_v42 = vmul.f32 %v3853_v22, %v8833_v30  ;;  %v2777_v48 = vmul.f32 %v3854_v13, %v8833_v30  ;;  %v3855_v50 = vld [vmem:[%s3902_s18 + $0x3f0] sm:$0xff] }
 0x366   : > { %3478 = vst [vmem:[%s7416_s28 + $0x3b0] sm:$0xff] %v3350_v52  ;;  %v8834_v52 = vld [vmem:[#allocation38_spill] sm:$0xff] }
 0x367   : > { %v3334_v43 = vmax.f32 %v3206_v57, 0.0  ;;  %v3335_v19 = vmax.f32 %v3207_v0, 0.0  ;;  %v3077_v10 = vpop.permute.xlu0 %3076  ;;  %3479 = vst.msk [vmem:[%s7416_s28 + $0x3b8] sm:$0xff] %vm351_vm0, %v3351_v36  ;;  %v2782_v36 = vmul.f32 %v3855_v50, %v8834_v52  ;;  %v3856_v57 = vld [vmem:[%s3902_s18 + $0x3f8] sm:$0xff] }
 0x368   : > { %v3220_v34 = vadd.f32 %v3077_v10, %v2772_v26  ;;  %v3221_v46 = vadd.f32 %v3077_v10, %v2773_v44  ;;  %v2783_v0 = vmul.f32 %v3856_v57, %v8834_v52 }
 0x369   : > { %3462 = vst [vmem:[%s7416_s28 + $0x330] sm:$0xff] %v3334_v43  ;;  %v3097_v49 = vpop.permute.xlu2 %3096 }
 0x36a   : > { %3463 = vst.msk [vmem:[%s7416_s28 + $0x338] sm:$0xff] %vm351_vm0, %v3335_v19  ;;  %v3348_v31 = vmax.f32 %v3220_v34, 0.0  ;;  %v3349_v62 = vmax.f32 %v3221_v46, 0.0  ;;  %v3228_v6 = vadd.f32 %v3097_v49, %v2780_v20  ;;  %v3229_v37 = vadd.f32 %v3097_v49, %v2781_v4 }
 0x36c   : > { %3476 = vst [vmem:[%s7416_s28 + $0x3a0] sm:$0xff] %v3348_v31  ;;  %v3057_v8 = vpop.permute.xlu1 %3056  ;;  %v3356_v47 = vmax.f32 %v3228_v6, 0.0  ;;  %v3357_v1 = vmax.f32 %v3229_v37, 0.0 }
 0x36d   : > { %3477 = vst.msk [vmem:[%s7416_s28 + $0x3a8] sm:$0xff] %vm351_vm0, %v3349_v62  ;;  %v3212_v21 = vadd.f32 %v3057_v8, %v2764_v40  ;;  %v3213_v25 = vadd.f32 %v3057_v8, %v2765_v45 }
 0x36e   : > { %3484 = vst [vmem:[%s7416_s28 + $0x3e0] sm:$0xff] %v3356_v47 }
 0x36f   : > { %v3340_v41 = vmax.f32 %v3212_v21, 0.0  ;;  %v3341_v51 = vmax.f32 %v3213_v25, 0.0  ;;  %v3092_v54 = vpop.permute.xlu0 %3091  ;;  %3485 = vst.msk [vmem:[%s7416_s28 + $0x3e8] sm:$0xff] %vm351_vm0, %v3357_v1 }
 0x370   : > { %v3226_v15 = vadd.f32 %v3092_v54, %v2778_v14  ;;  %v3227_v2 = vadd.f32 %v3092_v54, %v2779_v63 }
 0x371   : > { %3468 = vst [vmem:[%s7416_s28 + $0x360] sm:$0xff] %v3340_v41 }
 0x372   : > { %3469 = vst.msk [vmem:[%s7416_s28 + $0x368] sm:$0xff] %vm351_vm0, %v3341_v51  ;;  %v3354_v55 = vmax.f32 %v3226_v15, 0.0  ;;  %v3355_v35 = vmax.f32 %v3227_v2, 0.0 }
 0x374   : > { %3482 = vst [vmem:[%s7416_s28 + $0x3d0] sm:$0xff] %v3354_v55  ;;  %v3072_v5 = vpop.permute.xlu1 %3071 }
 0x375   : > { %3483 = vst.msk [vmem:[%s7416_s28 + $0x3d8] sm:$0xff] %vm351_vm0, %v3355_v35  ;;  %v3218_v9 = vadd.f32 %v3072_v5, %v2770_v24  ;;  %v3219_v60 = vadd.f32 %v3072_v5, %v2771_v18 }
 0x377   : > { %v3346_v39 = vmax.f32 %v3218_v9, 0.0  ;;  %v3347_v56 = vmax.f32 %v3219_v60, 0.0 }
 0x379   : > { %3474 = vst [vmem:[%s7416_s28 + $0x390] sm:$0xff] %v3346_v39 }
 0x37a   : > { %3475 = vst.msk [vmem:[%s7416_s28 + $0x398] sm:$0xff] %vm351_vm0, %v3347_v56 }
 0x37c   : > { %v3087_v12 = vpop.permute.xlu1 %3086 }
 0x37d   : > { %v3224_v11 = vadd.f32 %v3087_v12, %v2776_v42  ;;  %v3225_v17 = vadd.f32 %v3087_v12, %v2777_v48 }
 0x37f   : > { %v3352_v61 = vmax.f32 %v3224_v11, 0.0  ;;  %v3353_v38 = vmax.f32 %v3225_v17, 0.0 }
 0x381   : > { %3480 = vst [vmem:[%s7416_s28 + $0x3c0] sm:$0xff] %v3352_v61 }
 0x382   : > { %3481 = vst.msk [vmem:[%s7416_s28 + $0x3c8] sm:$0xff] %vm351_vm0, %v3353_v38 }
 0x384   : > { %v3102_v32 = vpop.permute.xlu1 %3101 }
 0x385   : > { %v3230_v26 = vadd.f32 %v3102_v32, %v2782_v36  ;;  %v3231_v16 = vadd.f32 %v3102_v32, %v2783_v0 }
 0x387   : > { %v3358_v44 = vmax.f32 %v3230_v26, 0.0  ;;  %v3359_v43 = vmax.f32 %v3231_v16, 0.0 }
 0x389   : > { %3486 = vst [vmem:[%s7416_s28 + $0x3f0] sm:$0xff] %v3358_v44 }
 0x38a   : > { %3487 = vst.msk [vmem:[%s7416_s28 + $0x3f8] sm:$0xff] %vm351_vm0, %v3359_v43 }
 0x38b PF: > { %s13_s12 = sadd.s32 1, %s3863_s12  }
 0x38c   : > { %p10_p4 = scmp.ge.s32.totalorder %s13_s12, 4  }
 0x38e   :  { %12 = sbr.rel (!%p10_p4) target bundleno = 1 (0x1), region = 68 }

</bundles_post_ra>
